<compile_context>
chip_gen: v5e
topology: v5e:2x2
jax: 0.10.0
libtpu: 0.0.40
codegen_flags: <defaults>
</compile_context>

<pallas_src>
import functools

import jax
import jax.numpy as jnp
from jax import lax
from jax.experimental import pallas as pl
from jax.experimental.pallas import tpu as pltpu

EPS = 1e-12  # torch.nn.functional.normalize default eps


def _l2_normalize(v, axis):
    # F.normalize: v / max(||v||_2, eps)  ==  v * rsqrt(max(sumsq, eps^2)).
    # rsqrt goes to the EUP slot; the tensor itself is a broadcast multiply.
    sumsq = jnp.sum(v * v, axis=axis, keepdims=True)
    return v * lax.rsqrt(jnp.maximum(sumsq, EPS * EPS))


def _eaa_kernel(x_ref, wqk_ref, bqk_ref, wg_ref, wt_ref, bt_ref, o_ref, *,
                scale, bb, n, d):
    m = bb * n
    x = x_ref[...].reshape(m, x_ref.shape[-1])          # (M, Din)

    # fused [query | key] projection: one MXU matmul, output width 2*D.
    qk = jnp.dot(x, wqk_ref[...], preferred_element_type=jnp.float32)
    qk = qk + bqk_ref[...]
    q = _l2_normalize(qk[:, :d], axis=-1)               # (M, D) f32
    k = _l2_normalize(qk[:, d:], axis=-1)               # (M, D) f32

    # per-batch token-axis math needs the (BB, N, .) view.
    q3 = q.reshape(bb, n, d)
    k3 = k.reshape(bb, n, d)

    # query_weight = query @ w_g done as a VPU multiply + lane reduce
    # (a matmul with output width 1 wastes an MXU pass + masked stores).
    qw = jnp.sum(q3 * wg_ref[...].reshape(1, 1, d), axis=-1, keepdims=True)
    A = _l2_normalize(qw * scale, axis=1)                # F.normalize(A, dim=1)

    # G = sum over tokens of A * query -> (BB, 1, D), broadcast over tokens.
    G = jnp.sum(A * q3, axis=1, keepdims=True)
    gk = (G * k3).reshape(m, d)

    # folded+fused tail:  y = [gk | q] @ [wp@wf ; wf] + (bp@wf + bf)
    # (single MXU pass, K = 2*D; both halves are 512-lane aligned)
    tail_in = jnp.concatenate([gk, q], axis=-1).astype(wt_ref.dtype)  # (M, 2D)
    y = jnp.dot(tail_in, wt_ref[...],
                preferred_element_type=jnp.float32) + bt_ref[...]
    o_ref[...] = y.reshape(bb, n, -1).astype(o_ref.dtype)


def efficient_additive_attention(x, params, *, token_dim, num_heads=1,
                                 batch_block=None,
                                 matmul_dtype=jnp.float32,
                                 out_dtype=None):
    B, N, Din = x.shape
    D = token_dim * num_heads
    scale = token_dim ** (-0.5)
    out_dtype = x.dtype if out_dtype is None else out_dtype
    f32 = jnp.float32

    wq, bq, wk, bk, wg, wp, bp, wf, bf = params

    # fuse to_query / to_key into one (Din, 2D) weight -> one matmul per step.
    wqk = jnp.concatenate([wq, wk], axis=1).astype(matmul_dtype)
    bqk = jnp.concatenate([bq, bk], axis=1).astype(f32)
    wg_row = wg.reshape(1, D).astype(f32)               # VPU/EUP math stays f32

    # fold Proj + final (done in f32, cast once to matmul_dtype):
    #   final(Proj(gk) + bp + q) = gk @ (wp@wf) + q @ wf + (bp@wf + bf)
    wpf = jnp.dot(wp.astype(f32), wf.astype(f32))                    # (D, Tk)
    b_fold = jnp.dot(bp.astype(f32), wf.astype(f32)) + bf.astype(f32)  # (1, Tk)
    w_tail = jnp.concatenate([wpf, wf.astype(f32)], axis=0).astype(matmul_dtype)

    x_c = x.astype(matmul_dtype)                         # halves x DMA in bf16

    # Default: whole batch in a single grid step -> M = B*N per matmul.
    # (v5e/v6e: single TC, grid length >1 only adds overhead.  v7x: only pass
    # batch_block to split across the 2 TCs when per-TC activation work
    # amortizes the replicated weight DMA; keep each block's bb*N >= 256.)
    bb = B if batch_block is None else min(batch_block, B)
    n_blocks = pl.cdiv(B, bb)
    Bp = n_blocks * bb
    if Bp != B:
        x_c = jnp.pad(x_c, ((0, Bp - B), (0, 0), (0, 0)))

    def rep(shape):
        nd = len(shape)
        return pl.BlockSpec(shape, lambda b, _n=nd: (0,) * _n)

    kernel = functools.partial(_eaa_kernel, scale=scale, bb=bb, n=N, d=D)

    # advisory cost so XLA overlaps neighbouring DeepFI stages with this call.
    itemsize = jnp.dtype(matmul_dtype).itemsize
    flops = 2 * Bp * N * (Din * 2 * D + 2 * D * token_dim)
    transcendentals = 2 * Bp * N + Bp                    # rsqrt per q/k row + A
    bytes_accessed = (x_c.size * itemsize
                      + (wqk.size + w_tail.size) * itemsize
                      + (bqk.size + wg_row.size + b_fold.size) * 4
                      + Bp * N * token_dim * jnp.dtype(out_dtype).itemsize)
    cost = pl.CostEstimate(flops=flops, transcendentals=transcendentals,
                           bytes_accessed=bytes_accessed)

    out = pl.pallas_call(
        kernel,
        out_shape=jax.ShapeDtypeStruct((Bp, N, token_dim), out_dtype),
        grid=(n_blocks,),
        in_specs=[
            pl.BlockSpec((bb, N, Din), lambda b: (b, 0, 0)),   # x
            rep(wqk.shape), rep(bqk.shape),
            rep(wg_row.shape),
            rep(w_tail.shape), rep(b_fold.shape),
        ],
        out_specs=pl.BlockSpec((bb, N, token_dim), lambda b: (b, 0, 0)),
        compiler_params=pltpu.CompilerParams(
            dimension_semantics=("parallel",),
            # per-step working set is ~2 MiB even with double-buffered weights;
            # stays far under v7x's 64 MiB physical VMEM.
            vmem_limit_bytes=32 * 1024 * 1024,
        ),
        cost_estimate=cost,
    )(x_c, wqk, bqk, wg_row, w_tail, b_fold)

    return out[:B] if Bp != B else out


def _reference(x, params, *, token_dim, num_heads=1):
    # Pure-JAX f32 reference mirroring the PyTorch forward exactly
    # (unfolded Proj + final, separate q/k projections).
    wq, bq, wk, bk, wg, wp, bp, wf, bf = params
    scale = token_dim ** (-0.5)

    q = jnp.einsum('bnd,df->bnf', x, wq) + bq
    k = jnp.einsum('bnd,df->bnf', x, wk) + bk
    q = _l2_normalize(q, axis=-1)
    k = _l2_normalize(k, axis=-1)
    qw = jnp.einsum('bnd,do->bno', q, wg)          # (B, N, 1)
    A = _l2_normalize(qw * scale, axis=1)          # normalize over tokens
    G = jnp.sum(A * q, axis=1, keepdims=True)      # (B, 1, D)
    out = jnp.einsum('bnd,df->bnf', G * k, wp) + bp + q
    return jnp.einsum('bnd,df->bnf', out, wf) + bf


if __name__ == "__main__":
    # Shapes from DeepFI.post_combine_attn: in_dims=128, token_dim=128, heads=4.
    # B=8, N=16 -> M = B*N = 128 rows per matmul (fills the MXU M dimension).
    B, N, IN_DIMS, TOKEN_DIM, NUM_HEADS = 8, 16, 128, 128, 4
    D = TOKEN_DIM * NUM_HEADS

    key = jax.random.PRNGKey(0)
    ks = jax.random.split(key, 10)

    # Deterministic synthetic parameter init (shapes from the module __init__).
    # Linear weights stored transposed: (in_features, out_features).
    wq = 0.1 * jax.random.normal(ks[0], (IN_DIMS, D), jnp.float32)
    bq = 0.1 * jax.random.normal(ks[1], (1, D), jnp.float32)
    wk = 0.1 * jax.random.normal(ks[2], (IN_DIMS, D), jnp.float32)
    bk = 0.1 * jax.random.normal(ks[3], (1, D), jnp.float32)
    wg = jax.random.normal(ks[4], (D, 1), jnp.float32)          # nn.Parameter randn
    wp = 0.1 * jax.random.normal(ks[5], (D, D), jnp.float32)
    bp = 0.1 * jax.random.normal(ks[6], (1, D), jnp.float32)
    wf = 0.1 * jax.random.normal(ks[7], (D, TOKEN_DIM), jnp.float32)
    bf = 0.1 * jax.random.normal(ks[8], (1, TOKEN_DIM), jnp.float32)
    params = (wq, bq, wk, bk, wg, wp, bp, wf, bf)

    x = jax.random.normal(ks[9], (B, N, IN_DIMS), jnp.float32)

    ref = _reference(x, params, token_dim=TOKEN_DIM, num_heads=NUM_HEADS)

    # f32 path: single grid step (default batch_block=B), folded/fused tail.
    out = efficient_additive_attention(x, params, token_dim=TOKEN_DIM,
                                       num_heads=NUM_HEADS)
    out = jax.block_until_ready(out)
    assert out.shape == (B, N, TOKEN_DIM)
    assert jnp.allclose(out, ref, atol=1e-4, rtol=1e-4), "f32 mismatch vs reference"

    # bf16 MXU-operand path — valid on all generations incl. v5e (MXU supports
    # bf16 operands; all VPU/EUP math stays f32; f32 accumulation).
    out_bf = efficient_additive_attention(x, params, token_dim=TOKEN_DIM,
                                          num_heads=NUM_HEADS,
                                          matmul_dtype=jnp.bfloat16)
    out_bf = jax.block_until_ready(out_bf)
    assert jnp.allclose(out_bf, ref, atol=2e-2, rtol=2e-2), "bf16 mismatch vs reference"

    print("KERNEL_OK")
</pallas_src>

<mosaic_0001>
module attributes {stable_mosaic.version = 11 : i64} {
  func.func @_eaa_kernel(%arg0: i32, %arg1: memref<8x16x128xf32, #tpu.memory_space<vmem>>, %arg2: memref<128x1024xf32, #tpu.memory_space<vmem>>, %arg3: memref<1x1024xf32, #tpu.memory_space<vmem>>, %arg4: memref<1x512xf32, #tpu.memory_space<vmem>>, %arg5: memref<1024x128xf32, #tpu.memory_space<vmem>>, %arg6: memref<1x128xf32, #tpu.memory_space<vmem>>, %arg7: memref<8x16x128xf32, #tpu.memory_space<vmem>>) attributes {dimension_semantics = [#tpu.dimension_semantics<parallel>], iteration_bounds = array<i64: 1>, scalar_prefetch = 0 : i64, scratch_operands = 0 : i64, tpu.core_type = #tpu.core_type<tc>, window_params = [{transform_indices = @transform_0, window_bounds = array<i64: 8, 16, 128>}, {pipeline_mode = #tpu.pipeline_mode<synchronous>, transform_indices = @transform_1, window_bounds = array<i64: 128, 1024>}, {pipeline_mode = #tpu.pipeline_mode<synchronous>, transform_indices = @transform_2, window_bounds = array<i64: 1, 1024>}, {pipeline_mode = #tpu.pipeline_mode<synchronous>, transform_indices = @transform_3, window_bounds = array<i64: 1, 512>}, {pipeline_mode = #tpu.pipeline_mode<synchronous>, transform_indices = @transform_4, window_bounds = array<i64: 1024, 128>}, {pipeline_mode = #tpu.pipeline_mode<synchronous>, transform_indices = @transform_5, window_bounds = array<i64: 1, 128>}, {transform_indices = @transform_6, window_bounds = array<i64: 8, 16, 128>}]} {
    %c0 = arith.constant 0 : index
    %c0_0 = arith.constant 0 : index
    %c0_1 = arith.constant 0 : index
    %0 = vector.load %arg1[%c0, %c0_0, %c0_1] : memref<8x16x128xf32, #tpu.memory_space<vmem>>, vector<8x16x128xf32>
    %1 = vector.shape_cast %0 : vector<8x16x128xf32> to vector<128x128xf32>
    %c0_2 = arith.constant 0 : index
    %c0_3 = arith.constant 0 : index
    %2 = vector.load %arg2[%c0_2, %c0_3] : memref<128x1024xf32, #tpu.memory_space<vmem>>, vector<128x1024xf32>
    %cst = arith.constant dense<0.000000e+00> : vector<128x1024xf32>
    %3 = tpu.matmul %1, %2, %cst {dimension_numbers = #tpu.dot_dimension_numbers<[1], [0], [0], [1], [0, 0, 1, 1], [], []>} : vector<128x128xf32>, vector<128x1024xf32>, vector<128x1024xf32> -> vector<128x1024xf32>
    %c0_4 = arith.constant 0 : index
    %c0_5 = arith.constant 0 : index
    %4 = vector.load %arg3[%c0_4, %c0_5] : memref<1x1024xf32, #tpu.memory_space<vmem>>, vector<1x1024xf32>
    %5 = vector.broadcast %4 : vector<1x1024xf32> to vector<128x1024xf32>
    %6 = arith.addf %3, %5 : vector<128x1024xf32>
    %7 = vector.extract_strided_slice %6 {offsets = [0, 0], sizes = [128, 512], strides = [1, 1]} : vector<128x1024xf32> to vector<128x512xf32>
    %8 = arith.mulf %7, %7 : vector<128x512xf32>
    %cst_6 = arith.constant dense<0.000000e+00> : vector<128xf32>
    %9 = vector.multi_reduction <add>, %8, %cst_6 [1] : vector<128x512xf32> to vector<128xf32>
    %10 = vector.shape_cast %9 : vector<128xf32> to vector<128x1xf32>
    %cst_7 = arith.constant 1.000000e-24 : f32
    %11 = vector.broadcast %cst_7 : f32 to vector<128x1xf32>
    %12 = arith.maximumf %10, %11 : vector<128x1xf32>
    %13 = math.rsqrt %12 : vector<128x1xf32>
    %14 = vector.broadcast %13 : vector<128x1xf32> to vector<128x512xf32>
    %15 = arith.mulf %7, %14 : vector<128x512xf32>
    %16 = vector.extract_strided_slice %6 {offsets = [0, 512], sizes = [128, 512], strides = [1, 1]} : vector<128x1024xf32> to vector<128x512xf32>
    %17 = arith.mulf %16, %16 : vector<128x512xf32>
    %cst_8 = arith.constant dense<0.000000e+00> : vector<128xf32>
    %18 = vector.multi_reduction <add>, %17, %cst_8 [1] : vector<128x512xf32> to vector<128xf32>
    %19 = vector.shape_cast %18 : vector<128xf32> to vector<128x1xf32>
    %cst_9 = arith.constant 1.000000e-24 : f32
    %20 = vector.broadcast %cst_9 : f32 to vector<128x1xf32>
    %21 = arith.maximumf %19, %20 : vector<128x1xf32>
    %22 = math.rsqrt %21 : vector<128x1xf32>
    %23 = vector.broadcast %22 : vector<128x1xf32> to vector<128x512xf32>
    %24 = arith.mulf %16, %23 : vector<128x512xf32>
    %25 = vector.shape_cast %15 : vector<128x512xf32> to vector<8x16x512xf32>
    %26 = vector.shape_cast %24 : vector<128x512xf32> to vector<8x16x512xf32>
    %c0_10 = arith.constant 0 : index
    %c0_11 = arith.constant 0 : index
    %27 = vector.load %arg4[%c0_10, %c0_11] : memref<1x512xf32, #tpu.memory_space<vmem>>, vector<1x512xf32>
    %28 = vector.shape_cast %27 : vector<1x512xf32> to vector<1x1x512xf32>
    %29 = vector.broadcast %28 : vector<1x1x512xf32> to vector<8x16x512xf32>
    %30 = arith.mulf %25, %29 : vector<8x16x512xf32>
    %cst_12 = arith.constant dense<0.000000e+00> : vector<8x16xf32>
    %31 = vector.multi_reduction <add>, %30, %cst_12 [2] : vector<8x16x512xf32> to vector<8x16xf32>
    %32 = vector.shape_cast %31 : vector<8x16xf32> to vector<8x16x1xf32>
    %cst_13 = arith.constant 0.0883883461 : f32
    %33 = vector.broadcast %cst_13 : f32 to vector<8x16x1xf32>
    %34 = arith.mulf %32, %33 : vector<8x16x1xf32>
    %35 = arith.mulf %34, %34 : vector<8x16x1xf32>
    %cst_14 = arith.constant dense<0.000000e+00> : vector<8x1xf32>
    %36 = vector.multi_reduction <add>, %35, %cst_14 [1] : vector<8x16x1xf32> to vector<8x1xf32>
    %37 = vector.shape_cast %36 : vector<8x1xf32> to vector<8x1x1xf32>
    %cst_15 = arith.constant 1.000000e-24 : f32
    %38 = vector.broadcast %cst_15 : f32 to vector<8x1x1xf32>
    %39 = arith.maximumf %37, %38 : vector<8x1x1xf32>
    %40 = math.rsqrt %39 : vector<8x1x1xf32>
    %41 = vector.broadcast %40 : vector<8x1x1xf32> to vector<8x16x1xf32>
    %42 = arith.mulf %34, %41 : vector<8x16x1xf32>
    %43 = vector.broadcast %42 : vector<8x16x1xf32> to vector<8x16x512xf32>
    %44 = arith.mulf %43, %25 : vector<8x16x512xf32>
    %cst_16 = arith.constant dense<0.000000e+00> : vector<8x512xf32>
    %45 = vector.multi_reduction <add>, %44, %cst_16 [1] : vector<8x16x512xf32> to vector<8x512xf32>
    %46 = vector.shape_cast %45 : vector<8x512xf32> to vector<8x1x512xf32>
    %47 = vector.broadcast %46 : vector<8x1x512xf32> to vector<8x16x512xf32>
    %48 = arith.mulf %47, %26 : vector<8x16x512xf32>
    %49 = vector.shape_cast %48 : vector<8x16x512xf32> to vector<128x512xf32>
    %50 = tpu.concatenate %49, %15 in 1 : vector<128x512xf32>, vector<128x512xf32> -> vector<128x1024xf32>
    %c0_17 = arith.constant 0 : index
    %c0_18 = arith.constant 0 : index
    %51 = vector.load %arg5[%c0_17, %c0_18] : memref<1024x128xf32, #tpu.memory_space<vmem>>, vector<1024x128xf32>
    %cst_19 = arith.constant dense<0.000000e+00> : vector<128x128xf32>
    %52 = tpu.matmul %50, %51, %cst_19 {dimension_numbers = #tpu.dot_dimension_numbers<[1], [0], [0], [1], [0, 0, 1, 1], [], []>} : vector<128x1024xf32>, vector<1024x128xf32>, vector<128x128xf32> -> vector<128x128xf32>
    %c0_20 = arith.constant 0 : index
    %c0_21 = arith.constant 0 : index
    %53 = vector.load %arg6[%c0_20, %c0_21] : memref<1x128xf32, #tpu.memory_space<vmem>>, vector<1x128xf32>
    %54 = vector.broadcast %53 : vector<1x128xf32> to vector<128x128xf32>
    %55 = arith.addf %52, %54 : vector<128x128xf32>
    %56 = vector.shape_cast %55 : vector<128x128xf32> to vector<8x16x128xf32>
    %c0_22 = arith.constant 0 : index
    %c0_23 = arith.constant 0 : index
    %c0_24 = arith.constant 0 : index
    %57 = vector.load %arg7[%c0_22, %c0_23, %c0_24] : memref<8x16x128xf32, #tpu.memory_space<vmem>>, vector<8x16x128xf32>
    tpu.vector_store %arg7[%c0_22, %c0_23, %c0_24], %56 {strides = array<i32>} : memref<8x16x128xf32, #tpu.memory_space<vmem>>, vector<8x16x128xf32>,
    return
  }
  func.func @transform_0(%arg0: i32) -> (i32, i32, i32) {
    %c0_i32 = arith.constant 0 : i32
    %c0_i32_0 = arith.constant 0 : i32
    %c0_i32_1 = arith.constant 0 : i32
    return %arg0, %c0_i32, %c0_i32_0 : i32, i32, i32
  }
  func.func @transform_1(%arg0: i32) -> (i32, i32) {
    %c0_i32 = arith.constant 0 : i32
    %c0_i32_0 = arith.constant 0 : i32
    %c0_i32_1 = arith.constant 0 : i32
    return %c0_i32, %c0_i32_0 : i32, i32
  }
  func.func @transform_2(%arg0: i32) -> (i32, i32) {
    %c0_i32 = arith.constant 0 : i32
    %c0_i32_0 = arith.constant 0 : i32
    %c0_i32_1 = arith.constant 0 : i32
    return %c0_i32, %c0_i32_0 : i32, i32
  }
  func.func @transform_3(%arg0: i32) -> (i32, i32) {
    %c0_i32 = arith.constant 0 : i32
    %c0_i32_0 = arith.constant 0 : i32
    %c0_i32_1 = arith.constant 0 : i32
    return %c0_i32, %c0_i32_0 : i32, i32
  }
  func.func @transform_4(%arg0: i32) -> (i32, i32) {
    %c0_i32 = arith.constant 0 : i32
    %c0_i32_0 = arith.constant 0 : i32
    %c0_i32_1 = arith.constant 0 : i32
    return %c0_i32, %c0_i32_0 : i32, i32
  }
  func.func @transform_5(%arg0: i32) -> (i32, i32) {
    %c0_i32 = arith.constant 0 : i32
    %c0_i32_0 = arith.constant 0 : i32
    %c0_i32_1 = arith.constant 0 : i32
    return %c0_i32, %c0_i32_0 : i32, i32
  }
  func.func @transform_6(%arg0: i32) -> (i32, i32, i32) {
    %c0_i32 = arith.constant 0 : i32
    %c0_i32_0 = arith.constant 0 : i32
    %c0_i32_1 = arith.constant 0 : i32
    return %arg0, %c0_i32, %c0_i32_0 : i32, i32, i32
  }
}

</mosaic_0001>

<bundles_post_ra>
// kernel: tpu_custom_call.1
= control target key start
LH: loop header
LB: loop body
LE: loop exit
PB: predicated region body
PF: predicated region fallthrough
CT: control target
= control target key end

     0   :  { %11 = vsyncpa [#allocation3], 0  ;;  %s5712_s0 = inlined_call_operand.hbm [shape: f32[8,16,128], index: 0, kind: input, shape index: {}]   ;;  %s5713_s1 = inlined_call_operand.hbm [shape: f32[128,1024], index: 1, kind: input, shape index: {}]   ;;  %s5714_s2 = inlined_call_operand.hbm [shape: f32[1,1024], index: 2, kind: input, shape index: {}]   ;;  %s5715_s3 = inlined_call_operand.hbm [shape: f32[1,512], index: 3, kind: input, shape index: {}]   ;;  %s5716_s4 = inlined_call_operand.hbm [shape: f32[1024,128], index: 4, kind: input, shape index: {}]   ;;  %s5717_s5 = inlined_call_operand.vmem [shape: f32[1,128], index: 5, kind: input, shape index: {}]   ;;  %s5718_s6 = inlined_call_operand.hbm [shape: f32[8,16,128], index: 6, kind: output, shape index: {}]  }
   0x1   :  { %12 = vsyncpa [#allocation6], 0 }
   0x2   :  { %13 = vsyncpa [#allocation9], 0  ;;  %s32_s23 = sshll.u32 %s5713_s1, 4  ;;  %s33_s23 = int_to_ptr.hbm [resolvable:$true] %s32_s23 }
   0x3   :  { %14 = vsyncpa [#allocation4], 0  ;;  %s3179_s24 = smov [#allocation5]   ;;  %s57_s28 = sshll.u32 %s5715_s3, 4  ;;  %s58_s28 = int_to_ptr.hbm [resolvable:$true] %s57_s28 }
   0x4   :  { %s34_s25 = sshll.u32 %s3179_s24, 4  ;;  %s3180_s29 = smov 1024   ;;  %s35_s25 = int_to_ptr.vmem [resolvable:$true] %s34_s25 }
   0x5   :  { %s3181_s30 = smov 64   ;;  %s3182_s7 = smov [#allocation8]  }
   0x6   :  { %40 = dma.hbm_to_vmem [thread:$0]  %s33_s23, 16384, %s35_s25, [#allocation6], %s3180_s29, %s3180_s29, %s3181_s30  }
   0x7   :  { %s59_s8 = sshll.u32 %s3182_s7, 4  ;;  %s19_s11 = sshll.u32 %s5712_s0, 4  ;;  %s60_s8 = int_to_ptr.vmem [resolvable:$true] %s59_s8  ;;  %s20_s11 = int_to_ptr.hbm [resolvable:$true] %s19_s11 }
   0x8   :  { %62 = dma.hbm_to_vmem [thread:$0]  %s58_s28, 64, %s60_s8, [#allocation9]  }
   0x9   :  { %s3183_s1 = smov [#allocation2]   ;;  %s46_s3 = sshll.u32 %s5714_s2, 4  ;;  %s47_s3 = int_to_ptr.hbm [resolvable:$true] %s46_s3 }
   0xa   :  { %s21_s12 = sshll.u32 %s3183_s1, 4  ;;  %s3184_s15 = smov 128   ;;  %s22_s12 = int_to_ptr.vmem [resolvable:$true] %s21_s12 }
   0xb   :  { %s3185_s16 = smov 8   ;;  %s3186_s17 = smov [#allocation7]  }
   0xc   :  { %27 = dma.hbm_to_vmem [thread:$0]  %s20_s11, 2048, %s22_s12, [#allocation3], %s3184_s15, %s3184_s15, %s3185_s16  }
   0xd   :  { %s48_s18 = sshll.u32 %s3186_s17, 4  ;;  %s67_s20 = sshll.u32 %s5716_s4, 4  ;;  %s49_s18 = int_to_ptr.vmem [resolvable:$true] %s48_s18  ;;  %s68_s20 = int_to_ptr.hbm [resolvable:$true] %s67_s20 }
   0xe   :  { %51 = dma.hbm_to_vmem [thread:$0]  %s47_s3, 128, %s49_s18, [#allocation6]  }
   0xf   :  { %s3187_s21 = smov [#allocation10]  }
  0x10   :  { %s69_s22 = sshll.u32 %s3187_s21, 4  ;;  %s70_s22 = int_to_ptr.vmem [resolvable:$true] %s69_s22 }
  0x11   :  { %75 = dma.hbm_to_vmem [thread:$0]  %s68_s20, 16384, %s70_s22, [#allocation9], %s3184_s15, %s3184_s15, %s3185_s16  }
  0x12   :  { %3171 = dma.done.wait [#allocation3], 2048  }
  0x13   :  { %3172 = vsyncadd [#allocation3], 4294965248 }
  0x14   :  { %3173 = dma.done.wait [#allocation6], 16512  }
  0x15   :  { %3174 = vsyncadd [#allocation6], 4294950784 }
  0x16   :  { %3175 = dma.done.wait [#allocation9], 16448  }
  0x17   :  { %3176 = vsyncadd [#allocation9], 4294950848  ;;  %v236_v0 = vld [vmem:[#allocation5 + $0x3d0] sm:$0xff]  ;;  %v237_v2 = vld [vmem:[#allocation5 + $0x3d8] sm:$0xff]  ;;  %s2920_s26 = sshll.u32 %s5718_s6, 4  ;;  %s2921_s26 = int_to_ptr.hbm [resolvable:$true] %s2920_s26 }
  0x18   :  { %v228_v1 = vld [vmem:[#allocation5 + $0x390] sm:$0xff]  ;;  %390 = vmatpush.msra.mxu2 %v236_v0  ;;  %455 = vmatpush.msra.mxu3 %v237_v2  ;;  %v234_v3 = vld [vmem:[#allocation5 + $0x3c0] sm:$0xff]  ;;  %v235_v4 = vld [vmem:[#allocation5 + $0x3c8] sm:$0xff] }
  0x19   :  { %v220_v5 = vld [vmem:[#allocation5 + $0x350] sm:$0xff]  ;;  %260 = vmatpush.msra.mxu0 %v234_v3  ;;  %325 = vmatpush.msra.mxu1 %v235_v4  ;;  %v229_v6 = vld [vmem:[#allocation5 + $0x398] sm:$0xff]  ;;  %v226_v7 = vld [vmem:[#allocation5 + $0x380] sm:$0xff] }
  0x1a   :  { %v227_v8 = vld [vmem:[#allocation5 + $0x388] sm:$0xff]  ;;  %391 = vmatpush.msra.mxu2 %v228_v1  ;;  %456 = vmatpush.msra.mxu3 %v229_v6  ;;  %v221_v9 = vld [vmem:[#allocation5 + $0x358] sm:$0xff]  ;;  %v218_v10 = vld [vmem:[#allocation5 + $0x340] sm:$0xff] }
  0x1b   :  { %261 = vmatpush.msra.mxu0 %v226_v7  ;;  %326 = vmatpush.msra.mxu1 %v227_v8  ;;  %v212_v11 = vld [vmem:[#allocation5 + $0x310] sm:$0xff]  ;;  %v219_v12 = vld [vmem:[#allocation5 + $0x348] sm:$0xff]  ;;  %v213_v13 = vld [vmem:[#allocation5 + $0x318] sm:$0xff] }
  0x1c   :  { %392 = vmatpush.msra.mxu2 %v220_v5  ;;  %457 = vmatpush.msra.mxu3 %v221_v9  ;;  %v210_v14 = vld [vmem:[#allocation5 + $0x300] sm:$0xff]  ;;  %v211_v15 = vld [vmem:[#allocation5 + $0x308] sm:$0xff]  ;;  %v204_v16 = vld [vmem:[#allocation5 + $0x2d0] sm:$0xff] }
  0x1d   :  { %262 = vmatpush.msra.mxu0 %v218_v10  ;;  %327 = vmatpush.msra.mxu1 %v219_v12  ;;  %v205_v17 = vld [vmem:[#allocation5 + $0x2d8] sm:$0xff]  ;;  %v202_v18 = vld [vmem:[#allocation5 + $0x2c0] sm:$0xff]  ;;  %v203_v19 = vld [vmem:[#allocation5 + $0x2c8] sm:$0xff] }
  0x1e   :  { %393 = vmatpush.msra.mxu2 %v212_v11  ;;  %458 = vmatpush.msra.mxu3 %v213_v13  ;;  %v196_v20 = vld [vmem:[#allocation5 + $0x290] sm:$0xff]  ;;  %v197_v21 = vld [vmem:[#allocation5 + $0x298] sm:$0xff]  ;;  %v194_v22 = vld [vmem:[#allocation5 + $0x280] sm:$0xff] }
  0x1f   :  { %263 = vmatpush.msra.mxu0 %v210_v14  ;;  %328 = vmatpush.msra.mxu1 %v211_v15  ;;  %v195_v23 = vld [vmem:[#allocation5 + $0x288] sm:$0xff]  ;;  %v188_v24 = vld [vmem:[#allocation5 + $0x250] sm:$0xff]  ;;  %v189_v25 = vld [vmem:[#allocation5 + $0x258] sm:$0xff] }
  0x20   :  { %394 = vmatpush.msra.mxu2 %v204_v16  ;;  %459 = vmatpush.msra.mxu3 %v205_v17  ;;  %v186_v26 = vld [vmem:[#allocation5 + $0x240] sm:$0xff]  ;;  %v187_v27 = vld [vmem:[#allocation5 + $0x248] sm:$0xff]  ;;  %v180_v28 = vld [vmem:[#allocation5 + $0x210] sm:$0xff] }
  0x21   :  { %264 = vmatpush.msra.mxu0 %v202_v18  ;;  %329 = vmatpush.msra.mxu1 %v203_v19  ;;  %v181_v29 = vld [vmem:[#allocation5 + $0x218] sm:$0xff]  ;;  %v178_v30 = vld [vmem:[#allocation5 + $0x200] sm:$0xff]  ;;  %v179_v31 = vld [vmem:[#allocation5 + $0x208] sm:$0xff] }
  0x22   :  { %395 = vmatpush.msra.mxu2 %v196_v20  ;;  %460 = vmatpush.msra.mxu3 %v197_v21  ;;  %v172_v32 = vld [vmem:[#allocation5 + $0x1d0] sm:$0xff]  ;;  %v173_v33 = vld [vmem:[#allocation5 + $0x1d8] sm:$0xff]  ;;  %v170_v34 = vld [vmem:[#allocation5 + $0x1c0] sm:$0xff] }
  0x23   :  { %265 = vmatpush.msra.mxu0 %v194_v22  ;;  %330 = vmatpush.msra.mxu1 %v195_v23  ;;  %v171_v35 = vld [vmem:[#allocation5 + $0x1c8] sm:$0xff]  ;;  %v164_v36 = vld [vmem:[#allocation5 + $0x190] sm:$0xff]  ;;  %v165_v37 = vld [vmem:[#allocation5 + $0x198] sm:$0xff] }
  0x24   :  { %396 = vmatpush.msra.mxu2 %v188_v24  ;;  %461 = vmatpush.msra.mxu3 %v189_v25  ;;  %v162_v38 = vld [vmem:[#allocation5 + $0x180] sm:$0xff]  ;;  %v163_v39 = vld [vmem:[#allocation5 + $0x188] sm:$0xff]  ;;  %v156_v40 = vld [vmem:[#allocation5 + $0x150] sm:$0xff] }
  0x25   :  { %266 = vmatpush.msra.mxu0 %v186_v26  ;;  %331 = vmatpush.msra.mxu1 %v187_v27  ;;  %v157_v41 = vld [vmem:[#allocation5 + $0x158] sm:$0xff]  ;;  %v154_v42 = vld [vmem:[#allocation5 + $0x140] sm:$0xff]  ;;  %v155_v43 = vld [vmem:[#allocation5 + $0x148] sm:$0xff] }
  0x26   :  { %397 = vmatpush.msra.mxu2 %v180_v28  ;;  %462 = vmatpush.msra.mxu3 %v181_v29  ;;  %v148_v44 = vld [vmem:[#allocation5 + $0x110] sm:$0xff]  ;;  %v149_v45 = vld [vmem:[#allocation5 + $0x118] sm:$0xff]  ;;  %v146_v46 = vld [vmem:[#allocation5 + $0x100] sm:$0xff] }
  0x27   :  { %267 = vmatpush.msra.mxu0 %v178_v30  ;;  %332 = vmatpush.msra.mxu1 %v179_v31  ;;  %v147_v47 = vld [vmem:[#allocation5 + $0x108] sm:$0xff]  ;;  %v140_v48 = vld [vmem:[#allocation5 + $0xd0] sm:$0xff]  ;;  %v141_v49 = vld [vmem:[#allocation5 + $0xd8] sm:$0xff] }
  0x28   :  { %398 = vmatpush.msra.mxu2 %v172_v32  ;;  %463 = vmatpush.msra.mxu3 %v173_v33  ;;  %v138_v50 = vld [vmem:[#allocation5 + $0xc0] sm:$0xff]  ;;  %v139_v51 = vld [vmem:[#allocation5 + $0xc8] sm:$0xff]  ;;  %v132_v52 = vld [vmem:[#allocation5 + $0x90] sm:$0xff] }
  0x29   :  { %268 = vmatpush.msra.mxu0 %v170_v34  ;;  %333 = vmatpush.msra.mxu1 %v171_v35  ;;  %v133_v53 = vld [vmem:[#allocation5 + $0x98] sm:$0xff]  ;;  %v130_v54 = vld [vmem:[#allocation5 + $0x80] sm:$0xff]  ;;  %v131_v55 = vld [vmem:[#allocation5 + $0x88] sm:$0xff] }
  0x2a   :  { %399 = vmatpush.msra.mxu2 %v164_v36  ;;  %464 = vmatpush.msra.mxu3 %v165_v37  ;;  %v124_v56 = vld [vmem:[#allocation5 + $0x50] sm:$0xff]  ;;  %v125_v57 = vld [vmem:[#allocation5 + $0x58] sm:$0xff]  ;;  %v122_v58 = vld [vmem:[#allocation5 + $0x40] sm:$0xff] }
  0x2b   :  { %269 = vmatpush.msra.mxu0 %v162_v38  ;;  %334 = vmatpush.msra.mxu1 %v163_v39  ;;  %v123_v59 = vld [vmem:[#allocation5 + $0x48] sm:$0xff]  ;;  %v116_v60 = vld [vmem:[#allocation5 + $0x10] sm:$0xff]  ;;  %v117_v61 = vld [vmem:[#allocation5 + $0x18] sm:$0xff] }
  0x2c   :  { %400 = vmatpush.msra.mxu2 %v156_v40  ;;  %465 = vmatpush.msra.mxu3 %v157_v41  ;;  %v3245_v62 = vld [vmem:[#allocation2] sm:$0xff]  ;;  %v115_v0 = vld [vmem:[#allocation5 + $0x8] sm:$0xff]  ;;  %v3257_v2 = vld [vmem:[#allocation2 + $0x10] sm:$0xff] }
  0x2d   :  { %270 = vmatpush.msra.mxu0 %v154_v42  ;;  %335 = vmatpush.msra.mxu1 %v155_v43  ;;  %v114_v63 = vld [vmem:[#allocation5] sm:$0xff]  ;;  %v3251_v1 = vld [vmem:[#allocation2 + $0x8] sm:$0xff]  ;;  %v3263_v3 = vld [vmem:[#allocation2 + $0x18] sm:$0xff] }
  0x2e   :  { %401 = vmatpush.msra.mxu2 %v148_v44  ;;  %466 = vmatpush.msra.mxu3 %v149_v45  ;;  %v3269_v4 = vld [vmem:[#allocation2 + $0x20] sm:$0xff]  ;;  %v3275_v5 = vld [vmem:[#allocation2 + $0x28] sm:$0xff]  ;;  %v3281_v6 = vld [vmem:[#allocation2 + $0x30] sm:$0xff] }
  0x2f   :  { %271 = vmatpush.msra.mxu0 %v146_v46  ;;  %336 = vmatpush.msra.mxu1 %v147_v47  ;;  %v3287_v7 = vld [vmem:[#allocation2 + $0x38] sm:$0xff]  ;;  %v3293_v8 = vld [vmem:[#allocation2 + $0x40] sm:$0xff]  ;;  %v3299_v9 = vld [vmem:[#allocation2 + $0x48] sm:$0xff] }
  0x30   :  { %402 = vmatpush.msra.mxu2 %v140_v48  ;;  %467 = vmatpush.msra.mxu3 %v141_v49  ;;  %v3305_v10 = vld [vmem:[#allocation2 + $0x50] sm:$0xff]  ;;  %v241_v12 = vld [vmem:[#allocation5 + $0x3f8] sm:$0xff]  ;;  %v238_v14 = vld [vmem:[#allocation5 + $0x3e0] sm:$0xff] }
  0x31   :  { %272 = vmatpush.msra.mxu0 %v138_v50  ;;  %337 = vmatpush.msra.mxu1 %v139_v51  ;;  %v240_v11 = vld [vmem:[#allocation5 + $0x3f0] sm:$0xff]  ;;  %v3311_v13 = vld [vmem:[#allocation2 + $0x58] sm:$0xff]  ;;  %v239_v15 = vld [vmem:[#allocation5 + $0x3e8] sm:$0xff] }
  0x32   :  { %403 = vmatpush.msra.mxu2 %v132_v52  ;;  %468 = vmatpush.msra.mxu3 %v133_v53  ;;  %v232_v16 = vld [vmem:[#allocation5 + $0x3b0] sm:$0xff]  ;;  %v233_v17 = vld [vmem:[#allocation5 + $0x3b8] sm:$0xff]  ;;  %v3317_v18 = vld [vmem:[#allocation2 + $0x60] sm:$0xff] }
  0x33   :  { %273 = vmatpush.msra.mxu0 %v130_v54  ;;  %338 = vmatpush.msra.mxu1 %v131_v55  ;;  %v230_v19 = vld [vmem:[#allocation5 + $0x3a0] sm:$0xff]  ;;  %v231_v20 = vld [vmem:[#allocation5 + $0x3a8] sm:$0xff]  ;;  %v224_v21 = vld [vmem:[#allocation5 + $0x370] sm:$0xff] }
  0x34   :  { %404 = vmatpush.msra.mxu2 %v124_v56  ;;  %469 = vmatpush.msra.mxu3 %v125_v57  ;;  %v225_v22 = vld [vmem:[#allocation5 + $0x378] sm:$0xff]  ;;  %v216_v23 = vld [vmem:[#allocation5 + $0x330] sm:$0xff]  ;;  %v3323_v24 = vld [vmem:[#allocation7] sm:$0xff] }
  0x35   :  { %274 = vmatpush.msra.mxu0 %v122_v58  ;;  %339 = vmatpush.msra.mxu1 %v123_v59  ;;  %v3325_v25 = vld [vmem:[#allocation2 + $0x68] sm:$0xff]  ;;  %v222_v26 = vld [vmem:[#allocation5 + $0x360] sm:$0xff]  ;;  %v208_v28 = vld [vmem:[#allocation5 + $0x2f0] sm:$0xff]  ;;  %v3330_v30 = vperm.slane %v3323_v24, 0  ;;  %v3333_v31 = vperm.slane %v3323_v24, 1  ;;  %v3344_v44 = vperm.slane %v3323_v24, 2 }
  0x36   :  { %405 = vmatpush.msra.mxu2 %v116_v60  ;;  %470 = vmatpush.msra.mxu3 %v117_v61  ;;  %v223_v27 = vld [vmem:[#allocation5 + $0x368] sm:$0xff]  ;;  %v217_v29 = vld [vmem:[#allocation5 + $0x338] sm:$0xff]  ;;  %v214_v32 = vld [vmem:[#allocation5 + $0x320] sm:$0xff]  ;;  %v3347_v45 = vperm.slane %v3323_v24, 3 }
  0x37   :  { %406 = vmatmul.f32.vlgmr.msra.gmra.mxu2 %v3245_v62  ;;  %471 = vmatmul.f32.vlgmr.msra.gmra.mxu3 %v3245_v62  ;;  %v215_v33 = vld [vmem:[#allocation5 + $0x328] sm:$0xff]  ;;  %v200_v34 = vld [vmem:[#allocation5 + $0x2b0] sm:$0xff]  ;;  %v209_v35 = vld [vmem:[#allocation5 + $0x2f8] sm:$0xff] }
  0x38   :  { %275 = vmatpush.msra.mxu0 %v114_v63  ;;  %340 = vmatpush.msra.mxu1 %v115_v0  ;;  %v206_v36 = vld [vmem:[#allocation5 + $0x2e0] sm:$0xff]  ;;  %v207_v37 = vld [vmem:[#allocation5 + $0x2e8] sm:$0xff]  ;;  %v192_v38 = vld [vmem:[#allocation5 + $0x270] sm:$0xff] }
  0x39   :  { %276 = vmatmul.f32.vlgmr.msra.gmra.mxu0 %v3245_v62  ;;  %341 = vmatmul.f32.vlgmr.msra.gmra.mxu1 %v3245_v62  ;;  %v201_v41 = vld [vmem:[#allocation5 + $0x2b8] sm:$0xff]  ;;  %v198_v46 = vld [vmem:[#allocation5 + $0x2a0] sm:$0xff]  ;;  %v199_v47 = vld [vmem:[#allocation5 + $0x2a8] sm:$0xff] }
  0x3a   :  { %650 = vmatpush.msrb.mxu2 %v240_v11  ;;  %715 = vmatpush.msrb.mxu3 %v241_v12  ;;  %v184_v48 = vld [vmem:[#allocation5 + $0x230] sm:$0xff]  ;;  %v193_v49 = vld [vmem:[#allocation5 + $0x278] sm:$0xff]  ;;  %v190_v53 = vld [vmem:[#allocation5 + $0x260] sm:$0xff] }
  0x3b   :  { %520 = vmatpush.msrb.mxu0 %v238_v14  ;;  %585 = vmatpush.msrb.mxu1 %v239_v15  ;;  %v3349_v50 = vld [vmem:[#allocation2 + $0x70] sm:$0xff]  ;;  %v191_v54 = vld [vmem:[#allocation5 + $0x268] sm:$0xff]  ;;  %v185_v58 = vld [vmem:[#allocation5 + $0x238] sm:$0xff] }
  0x3c   :  { %651 = vmatpush.msrb.mxu2 %v232_v16  ;;  %716 = vmatpush.msrb.mxu3 %v233_v17  ;;  %v176_v55 = vld [vmem:[#allocation5 + $0x1f0] sm:$0xff]  ;;  %v182_v63 = vld [vmem:[#allocation5 + $0x220] sm:$0xff]  ;;  %v183_v0 = vld [vmem:[#allocation5 + $0x228] sm:$0xff] }
  0x3d   :  { %521 = vmatpush.msrb.mxu0 %v230_v19  ;;  %586 = vmatpush.msrb.mxu1 %v231_v20  ;;  %v168_v11 = vld [vmem:[#allocation5 + $0x1b0] sm:$0xff]  ;;  %v177_v12 = vld [vmem:[#allocation5 + $0x1f8] sm:$0xff]  ;;  %v174_v19 = vld [vmem:[#allocation5 + $0x1e0] sm:$0xff] }
  0x3e   :  { %652 = vmatpush.msrb.mxu2 %v224_v21  ;;  %717 = vmatpush.msrb.mxu3 %v225_v22  ;;  %v175_v20 = vld [vmem:[#allocation5 + $0x1e8] sm:$0xff] }
  0x3f   :  { %409 = vmatmul.f32.gmra.mxu2 %v3251_v1  ;;  %474 = vmatmul.f32.gmra.mxu3 %v3251_v1 }
  0x40   :  { %653 = vmatpush.msrb.mxu2 %v216_v23  ;;  %522 = vmatpush.msrb.mxu0 %v222_v26  ;;  %v160_v26 = vld [vmem:[#allocation5 + $0x170] sm:$0xff] }
  0x41   :  { %279 = vmatmul.f32.gmra.mxu0 %v3251_v1  ;;  %344 = vmatmul.f32.gmra.mxu1 %v3251_v1 }
  0x42   :  { %587 = vmatpush.msrb.mxu1 %v223_v27  ;;  %654 = vmatpush.msrb.mxu2 %v208_v28  ;;  %v169_v27 = vld [vmem:[#allocation5 + $0x1b8] sm:$0xff]  ;;  %v166_v28 = vld [vmem:[#allocation5 + $0x1a0] sm:$0xff] }
  0x43   :  { %718 = vmatpush.msrb.mxu3 %v217_v29  ;;  %523 = vmatpush.msrb.mxu0 %v214_v32 }
  0x44   :  { %588 = vmatpush.msrb.mxu1 %v215_v33  ;;  %655 = vmatpush.msrb.mxu2 %v200_v34  ;;  %v167_v34 = vld [vmem:[#allocation5 + $0x1a8] sm:$0xff] }
  0x45   :  { %719 = vmatpush.msrb.mxu3 %v209_v35  ;;  %524 = vmatpush.msrb.mxu0 %v206_v36  ;;  %v152_v35 = vld [vmem:[#allocation5 + $0x130] sm:$0xff] }
  0x46   :  { %589 = vmatpush.msrb.mxu1 %v207_v37  ;;  %656 = vmatpush.msrb.mxu2 %v192_v38  ;;  %v161_v38 = vld [vmem:[#allocation5 + $0x178] sm:$0xff] }
  0x47   :  { %412 = vmatmul.f32.gmra.mxu2 %v3257_v2  ;;  %477 = vmatmul.f32.gmra.mxu3 %v3257_v2 }
  0x48   :  { %720 = vmatpush.msrb.mxu3 %v201_v41  ;;  %525 = vmatpush.msrb.mxu0 %v198_v46 }
  0x49   :  { %282 = vmatmul.f32.gmra.mxu0 %v3257_v2  ;;  %347 = vmatmul.f32.gmra.mxu1 %v3257_v2 }
  0x4a   :  { %590 = vmatpush.msrb.mxu1 %v199_v47  ;;  %657 = vmatpush.msrb.mxu2 %v184_v48  ;;  %v158_v47 = vld [vmem:[#allocation5 + $0x160] sm:$0xff]  ;;  %v159_v48 = vld [vmem:[#allocation5 + $0x168] sm:$0xff] }
  0x4b   :  { %721 = vmatpush.msrb.mxu3 %v193_v49  ;;  %526 = vmatpush.msrb.mxu0 %v190_v53  ;;  %v144_v49 = vld [vmem:[#allocation5 + $0xf0] sm:$0xff] }
  0x4c   :  { %591 = vmatpush.msrb.mxu1 %v191_v54  ;;  %658 = vmatpush.msrb.mxu2 %v176_v55  ;;  %v150_v54 = vld [vmem:[#allocation5 + $0x120] sm:$0xff] }
  0x4d   :  { %722 = vmatpush.msrb.mxu3 %v185_v58  ;;  %527 = vmatpush.msrb.mxu0 %v182_v63  ;;  %v136_v58 = vld [vmem:[#allocation5 + $0xb0] sm:$0xff] }
  0x4e   :  { %592 = vmatpush.msrb.mxu1 %v183_v0  ;;  %659 = vmatpush.msrb.mxu2 %v168_v11  ;;  %v145_v11 = vld [vmem:[#allocation5 + $0xf8] sm:$0xff] }
  0x4f   :  { %415 = vmatmul.f32.gmra.mxu2 %v3263_v3  ;;  %480 = vmatmul.f32.gmra.mxu3 %v3263_v3 }
  0x50   :  { %723 = vmatpush.msrb.mxu3 %v177_v12  ;;  %528 = vmatpush.msrb.mxu0 %v174_v19 }
  0x51   :  { %285 = vmatmul.f32.gmra.mxu0 %v3263_v3  ;;  %350 = vmatmul.f32.gmra.mxu1 %v3263_v3 }
  0x52   :  { %593 = vmatpush.msrb.mxu1 %v175_v20  ;;  %660 = vmatpush.msrb.mxu2 %v160_v26  ;;  %v137_v26 = vld [vmem:[#allocation5 + $0xb8] sm:$0xff] }
  0x53   :  { %724 = vmatpush.msrb.mxu3 %v169_v27  ;;  %529 = vmatpush.msrb.mxu0 %v166_v28 }
  0x54   :  { %594 = vmatpush.msrb.mxu1 %v167_v34  ;;  %661 = vmatpush.msrb.mxu2 %v152_v35  ;;  %v120_v34 = vld [vmem:[#allocation5 + $0x30] sm:$0xff]  ;;  %v129_v35 = vld [vmem:[#allocation5 + $0x78] sm:$0xff] }
  0x55   :  { %725 = vmatpush.msrb.mxu3 %v161_v38  ;;  %530 = vmatpush.msrb.mxu0 %v158_v47  ;;  %v126_v38 = vld [vmem:[#allocation5 + $0x60] sm:$0xff] }
  0x56   :  { %595 = vmatpush.msrb.mxu1 %v159_v48  ;;  %662 = vmatpush.msrb.mxu2 %v144_v49  ;;  %v127_v48 = vld [vmem:[#allocation5 + $0x68] sm:$0xff]  ;;  %v121_v49 = vld [vmem:[#allocation5 + $0x38] sm:$0xff] }
  0x57   :  { %418 = vmatmul.f32.gmra.mxu2 %v3269_v4  ;;  %483 = vmatmul.f32.gmra.mxu3 %v3269_v4 }
  0x58   :  { %531 = vmatpush.msrb.mxu0 %v150_v54  ;;  %663 = vmatpush.msrb.mxu2 %v136_v58  ;;  %v118_v54 = vld [vmem:[#allocation5 + $0x20] sm:$0xff] }
  0x59   :  { %288 = vmatmul.f32.gmra.mxu0 %v3269_v4  ;;  %353 = vmatmul.f32.gmra.mxu1 %v3269_v4 }
  0x5f   :  { %421 = vmatmul.f32.gmra.mxu2 %v3275_v5  ;;  %486 = vmatmul.f32.gmra.mxu3 %v3275_v5 }
  0x61   :  { %291 = vmatmul.f32.gmra.mxu0 %v3275_v5  ;;  %356 = vmatmul.f32.gmra.mxu1 %v3275_v5 }
  0x67   :  { %424 = vmatmul.f32.gmra.mxu2 %v3281_v6  ;;  %489 = vmatmul.f32.gmra.mxu3 %v3281_v6 }
  0x69   :  { %294 = vmatmul.f32.gmra.mxu0 %v3281_v6  ;;  %359 = vmatmul.f32.gmra.mxu1 %v3281_v6 }
  0x6f   :  { %427 = vmatmul.f32.gmra.mxu2 %v3287_v7  ;;  %492 = vmatmul.f32.gmra.mxu3 %v3287_v7 }
  0x71   :  { %297 = vmatmul.f32.gmra.mxu0 %v3287_v7  ;;  %362 = vmatmul.f32.gmra.mxu1 %v3287_v7 }
  0x77   :  { %430 = vmatmul.f32.gmra.mxu2 %v3293_v8  ;;  %495 = vmatmul.f32.gmra.mxu3 %v3293_v8 }
  0x79   :  { %300 = vmatmul.f32.gmra.mxu0 %v3293_v8  ;;  %365 = vmatmul.f32.gmra.mxu1 %v3293_v8 }
  0x7f   :  { %433 = vmatmul.f32.gmra.mxu2 %v3299_v9  ;;  %498 = vmatmul.f32.gmra.mxu3 %v3299_v9 }
  0x81   :  { %303 = vmatmul.f32.gmra.mxu0 %v3299_v9  ;;  %368 = vmatmul.f32.gmra.mxu1 %v3299_v9 }
  0x87   :  { %436 = vmatmul.f32.gmra.mxu2 %v3305_v10  ;;  %501 = vmatmul.f32.gmra.mxu3 %v3305_v10 }
  0x89   :  { %306 = vmatmul.f32.gmra.mxu0 %v3305_v10  ;;  %371 = vmatmul.f32.gmra.mxu1 %v3305_v10 }
  0x8f   :  { %439 = vmatmul.f32.gmra.mxu2 %v3311_v13  ;;  %504 = vmatmul.f32.gmra.mxu3 %v3311_v13 }
  0x91   :  { %309 = vmatmul.f32.gmra.mxu0 %v3311_v13  ;;  %374 = vmatmul.f32.gmra.mxu1 %v3311_v13 }
  0x97   :  { %442 = vmatmul.f32.gmra.mxu2 %v3317_v18  ;;  %507 = vmatmul.f32.gmra.mxu3 %v3317_v18 }
  0x99   :  { %312 = vmatmul.f32.gmra.mxu0 %v3317_v18  ;;  %377 = vmatmul.f32.gmra.mxu1 %v3317_v18 }
  0x9f   :  { %445 = vmatmul.f32.gmra.mxu2 %v3325_v25  ;;  %510 = vmatmul.f32.gmra.mxu3 %v3325_v25 }
  0xa1   :  { %315 = vmatmul.f32.gmra.mxu0 %v3325_v25  ;;  %380 = vmatmul.f32.gmra.mxu1 %v3325_v25 }
  0xa7   :  { %448 = vmatmul.f32.gmra.mxu2 %v3349_v50  ;;  %513 = vmatmul.f32.gmra.mxu3 %v3349_v50 }
  0xa9   :  { %318 = vmatmul.f32.gmra.mxu0 %v3349_v50  ;;  %383 = vmatmul.f32.gmra.mxu1 %v3349_v50 }
  0xb6   :  { %v277_v39 = vpop.f32.mrf.mxu0  ;;  %v342_v40 = vpop.f32.mrf.mxu1 }
  0xb7   :  { %v3338_v42 = vadd.f32 %v277_v39, %v3330_v30  ;;  %v3341_v43 = vadd.f32 %v342_v40, %v3333_v31  ;;  %v3379_v39 = vld [vmem:[#allocation2 + $0x78] sm:$0xff] }
  0xb8   :  { %451 = vmatmul.f32.gmra.mxu2 %v3379_v39  ;;  %516 = vmatmul.f32.gmra.mxu3 %v3379_v39 }
  0xb9   :  { %v780_v51 = vmul.f32 %v3338_v42, %v3338_v42  ;;  %v781_v52 = vmul.f32 %v3341_v43, %v3341_v43  ;;  %321 = vmatmul.f32.gmra.mxu0 %v3379_v39  ;;  %386 = vmatmul.f32.gmra.mxu1 %v3379_v39 }
  0xba   :  { %v407_v56 = vpop.f32.mrf.mxu2  ;;  %v472_v57 = vpop.f32.mrf.mxu3 }
  0xbb   :  { %v3356_v59 = vadd.f32 %v407_v56, %v3344_v44  ;;  %v3359_v60 = vadd.f32 %v472_v57, %v3347_v45  ;;  %v844_v61 = vadd.f32 %v781_v52, %v780_v51  ;;  %v153_v51 = vld [vmem:[#allocation5 + $0x138] sm:$0xff]  ;;  %v151_v57 = vld [vmem:[#allocation5 + $0x128] sm:$0xff] }
  0xbc   :  { %726 = vmatpush.msrb.mxu3 %v153_v51  ;;  %596 = vmatpush.msrb.mxu1 %v151_v57 }
  0xbd   :  { %v782_v14 = vmul.f32 %v3356_v59, %v3356_v59  ;;  %v783_v15 = vmul.f32 %v3359_v60, %v3359_v60 }
  0xbe   :  { %v280_v16 = vpop.f32.mrf.mxu0  ;;  %v345_v17 = vpop.f32.mrf.mxu1  ;;  %727 = vmatpush.msrb.mxu3 %v145_v11 }
  0xbf   :  { %v3368_v21 = vadd.f32 %v280_v16, %v3330_v30  ;;  %v3371_v22 = vadd.f32 %v345_v17, %v3333_v31  ;;  %v845_v23 = vadd.f32 %v844_v61, %v782_v14  ;;  %v142_v16 = vld [vmem:[#allocation5 + $0xe0] sm:$0xff]  ;;  %v143_v17 = vld [vmem:[#allocation5 + $0xe8] sm:$0xff] }
  0xc0   :  { %532 = vmatpush.msrb.mxu0 %v142_v16  ;;  %597 = vmatpush.msrb.mxu1 %v143_v17 }
  0xc1   :  { %v784_v29 = vmul.f32 %v3368_v21, %v3368_v21  ;;  %v785_v32 = vmul.f32 %v3371_v22, %v3371_v22  ;;  %v846_v33 = vadd.f32 %v845_v23, %v783_v15  ;;  %v128_v23 = vld [vmem:[#allocation5 + $0x70] sm:$0xff]  ;;  %728 = vmatpush.msrb.mxu3 %v137_v26 }
  0xc2   :  { %v410_v36 = vpop.f32.mrf.mxu2  ;;  %v475_v37 = vpop.f32.mrf.mxu3  ;;  %664 = vmatpush.msrb.mxu2 %v128_v23 }
  0xc3   :  { %v3382_v40 = vadd.f32 %v410_v36, %v3344_v44  ;;  %847 = vadd.xlane.f32.xlu0 %v846_v33  ;;  %v3385_v41 = vadd.f32 %v475_v37, %v3347_v45  ;;  %v849_v46 = vadd.f32 %v785_v32, %v784_v29  ;;  %v134_v32 = vld [vmem:[#allocation5 + $0xa0] sm:$0xff]  ;;  %v135_v33 = vld [vmem:[#allocation5 + $0xa8] sm:$0xff]  ;;  %729 = vmatpush.msrb.mxu3 %v129_v35 }
  0xc4   :  { %533 = vmatpush.msrb.mxu0 %v134_v32  ;;  %598 = vmatpush.msrb.mxu1 %v135_v33 }
  0xc5   :  { %v786_v52 = vmul.f32 %v3382_v40, %v3382_v40  ;;  %v787_v53 = vmul.f32 %v3385_v41, %v3385_v41  ;;  %665 = vmatpush.msrb.mxu2 %v120_v34  ;;  %730 = vmatpush.msrb.mxu3 %v121_v49 }
  0xc6   :  { %v283_v55 = vpop.f32.mrf.mxu0  ;;  %v348_v56 = vpop.f32.mrf.mxu1  ;;  %666 = vmatmul.f32.vlgmr.msrb.gmra.mxu2 %v3245_v62  ;;  %534 = vmatpush.msrb.mxu0 %v126_v38 }
  0xc7   :  { %v3393_v61 = vadd.f32 %v283_v55, %v3330_v30  ;;  %v3396_v63 = vadd.f32 %v348_v56, %v3333_v31  ;;  %v850_v0 = vadd.f32 %v849_v46, %v786_v52  ;;  %v119_v55 = vld [vmem:[#allocation5 + $0x28] sm:$0xff]  ;;  %599 = vmatpush.msrb.mxu1 %v127_v48  ;;  %731 = vmatmul.f32.vlgmr.msrb.gmra.mxu3 %v3245_v62 }
  0xc8   :  { %535 = vmatpush.msrb.mxu0 %v118_v54 }
  0xc9   :  { %v788_v12 = vmul.f32 %v3393_v61, %v3393_v61  ;;  %v789_v14 = vmul.f32 %v3396_v63, %v3396_v63  ;;  %v851_v15 = vadd.f32 %v850_v0, %v787_v53  ;;  %600 = vmatpush.msrb.mxu1 %v119_v55  ;;  %536 = vmatmul.f32.vlgmr.msrb.gmra.mxu0 %v3245_v62 }
  0xca   :  { %v413_v19 = vpop.f32.mrf.mxu2  ;;  %v478_v20 = vpop.f32.mrf.mxu3  ;;  %601 = vmatmul.f32.vlgmr.msrb.gmra.mxu1 %v3245_v62 }
  0xcb   :  { %v3405_v27 = vadd.f32 %v413_v19, %v3344_v44  ;;  %852 = vadd.xlane.f32.xlu0 %v851_v15  ;;  %v3408_v28 = vadd.f32 %v478_v20, %v3347_v45  ;;  %v854_v29 = vadd.f32 %v789_v14, %v788_v12 }
  0xcd   :  { %v790_v36 = vmul.f32 %v3405_v27, %v3405_v27  ;;  %v791_v37 = vmul.f32 %v3408_v28, %v3408_v28 }
  0xce   :  { %v286_v46 = vpop.f32.mrf.mxu0  ;;  %v351_v47 = vpop.f32.mrf.mxu1  ;;  %669 = vmatmul.f32.gmra.mxu2 %v3251_v1 }
  0xcf   :  { %v3416_v51 = vadd.f32 %v286_v46, %v3330_v30  ;;  %v3419_v52 = vadd.f32 %v351_v47, %v3333_v31  ;;  %v855_v53 = vadd.f32 %v854_v29, %v790_v36  ;;  %734 = vmatmul.f32.gmra.mxu3 %v3251_v1 }
  0xd1   :  { %v792_v56 = vmul.f32 %v3416_v51, %v3416_v51  ;;  %v793_v57 = vmul.f32 %v3419_v52, %v3419_v52  ;;  %v856_v58 = vadd.f32 %v855_v53, %v791_v37  ;;  %539 = vmatmul.f32.gmra.mxu0 %v3251_v1 }
  0xd2   :  { %v416_v0 = vpop.f32.mrf.mxu2  ;;  %v481_v11 = vpop.f32.mrf.mxu3  ;;  %604 = vmatmul.f32.gmra.mxu1 %v3251_v1 }
  0xd3   :  { %v3428_v12 = vadd.f32 %v416_v0, %v3344_v44  ;;  %857 = vadd.xlane.f32.xlu1 %v856_v58  ;;  %v3431_v14 = vadd.f32 %v481_v11, %v3347_v45  ;;  %v859_v15 = vadd.f32 %v793_v57, %v792_v56 }
  0xd5   :  { %v794_v16 = vmul.f32 %v3428_v12, %v3428_v12  ;;  %v795_v17 = vmul.f32 %v3431_v14, %v3431_v14 }
  0xd6   :  { %v289_v19 = vpop.f32.mrf.mxu0  ;;  %v354_v20 = vpop.f32.mrf.mxu1  ;;  %672 = vmatmul.f32.gmra.mxu2 %v3257_v2 }
  0xd7   :  { %v3440_v23 = vadd.f32 %v289_v19, %v3330_v30  ;;  %v3443_v26 = vadd.f32 %v354_v20, %v3333_v31  ;;  %v860_v29 = vadd.f32 %v859_v15, %v794_v16  ;;  %737 = vmatmul.f32.gmra.mxu3 %v3257_v2 }
  0xd9   :  { %v796_v62 = vmul.f32 %v3440_v23, %v3440_v23  ;;  %v797_v32 = vmul.f32 %v3443_v26, %v3443_v26  ;;  %v861_v33 = vadd.f32 %v860_v29, %v795_v17  ;;  %542 = vmatmul.f32.gmra.mxu0 %v3257_v2 }
  0xda   :  { %v419_v34 = vpop.f32.mrf.mxu2  ;;  %v484_v35 = vpop.f32.mrf.mxu3  ;;  %607 = vmatmul.f32.gmra.mxu1 %v3257_v2 }
  0xdb   :  { %v3452_v36 = vadd.f32 %v419_v34, %v3344_v44  ;;  %862 = vadd.xlane.f32.xlu1 %v861_v33  ;;  %v3455_v37 = vadd.f32 %v484_v35, %v3347_v45  ;;  %v864_v38 = vadd.f32 %v797_v32, %v796_v62 }
  0xdd   :  { %v798_v46 = vmul.f32 %v3452_v36, %v3452_v36  ;;  %v799_v47 = vmul.f32 %v3455_v37, %v3455_v37 }
  0xde   :  { %v292_v48 = vpop.f32.mrf.mxu0  ;;  %v357_v49 = vpop.f32.mrf.mxu1  ;;  %675 = vmatmul.f32.gmra.mxu2 %v3263_v3 }
  0xdf   :  { %v3464_v53 = vadd.f32 %v292_v48, %v3330_v30  ;;  %v3467_v54 = vadd.f32 %v357_v49, %v3333_v31  ;;  %v865_v55 = vadd.f32 %v864_v38, %v798_v46  ;;  %740 = vmatmul.f32.gmra.mxu3 %v3263_v3 }
  0xe1   :  { %v800_v1 = vmul.f32 %v3464_v53, %v3464_v53  ;;  %v801_v56 = vmul.f32 %v3467_v54, %v3467_v54  ;;  %v866_v57 = vadd.f32 %v865_v55, %v799_v47  ;;  %545 = vmatmul.f32.gmra.mxu0 %v3263_v3 }
  0xe2   :  { %v422_v58 = vpop.f32.mrf.mxu2  ;;  %v487_v0 = vpop.f32.mrf.mxu3  ;;  %610 = vmatmul.f32.gmra.mxu1 %v3263_v3 }
  0xe3   :  { %v3476_v11 = vadd.f32 %v422_v58, %v3344_v44  ;;  %867 = vadd.xlane.f32.xlu2 %v866_v57  ;;  %v3479_v15 = vadd.f32 %v487_v0, %v3347_v45  ;;  %v869_v16 = vadd.f32 %v801_v56, %v800_v1 }
  0xe5   :  { %v802_v17 = vmul.f32 %v3476_v11, %v3476_v11  ;;  %v803_v19 = vmul.f32 %v3479_v15, %v3479_v15 }
  0xe6   :  { %v295_v20 = vpop.f32.mrf.mxu0  ;;  %v360_v29 = vpop.f32.mrf.mxu1  ;;  %678 = vmatmul.f32.gmra.mxu2 %v3269_v4 }
  0xe7   :  { %v3488_v62 = vadd.f32 %v295_v20, %v3330_v30  ;;  %v3491_v32 = vadd.f32 %v360_v29, %v3333_v31  ;;  %v870_v33 = vadd.f32 %v869_v16, %v802_v17  ;;  %743 = vmatmul.f32.gmra.mxu3 %v3269_v4 }
  0xe9   :  { %5937 = vst [vmem:[#allocation16_spill] sm:$0xff] %v3491_v32  ;;  %v804_v2 = vmul.f32 %v3488_v62, %v3488_v62  ;;  %v805_v34 = vmul.f32 %v3491_v32, %v3491_v32  ;;  %v871_v35 = vadd.f32 %v870_v33, %v803_v19  ;;  %548 = vmatmul.f32.gmra.mxu0 %v3269_v4 }
  0xea   :  { %v425_v38 = vpop.f32.mrf.mxu2  ;;  %v490_v46 = vpop.f32.mrf.mxu3  ;;  %613 = vmatmul.f32.gmra.mxu1 %v3269_v4 }
  0xeb   :  { %v3500_v47 = vadd.f32 %v425_v38, %v3344_v44  ;;  %872 = vadd.xlane.f32.xlu2 %v871_v35  ;;  %v3503_v48 = vadd.f32 %v490_v46, %v3347_v45  ;;  %v874_v49 = vadd.f32 %v805_v34, %v804_v2 }
  0xed   :  { %5938 = vst [vmem:[#allocation17_spill] sm:$0xff] %v3500_v47  ;;  %v806_v55 = vmul.f32 %v3500_v47, %v3500_v47  ;;  %v807_v1 = vmul.f32 %v3503_v48, %v3503_v48 }
  0xee   :  { %5939 = vst [vmem:[#allocation18_spill] sm:$0xff] %v3503_v48  ;;  %v298_v56 = vpop.f32.mrf.mxu0  ;;  %v363_v57 = vpop.f32.mrf.mxu1  ;;  %681 = vmatmul.f32.gmra.mxu2 %v3275_v5 }
  0xef   :  { %v3512_v58 = vadd.f32 %v298_v56, %v3330_v30  ;;  %v3515_v0 = vadd.f32 %v363_v57, %v3333_v31  ;;  %v875_v16 = vadd.f32 %v874_v49, %v806_v55  ;;  %746 = vmatmul.f32.gmra.mxu3 %v3275_v5 }
  0xf1   :  { %5940 = vst [vmem:[#allocation19_spill] sm:$0xff] %v3512_v58  ;;  %v808_v3 = vmul.f32 %v3512_v58, %v3512_v58  ;;  %v809_v17 = vmul.f32 %v3515_v0, %v3515_v0  ;;  %v876_v19 = vadd.f32 %v875_v16, %v807_v1  ;;  %551 = vmatmul.f32.gmra.mxu0 %v3275_v5 }
  0xf2   :  { %5941 = vst [vmem:[#allocation20_spill] sm:$0xff] %v3515_v0  ;;  %v428_v20 = vpop.f32.mrf.mxu2  ;;  %v493_v29 = vpop.f32.mrf.mxu3  ;;  %616 = vmatmul.f32.gmra.mxu1 %v3275_v5 }
  0xf3   :  { %v3524_v33 = vadd.f32 %v428_v20, %v3344_v44  ;;  %877 = vadd.xlane.f32.xlu0 %v876_v19  ;;  %v3527_v2 = vadd.f32 %v493_v29, %v3347_v45  ;;  %v879_v34 = vadd.f32 %v809_v17, %v808_v3 }
  0xf5   :  { %5942 = vst [vmem:[#allocation21_spill] sm:$0xff] %v3524_v33  ;;  %v810_v35 = vmul.f32 %v3524_v33, %v3524_v33  ;;  %v811_v38 = vmul.f32 %v3527_v2, %v3527_v2 }
  0xf6   :  { %5943 = vst [vmem:[#allocation22_spill] sm:$0xff] %v3527_v2  ;;  %v301_v46 = vpop.f32.mrf.mxu0  ;;  %v366_v49 = vpop.f32.mrf.mxu1  ;;  %684 = vmatmul.f32.gmra.mxu2 %v3281_v6 }
  0xf7   :  { %v3536_v55 = vadd.f32 %v301_v46, %v3330_v30  ;;  %v3539_v1 = vadd.f32 %v366_v49, %v3333_v31  ;;  %v880_v56 = vadd.f32 %v879_v34, %v810_v35  ;;  %749 = vmatmul.f32.gmra.mxu3 %v3281_v6 }
  0xf9   :  { %5944 = vst [vmem:[#allocation23_spill] sm:$0xff] %v3536_v55  ;;  %v812_v4 = vmul.f32 %v3536_v55, %v3536_v55  ;;  %v813_v57 = vmul.f32 %v3539_v1, %v3539_v1  ;;  %v881_v16 = vadd.f32 %v880_v56, %v811_v38  ;;  %554 = vmatmul.f32.gmra.mxu0 %v3281_v6 }
  0xfa   :  { %5945 = vst [vmem:[#allocation24_spill] sm:$0xff] %v3539_v1  ;;  %v431_v3 = vpop.f32.mrf.mxu2  ;;  %v496_v17 = vpop.f32.mrf.mxu3  ;;  %619 = vmatmul.f32.gmra.mxu1 %v3281_v6 }
  0xfb   :  { %v3548_v19 = vadd.f32 %v431_v3, %v3344_v44  ;;  %882 = vadd.xlane.f32.xlu1 %v881_v16  ;;  %v3551_v20 = vadd.f32 %v496_v17, %v3347_v45  ;;  %v884_v29 = vadd.f32 %v813_v57, %v812_v4 }
  0xfd   :  { %5946 = vst [vmem:[#allocation25_spill] sm:$0xff] %v3548_v19  ;;  %v814_v34 = vmul.f32 %v3548_v19, %v3548_v19  ;;  %v815_v35 = vmul.f32 %v3551_v20, %v3551_v20 }
  0xfe   :  { %5947 = vst [vmem:[#allocation26_spill] sm:$0xff] %v3551_v20  ;;  %v304_v38 = vpop.f32.mrf.mxu0  ;;  %v369_v46 = vpop.f32.mrf.mxu1  ;;  %687 = vmatmul.f32.gmra.mxu2 %v3287_v7 }
  0xff   :  { %v3560_v49 = vadd.f32 %v304_v38, %v3330_v30  ;;  %v3563_v56 = vadd.f32 %v369_v46, %v3333_v31  ;;  %v885_v16 = vadd.f32 %v884_v29, %v814_v34  ;;  %752 = vmatmul.f32.gmra.mxu3 %v3287_v7 }
 0x101   :  { %5948 = vst [vmem:[#allocation27_spill] sm:$0xff] %v3560_v49  ;;  %v816_v5 = vmul.f32 %v3560_v49, %v3560_v49  ;;  %v817_v4 = vmul.f32 %v3563_v56, %v3563_v56  ;;  %v886_v57 = vadd.f32 %v885_v16, %v815_v35  ;;  %557 = vmatmul.f32.gmra.mxu0 %v3287_v7 }
 0x102   :  { %5949 = vst [vmem:[#allocation28_spill] sm:$0xff] %v3563_v56  ;;  %v434_v3 = vpop.f32.mrf.mxu2  ;;  %v499_v17 = vpop.f32.mrf.mxu3  ;;  %622 = vmatmul.f32.gmra.mxu1 %v3287_v7 }
 0x103   :  { %v3572_v38 = vadd.f32 %v434_v3, %v3344_v44  ;;  %887 = vadd.xlane.f32.xlu2 %v886_v57  ;;  %v3575_v46 = vadd.f32 %v499_v17, %v3347_v45  ;;  %v889_v29 = vadd.f32 %v817_v4, %v816_v5 }
 0x105   :  { %5950 = vst [vmem:[#allocation29_spill] sm:$0xff] %v3572_v38  ;;  %v818_v34 = vmul.f32 %v3572_v38, %v3572_v38  ;;  %v819_v35 = vmul.f32 %v3575_v46, %v3575_v46 }
 0x106   :  { %5951 = vst [vmem:[#allocation30_spill] sm:$0xff] %v3575_v46  ;;  %v307_v16 = vpop.f32.mrf.mxu0  ;;  %v372_v56 = vpop.f32.mrf.mxu1  ;;  %690 = vmatmul.f32.gmra.mxu2 %v3293_v8 }
 0x107   :  { %v3584_v3 = vadd.f32 %v307_v16, %v3330_v30  ;;  %v3587_v57 = vadd.f32 %v372_v56, %v3333_v31  ;;  %v890_v17 = vadd.f32 %v889_v29, %v818_v34  ;;  %755 = vmatmul.f32.gmra.mxu3 %v3293_v8 }
 0x109   :  { %5952 = vst [vmem:[#allocation31_spill] sm:$0xff] %v3584_v3  ;;  %v820_v6 = vmul.f32 %v3584_v3, %v3584_v3  ;;  %v821_v5 = vmul.f32 %v3587_v57, %v3587_v57  ;;  %v891_v4 = vadd.f32 %v890_v17, %v819_v35  ;;  %560 = vmatmul.f32.gmra.mxu0 %v3293_v8 }
 0x10a   :  { %5953 = vst [vmem:[#allocation32_spill] sm:$0xff] %v3587_v57  ;;  %v437_v38 = vpop.f32.mrf.mxu2  ;;  %v502_v46 = vpop.f32.mrf.mxu3  ;;  %625 = vmatmul.f32.gmra.mxu1 %v3293_v8 }
 0x10b   :  { %v3596_v16 = vadd.f32 %v437_v38, %v3344_v44  ;;  %892 = vadd.xlane.f32.xlu0 %v891_v4  ;;  %v3599_v56 = vadd.f32 %v502_v46, %v3347_v45  ;;  %v894_v29 = vadd.f32 %v821_v5, %v820_v6 }
 0x10d   :  { %5954 = vst [vmem:[#allocation33_spill] sm:$0xff] %v3596_v16  ;;  %v822_v34 = vmul.f32 %v3596_v16, %v3596_v16  ;;  %v823_v35 = vmul.f32 %v3599_v56, %v3599_v56 }
 0x10e   :  { %5955 = vst [vmem:[#allocation34_spill] sm:$0xff] %v3599_v56  ;;  %693 = vmatmul.f32.gmra.mxu2 %v3299_v9  ;;  %v310_v7 = vpop.f32.mrf.mxu0  ;;  %v375_v46 = vpop.f32.mrf.mxu1 }
 0x10f   :  { %v895_v17 = vadd.f32 %v894_v29, %v822_v34  ;;  %758 = vmatmul.f32.gmra.mxu3 %v3299_v9  ;;  %v3634_v16 = vadd.f32 %v375_v46, %v3333_v31 }
 0x111   :  { %v896_v38 = vadd.f32 %v895_v17, %v823_v35  ;;  %563 = vmatmul.f32.gmra.mxu0 %v3299_v9  ;;  %5957 = vst [vmem:[#allocation36_spill] sm:$0xff] %v3634_v16 }
 0x112   :  { %628 = vmatmul.f32.gmra.mxu1 %v3299_v9  ;;  %v440_v6 = vpop.f32.mrf.mxu2  ;;  %v505_v8 = vpop.f32.mrf.mxu3 }
 0x113   :  { %897 = vadd.xlane.f32.xlu0 %v896_v38  ;;  %v3644_v57 = vadd.f32 %v440_v6, %v3344_v44  ;;  %v3665_v1 = vadd.f32 %v505_v8, %v3347_v45 }
 0x115   :  { %5958 = vst [vmem:[#allocation37_spill] sm:$0xff] %v3644_v57  ;;  %v826_v6 = vmul.f32 %v3644_v57, %v3644_v57 }
 0x116   :  { %696 = vmatmul.f32.gmra.mxu2 %v3305_v10  ;;  %v313_v5 = vpop.f32.mrf.mxu0  ;;  %v378_v4 = vpop.f32.mrf.mxu1  ;;  %5961 = vst [vmem:[#allocation40_spill] sm:$0xff] %v3665_v1 }
 0x117   :  { %761 = vmatmul.f32.gmra.mxu3 %v3305_v10  ;;  %v3653_v19 = vadd.f32 %v313_v5, %v3330_v30 }
 0x119   :  { %566 = vmatmul.f32.gmra.mxu0 %v3305_v10  ;;  %5959 = vst [vmem:[#allocation38_spill] sm:$0xff] %v3653_v19 }
 0x11a   :  { %631 = vmatmul.f32.gmra.mxu1 %v3305_v10  ;;  %v443_v29 = vpop.f32.mrf.mxu2  ;;  %v508_v9 = vpop.f32.mrf.mxu3 }
 0x11b   :  { %v3675_v0 = vadd.f32 %v443_v29, %v3344_v44 }
 0x11d   :  { %5962 = vst [vmem:[#allocation41_spill] sm:$0xff] %v3675_v0 }
 0x11e   :  { %699 = vmatmul.f32.gmra.mxu2 %v3311_v13  ;;  %v316_v34 = vpop.f32.mrf.mxu0  ;;  %v381_v35 = vpop.f32.mrf.mxu1 }
 0x11f   :  { %764 = vmatmul.f32.gmra.mxu3 %v3311_v13  ;;  %v3695_v47 = vadd.f32 %v316_v34, %v3330_v30 }
 0x121   :  { %569 = vmatmul.f32.gmra.mxu0 %v3311_v13  ;;  %5964 = vst [vmem:[#allocation43_spill] sm:$0xff] %v3695_v47 }
 0x122   :  { %634 = vmatmul.f32.gmra.mxu1 %v3311_v13  ;;  %v446_v10 = vpop.f32.mrf.mxu2  ;;  %v3627_v56 = vpop.f32.mrf.mxu3  ;;  %v3631_v13 = vadd.f32 %v310_v7, %v3330_v30 }
 0x124   :  { %5956 = vst [vmem:[#allocation35_spill] sm:$0xff] %v3631_v13 }
 0x126   :  { %702 = vmatmul.f32.gmra.mxu2 %v3317_v18  ;;  %v3646_v7 = vpop.f32.mrf.mxu0  ;;  %v3648_v46 = vpop.f32.mrf.mxu1 }
 0x127   :  { %767 = vmatmul.f32.gmra.mxu3 %v3317_v18 }
 0x129   :  { %572 = vmatmul.f32.gmra.mxu0 %v3317_v18 }
 0x12a   :  { %637 = vmatmul.f32.gmra.mxu1 %v3317_v18  ;;  %v824_v18 = vmul.f32 %v3631_v13, %v3631_v13  ;;  %v3658_v13 = vpop.f32.mrf.mxu2  ;;  %v3667_v2 = vpop.f32.mrf.mxu3 }
 0x12e   :  { %705 = vmatmul.f32.gmra.mxu2 %v3325_v25 }
 0x12f   :  { %770 = vmatmul.f32.gmra.mxu3 %v3325_v25 }
 0x131   :  { %575 = vmatmul.f32.gmra.mxu0 %v3325_v25 }
 0x132   :  { %640 = vmatmul.f32.gmra.mxu1 %v3325_v25  ;;  %v3656_v25 = vadd.f32 %v378_v4, %v3333_v31  ;;  %v828_v4 = vmul.f32 %v3653_v19, %v3653_v19 }
 0x134   :  { %5960 = vst [vmem:[#allocation39_spill] sm:$0xff] %v3656_v25  ;;  %v829_v33 = vmul.f32 %v3656_v25, %v3656_v25 }
 0x136   :  { %v848_v17 = vpop.xlane.xlu0 %847  ;;  %708 = vmatmul.f32.gmra.mxu2 %v3349_v50  ;;  %v3697_v32 = vpop.f32.mrf.mxu0 }
 0x137   :  { %v924_v38 = vmax.f32 %v848_v17, 1e-24  ;;  %v825_v17 = vmul.f32 %v3634_v16, %v3634_v16  ;;  %773 = vmatmul.f32.gmra.mxu3 %v3349_v50 }
 0x139   :  { %2946 = vrsqrt.f32 %v924_v38  ;;  %v899_v55 = vadd.f32 %v825_v17, %v824_v18  ;;  %578 = vmatmul.f32.gmra.mxu0 %v3349_v50  ;;  %v827_v18 = vmul.f32 %v3665_v1, %v3665_v1  ;;  %vm946_vm0 = vweird.f32 %v924_v38 }
 0x13a   :  { %643 = vmatmul.f32.gmra.mxu1 %v3349_v50  ;;  %v830_v50 = vmul.f32 %v3675_v0, %v3675_v0  ;;  %v904_v1 = vadd.f32 %v829_v33, %v828_v4  ;;  %v3721_v4 = vadd.f32 %v3627_v56, %v3347_v45  ;;  %v832_v56 = vmul.f32 %v3695_v47, %v3695_v47 }
 0x13b   :  { %v900_v17 = vadd.f32 %v899_v55, %v826_v6  ;;  %v3701_v6 = vadd.f32 %v381_v35, %v3333_v31  ;;  %v3717_v34 = vpop.f32.mrf.mxu2 }
 0x13c   :  { %5967 = vst [vmem:[#allocation46_spill] sm:$0xff] %v3721_v4 }
 0x13d   :  { %5965 = vst [vmem:[#allocation44_spill] sm:$0xff] %v3701_v6 }
 0x13e   :  { %v853_v3 = vpop.xlane.xlu0 %852  ;;  %711 = vmatmul.f32.gmra.mxu2 %v3379_v39 }
 0x13f   :  { %v2947_v49 = vpop.eup %2946  ;;  %v3650_v20 = vmax.f32 %v853_v3, 1e-24  ;;  %v1548_v3 = vld [vmem:[#allocation8] sm:$0xf]  ;;  %776 = vmatmul.f32.gmra.mxu3 %v3379_v39 }
 0x140   :  { %v941_v16 = vmul.f32 %v2947_v49, %v924_v38  ;;  %v3677_v58 = vperm.slane %v1548_v3, 0  ;;  %v3683_v8 = vperm.slane %v1548_v3, 2  ;;  %vm947_vm1 = vweird.f32 %v2947_v49 }
 0x141   :  { %2948 = vrsqrt.f32 %v3650_v20  ;;  %vm948_vm2 = vmor %vm946_vm0, %vm947_vm1  ;;  %vm956_vm3 = vweird.f32 %v3650_v20  ;;  %v3713_v33 = vperm.slane %v1548_v3, 3  ;;  %581 = vmatmul.f32.gmra.mxu0 %v3379_v39 }
 0x142   :  { %v942_v5 = vmul.f32 %v2947_v49, %v941_v16  ;;  %v3681_v16 = vperm.slane %v1548_v3, 1  ;;  %646 = vmatmul.f32.gmra.mxu1 %v3379_v39 }
 0x144   :  { %v943_v57 = vmul.f32 0.5, %v942_v5  ;;  %v3688_v5 = vadd.f32 %v508_v9, %v3347_v45  ;;  %v3704_v9 = vadd.f32 %v446_v10, %v3344_v44 }
 0x146   :  { %v944_v19 = vsub.f32 1.5, %v943_v57  ;;  %v858_v29 = vpop.xlane.xlu1 %857  ;;  %5963 = vst [vmem:[#allocation42_spill] sm:$0xff] %v3688_v5  ;;  %v831_v38 = vmul.f32 %v3688_v5, %v3688_v5  ;;  %v3741_v5 = vpop.f32.mrf.mxu3 }
 0x147   :  { %v2949_v25 = vpop.eup %2948  ;;  %v3690_v48 = vmax.f32 %v858_v29, 1e-24  ;;  %5966 = vst [vmem:[#allocation45_spill] sm:$0xff] %v3704_v9  ;;  %v3706_v29 = vpop.f32.mrf.mxu1 }
 0x148   :  { %v945_v55 = vmul.f32 %v2947_v49, %v944_v19  ;;  %v951_v57 = vmul.f32 %v2949_v25, %v3650_v20  ;;  %v3715_v19 = vadd.f32 %v900_v17, %v827_v18  ;;  %vm957_vm4 = vweird.f32 %v2949_v25 }
 0x149   :  { %2950 = vrsqrt.f32 %v3690_v48  ;;  %vm966_vm5 = vweird.f32 %v3690_v48  ;;  %vm958_vm6 = vmor %vm956_vm3, %vm957_vm4 }
 0x14a   :  { %v949_v35 = vsel %vm948_vm2, %v2947_v49, %v945_v55  ;;  %v952_v10 = vmul.f32 %v2949_v25, %v951_v57  ;;  %v905_v49 = vadd.f32 %v904_v1, %v830_v50  ;;  %v833_v55 = vmul.f32 %v3701_v6, %v3701_v6 }
 0x14b   :  { %v3727_v0 = vmul.f32 %v949_v35, %v3338_v42  ;;  %v3730_v3 = vmul.f32 %v949_v35, %v3341_v43  ;;  %v3733_v18 = vmul.f32 %v949_v35, %v3356_v59  ;;  %v834_v57 = vmul.f32 %v3704_v9, %v3704_v9 }
 0x14c   :  { %v953_v17 = vmul.f32 0.5, %v952_v10  ;;  %v3746_v42 = vmul.f32 %v949_v35, %v3359_v60  ;;  %v3754_v1 = vadd.f32 %v3646_v7, %v3330_v30  ;;  %v3758_v9 = vadd.f32 %v3648_v46, %v3333_v31 }
 0x14d   :  { %5968 = vst [vmem:[#allocation47_spill] sm:$0xff] %v3727_v0  ;;  %v1558_v43 = vmul.f32 %v3677_v58, %v3727_v0  ;;  %v1559_v59 = vmul.f32 %v3681_v16, %v3730_v3  ;;  %v3762_v60 = vadd.f32 %v3658_v13, %v3344_v44  ;;  %v1560_v6 = vmul.f32 %v3683_v8, %v3733_v18 }
 0x14e   :  { %5969 = vst [vmem:[#allocation48_spill] sm:$0xff] %v3730_v3  ;;  %v954_v50 = vsub.f32 1.5, %v953_v17  ;;  %v863_v10 = vpop.xlane.xlu1 %862  ;;  %v3768_v7 = vadd.f32 %v905_v49, %v831_v38  ;;  %v909_v46 = vadd.f32 %v833_v55, %v832_v56  ;;  %v1561_v13 = vmul.f32 %v3713_v33, %v3746_v42  ;;  %v537_v38 = vpop.f32.mrf.mxu0 }
 0x14f   :  { %5970 = vst [vmem:[#allocation49_spill] sm:$0xff] %v3733_v18  ;;  %v2951_v39 = vpop.eup %2950  ;;  %v3764_v35 = vmax.f32 %v863_v10, 1e-24  ;;  %v1622_v47 = vadd.f32 %v1559_v59, %v1558_v43  ;;  %v3779_v43 = vmul.f32 %v3754_v1, %v3754_v1  ;;  %v602_v49 = vpop.f32.mrf.mxu1  ;;  %v3783_v56 = vmul.f32 %v3758_v9, %v3758_v9 }
 0x150   :  { %5971 = vst [vmem:[#allocation50_spill] sm:$0xff] %v3746_v42  ;;  %v955_v17 = vmul.f32 %v2949_v25, %v954_v50  ;;  %v961_v3 = vmul.f32 %v2951_v39, %v3690_v48  ;;  %v3787_v20 = vmul.f32 %v3762_v60, %v3762_v60  ;;  %vm967_vm7 = vweird.f32 %v2951_v39 }
 0x151   :  { %5972 = vst [vmem:[#allocation51_spill] sm:$0xff] %v3754_v1  ;;  %2952 = vrsqrt.f32 %v3764_v35  ;;  %v1623_v10 = vadd.f32 %v1622_v47, %v1560_v6  ;;  %vm976_vm8 = vweird.f32 %v3764_v35  ;;  %vm968_vm9 = vmor %vm966_vm5, %vm967_vm7 }
 0x152   :  { %5973 = vst [vmem:[#allocation52_spill] sm:$0xff] %v3758_v9  ;;  %v959_v59 = vsel %vm958_vm6, %v2949_v25, %v955_v17  ;;  %v962_v50 = vmul.f32 %v2951_v39, %v961_v3  ;;  %v667_v25 = vpop.f32.mrf.mxu2  ;;  %v3800_v17 = vadd.f32 %v3667_v2, %v3347_v45  ;;  %v3817_v2 = vperm.slane %v3323_v24, 5 }
 0x153   :  { %5974 = vst [vmem:[#allocation53_spill] sm:$0xff] %v3762_v60  ;;  %v1624_v55 = vadd.f32 %v1623_v10, %v1561_v13  ;;  %v3790_v42 = vmul.f32 %v959_v59, %v3368_v21  ;;  %v3793_v47 = vmul.f32 %v959_v59, %v3371_v22  ;;  %v3796_v6 = vmul.f32 %v959_v59, %v3382_v40 }
 0x154   :  { %v963_v3 = vmul.f32 0.5, %v962_v50  ;;  %5978 = vst [vmem:[#allocation57_spill] sm:$0xff] %v3800_v17  ;;  %v3804_v60 = vadd.f32 %v3697_v32, %v3330_v30  ;;  %v3807_v13 = vperm.slane %v3323_v24, 4  ;;  %v3810_v21 = vmul.f32 %v959_v59, %v3385_v41  ;;  %v732_v41 = vpop.f32.mrf.mxu3 }
 0x155   :  { %5975 = vst [vmem:[#allocation54_spill] sm:$0xff] %v3790_v42  ;;  %1625 = vadd.xlane.f32.xlu1 %v1624_v55  ;;  %v1562_v22 = vmul.f32 %v3677_v58, %v3790_v42  ;;  %v1563_v40 = vmul.f32 %v3681_v16, %v3793_v47  ;;  %v3820_v32 = vperm.slane %v3323_v24, 6  ;;  %v835_v50 = vmul.f32 %v3721_v4, %v3721_v4 }
 0x156   :  { %5976 = vst [vmem:[#allocation55_spill] sm:$0xff] %v3793_v47  ;;  %v964_v10 = vsub.f32 1.5, %v963_v3  ;;  %v868_v30 = vpop.xlane.xlu2 %867  ;;  %v1564_v9 = vmul.f32 %v3683_v8, %v3796_v6  ;;  %v910_v47 = vadd.f32 %v909_v46, %v834_v57  ;;  %v3832_v24 = vmul.f32 %v3804_v60, %v3804_v60 }
 0x157   :  { %5977 = vst [vmem:[#allocation56_spill] sm:$0xff] %v3796_v6  ;;  %v2953_v59 = vpop.eup %2952  ;;  %v3824_v55 = vmax.f32 %v868_v30, 1e-24  ;;  %v1627_v1 = vadd.f32 %v1563_v40, %v1562_v22  ;;  %v3836_v4 = vadd.f32 %v3706_v29, %v3333_v31  ;;  %v1565_v57 = vmul.f32 %v3713_v33, %v3810_v21  ;;  %v540_v40 = vpop.f32.mrf.mxu0 }
 0x158   :  { %5979 = vst [vmem:[#allocation58_spill] sm:$0xff] %v3804_v60  ;;  %v965_v18 = vmul.f32 %v2951_v39, %v964_v10  ;;  %v971_v3 = vmul.f32 %v2953_v59, %v3764_v35  ;;  %v3846_v22 = vadd.f32 %v3717_v34, %v3344_v44  ;;  %v605_v10 = vpop.f32.mrf.mxu1  ;;  %v3849_v31 = vadd.f32 %v537_v38, %v3807_v13 }
 0x159   :  { %5980 = vst [vmem:[#allocation59_spill] sm:$0xff] %v3810_v21  ;;  %2954 = vrsqrt.f32 %v3824_v55  ;;  %v1628_v46 = vadd.f32 %v1627_v1, %v1564_v9  ;;  %v3852_v48 = vadd.f32 %v602_v49, %v3817_v2  ;;  %v3872_v38 = vadd.f32 %v3741_v5, %v3347_v45 }
 0x15a   :  { %5981 = vst [vmem:[#allocation60_spill] sm:$0xff] %v3836_v4  ;;  %v969_v30 = vsel %vm968_vm9, %v2951_v39, %v965_v18  ;;  %v972_v60 = vmul.f32 %v2953_v59, %v971_v3  ;;  %v670_v34 = vpop.f32.mrf.mxu2  ;;  %v3865_v18 = vmul.f32 %v3836_v4, %v3836_v4  ;;  %vm977_vm10 = vweird.f32 %v2953_v59 }
 0x15b   :  { %5982 = vst [vmem:[#allocation61_spill] sm:$0xff] %v3846_v22  ;;  %v1629_v29 = vadd.f32 %v1628_v46, %v1565_v57  ;;  %v3855_v6 = vmul.f32 %v969_v30, %v3393_v61  ;;  %v3858_v9 = vmul.f32 %v969_v30, %v3396_v63  ;;  %v3861_v44 = vmul.f32 %v969_v30, %v3405_v27  ;;  %vm978_vm12 = vmor %vm976_vm8, %vm977_vm10 }
 0x15c   :  { %v973_v1 = vmul.f32 0.5, %v972_v60  ;;  %v3868_v39 = vmul.f32 %v969_v30, %v3408_v28  ;;  %5987 = vst [vmem:[#allocation66_spill] sm:$0xff] %v3872_v38  ;;  %v3877_v61 = vmul.f32 %v3846_v22, %v3846_v22  ;;  %v3026_v60 = vld [vmem:[#allocation7] sm:$0xff]  ;;  %v1164_v5 = vmul.f32 %v3849_v31, %v3849_v31 }
 0x15d   :  { %5983 = vst [vmem:[#allocation62_spill] sm:$0xff] %v3855_v6  ;;  %902 = vadd.xlane.f32.xlu1 %v3715_v19  ;;  %1630 = vadd.xlane.f32.xlu2 %v1629_v29  ;;  %v1566_v63 = vmul.f32 %v3677_v58, %v3855_v6  ;;  %v1567_v27 = vmul.f32 %v3681_v16, %v3858_v9  ;;  %v3883_v28 = vperm.slane %v3026_v60, 7  ;;  %vm986_vm11 = vweird.f32 %v3824_v55 }
 0x15e   :  { %5984 = vst [vmem:[#allocation63_spill] sm:$0xff] %v3858_v9  ;;  %v974_v49 = vsub.f32 1.5, %v973_v1  ;;  %v873_v45 = vpop.xlane.xlu2 %872  ;;  %v1165_v19 = vmul.f32 %v3852_v48, %v3852_v48  ;;  %v1568_v46 = vmul.f32 %v3683_v8, %v3861_v44  ;;  %v3894_v29 = vadd.f32 %v667_v25, %v3820_v32  ;;  %v735_v9 = vpop.f32.mrf.mxu3 }
 0x15f   :  { %5985 = vst [vmem:[#allocation64_spill] sm:$0xff] %v3861_v44  ;;  %v2955_v3 = vpop.eup %2954  ;;  %v3889_v57 = vmax.f32 %v873_v45, 1e-24  ;;  %v1632_v30 = vadd.f32 %v1567_v27, %v1566_v63  ;;  %v1569_v22 = vmul.f32 %v3713_v33, %v3868_v39  ;;  %v3900_v4 = vadd.f32 %v910_v47, %v835_v50 }
 0x160   :  { %5986 = vst [vmem:[#allocation65_spill] sm:$0xff] %v3868_v39  ;;  %v975_v60 = vmul.f32 %v2953_v59, %v974_v49  ;;  %v981_v1 = vmul.f32 %v2955_v3, %v3824_v55  ;;  %v3907_v25 = vadd.f32 %v732_v41, %v3883_v28  ;;  %v3910_v27 = vadd.f32 %v540_v40, %v3807_v13  ;;  %v543_v49 = vpop.f32.mrf.mxu0  ;;  %v608_v45 = vpop.f32.mrf.mxu1 }
 0x161   :  { %2956 = vrsqrt.f32 %v3889_v57  ;;  %v1633_v63 = vadd.f32 %v1632_v30, %v1568_v46  ;;  %v3913_v47 = vadd.f32 %v605_v10, %v3817_v2  ;;  %v3916_v50 = vadd.f32 %v670_v34, %v3820_v32 }
 0x162   :  { %5988 = vst [vmem:[#allocation67_spill] sm:$0xff] %v3910_v27  ;;  %v979_v44 = vsel %vm978_vm12, %v2953_v59, %v975_v60  ;;  %v982_v39 = vmul.f32 %v2955_v3, %v981_v1  ;;  %v1166_v59 = vmul.f32 %v3894_v29, %v3894_v29  ;;  %v1228_v30 = vadd.f32 %v1165_v19, %v1164_v5 }
 0x163   :  { %5989 = vst [vmem:[#allocation68_spill] sm:$0xff] %v3913_v47  ;;  %v1634_v35 = vadd.f32 %v1633_v63, %v1569_v22  ;;  %v3919_v6 = vmul.f32 %v979_v44, %v3416_v51  ;;  %v3922_v41 = vmul.f32 %v979_v44, %v3419_v52  ;;  %v3925_v40 = vmul.f32 %v979_v44, %v3428_v12  ;;  %v673_v22 = vpop.f32.mrf.mxu2 }
 0x164   :  { %5990 = vst [vmem:[#allocation69_spill] sm:$0xff] %v3916_v50  ;;  %v983_v46 = vmul.f32 0.5, %v982_v39  ;;  %v3930_v10 = vmul.f32 %v979_v44, %v3431_v14  ;;  %vm987_vm13 = vweird.f32 %v2955_v3  ;;  %v1168_v12 = vmul.f32 %v3910_v27, %v3910_v27 }
 0x165   :  { %5991 = vst [vmem:[#allocation70_spill] sm:$0xff] %v3919_v6  ;;  %907 = vadd.xlane.f32.xlu1 %v3768_v7  ;;  %1635 = vadd.xlane.f32.xlu2 %v1634_v35  ;;  %v1570_v51 = vmul.f32 %v3677_v58, %v3919_v6  ;;  %v1571_v52 = vmul.f32 %v3681_v16, %v3922_v41  ;;  %vm996_vm14 = vweird.f32 %v3889_v57  ;;  %vm988_vm15 = vmor %vm986_vm11, %vm987_vm13 }
 0x166   :  { %5992 = vst [vmem:[#allocation71_spill] sm:$0xff] %v3922_v41  ;;  %v984_v34 = vsub.f32 1.5, %v983_v46  ;;  %v878_v39 = vpop.xlane.xlu0 %877  ;;  %v1169_v14 = vmul.f32 %v3913_v47, %v3913_v47  ;;  %v1170_v44 = vmul.f32 %v3916_v50, %v3916_v50  ;;  %v1167_v7 = vmul.f32 %v3907_v25, %v3907_v25 }
 0x167   :  { %5993 = vst [vmem:[#allocation72_spill] sm:$0xff] %v3925_v40  ;;  %v2957_v5 = vpop.eup %2956  ;;  %v3945_v19 = vmax.f32 %v878_v39, 1e-24  ;;  %v1572_v60 = vmul.f32 %v3683_v8, %v3925_v40  ;;  %v1637_v1 = vadd.f32 %v1571_v52, %v1570_v51  ;;  %v3950_v63 = vadd.f32 %v735_v9, %v3883_v28 }
 0x168   :  { %5994 = vst [vmem:[#allocation73_spill] sm:$0xff] %v3930_v10  ;;  %v985_v35 = vmul.f32 %v2955_v3, %v984_v34  ;;  %v991_v46 = vmul.f32 %v2957_v5, %v3889_v57  ;;  %v1573_v50 = vmul.f32 %v3713_v33, %v3930_v10  ;;  %v1229_v47 = vadd.f32 %v1228_v30, %v1166_v59  ;;  %v738_v59 = vpop.f32.mrf.mxu3 }
 0x169   :  { %5995 = vst [vmem:[#allocation74_spill] sm:$0xff] %v3950_v63  ;;  %2958 = vrsqrt.f32 %v3945_v19  ;;  %v1638_v39 = vadd.f32 %v1637_v1, %v1572_v60  ;;  %v3961_v51 = vadd.f32 %v543_v49, %v3807_v13  ;;  %v3964_v9 = vadd.f32 %v608_v45, %v3817_v2  ;;  %v546_v60 = vpop.f32.mrf.mxu0  ;;  %v611_v45 = vpop.f32.mrf.mxu1 }
 0x16a   :  { %v989_v52 = vsel %vm988_vm15, %v2955_v3, %v985_v35  ;;  %v992_v34 = vmul.f32 %v2957_v5, %v991_v46  ;;  %vm997_vm0 = vweird.f32 %v2957_v5  ;;  %v3967_v27 = vadd.f32 %v673_v22, %v3820_v32 }
 0x16b   :  { %5996 = vst [vmem:[#allocation75_spill] sm:$0xff] %v3961_v51  ;;  %v1639_v30 = vadd.f32 %v1638_v39, %v1573_v50  ;;  %v3970_v55 = vmul.f32 %v989_v52, %v3440_v23  ;;  %v3973_v10 = vmul.f32 %v989_v52, %v3443_v26  ;;  %v3976_v49 = vmul.f32 %v989_v52, %v3452_v36  ;;  %vm998_vm2 = vmor %vm996_vm14, %vm997_vm0 }
 0x16c   :  { %5997 = vst [vmem:[#allocation76_spill] sm:$0xff] %v3964_v9  ;;  %v993_v1 = vmul.f32 0.5, %v992_v34  ;;  %v3979_v3 = vmul.f32 %v989_v52, %v3455_v37  ;;  %v1230_v35 = vadd.f32 %v1229_v47, %v1167_v7  ;;  %v914_v22 = vadd.f32 %v3783_v56, %v3779_v43  ;;  %v676_v34 = vpop.f32.mrf.mxu2 }
 0x16d   :  { %5998 = vst [vmem:[#allocation77_spill] sm:$0xff] %v3967_v27  ;;  %vm1006_vm1 = vweird.f32 %v3945_v19  ;;  %1640 = vadd.xlane.f32.xlu0 %v1639_v30  ;;  %912 = vadd.xlane.f32.xlu2 %v3900_v4  ;;  %v1574_v23 = vmul.f32 %v3677_v58, %v3970_v55  ;;  %v1575_v26 = vmul.f32 %v3681_v16, %v3973_v10 }
 0x16e   :  { %5999 = vst [vmem:[#allocation78_spill] sm:$0xff] %v3970_v55  ;;  %v3991_v36 = vmul.f32 %v3961_v51, %v3961_v51  ;;  %v994_v37 = vsub.f32 1.5, %v993_v1  ;;  %v883_v47 = vpop.xlane.xlu1 %882  ;;  %v1173_v43 = vmul.f32 %v3964_v9, %v3964_v9  ;;  %v3997_v56 = vmul.f32 %v3967_v27, %v3967_v27  ;;  %v6098_v55 = vld [vmem:[#allocation50_spill] sm:$0xff] }
 0x16f   :  { %6000 = vst [vmem:[#allocation79_spill] sm:$0xff] %v3973_v10  ;;  %v839_v4 = vmul.f32 %v3800_v17, %v3800_v17  ;;  %v2959_v50 = vpop.eup %2958  ;;  %v4001_v7 = vmax.f32 %v883_v47, 1e-24  ;;  %v1576_v46 = vmul.f32 %v3683_v8, %v3976_v49  ;;  %v1642_v39 = vadd.f32 %v1575_v26, %v1574_v23 }
 0x170   :  { %6001 = vst [vmem:[#allocation80_spill] sm:$0xff] %v3976_v49  ;;  %v1233_v52 = vadd.f32 %v1169_v14, %v1168_v12  ;;  %v995_v30 = vmul.f32 %v2957_v5, %v994_v37  ;;  %v1001_v1 = vmul.f32 %v2959_v50, %v3945_v19  ;;  %v1577_v9 = vmul.f32 %v3713_v33, %v3979_v3  ;;  %v6097_v49 = vld [vmem:[#allocation56_spill] sm:$0xff] }
 0x171   :  { %6002 = vst [vmem:[#allocation81_spill] sm:$0xff] %v3979_v3  ;;  %v915_v27 = vadd.f32 %v914_v22, %v3787_v20  ;;  %2960 = vrsqrt.f32 %v4001_v7  ;;  %v1643_v47 = vadd.f32 %v1642_v39, %v1576_v46  ;;  %v1171_v23 = vmul.f32 %v3950_v63, %v3950_v63 }
 0x172   :  { %v4016_v12 = vadd.f32 %v738_v59, %v3883_v28  ;;  %v999_v14 = vsel %vm998_vm2, %v2957_v5, %v995_v30  ;;  %v1002_v26 = vmul.f32 %v2959_v50, %v1001_v1  ;;  %v1234_v37 = vadd.f32 %v1233_v52, %v1170_v44  ;;  %v741_v5 = vpop.f32.mrf.mxu3 }
 0x173   :  { %v4019_v51 = vadd.f32 %v546_v60, %v3807_v13  ;;  %v1644_v20 = vadd.f32 %v1643_v47, %v1577_v9  ;;  %v4022_v22 = vmul.f32 %v999_v14, %v3464_v53  ;;  %v4025_v57 = vmul.f32 %v999_v14, %v3467_v54  ;;  %v614_v60 = vpop.f32.mrf.mxu1 }
 0x174   :  { %6003 = vst [vmem:[#allocation82_spill] sm:$0xff] %v4016_v12  ;;  %v4028_v46 = vmul.f32 %v999_v14, %v3476_v11  ;;  %v1003_v39 = vmul.f32 0.5, %v1002_v26  ;;  %vm1007_vm3 = vweird.f32 %v2959_v50  ;;  %v4031_v59 = vmul.f32 %v999_v14, %v3479_v15  ;;  %v549_v11 = vpop.f32.mrf.mxu0 }
 0x175   :  { %6004 = vst [vmem:[#allocation83_spill] sm:$0xff] %v4019_v51  ;;  %v4034_v44 = vadd.f32 %v611_v45, %v3817_v2  ;;  %1645 = vadd.xlane.f32.xlu0 %v1644_v20  ;;  %1231 = vadd.xlane.f32.xlu2 %v1230_v35  ;;  %v916_v9 = vadd.f32 %v915_v27, %v839_v4  ;;  %vm1016_vm4 = vweird.f32 %v4001_v7  ;;  %vm1008_vm5 = vmor %vm1006_vm1, %vm1007_vm3 }
 0x176   :  { %6005 = vst [vmem:[#allocation84_spill] sm:$0xff] %v4022_v22  ;;  %v1578_v53 = vmul.f32 %v3677_v58, %v4022_v22  ;;  %v1579_v54 = vmul.f32 %v3681_v16, %v4025_v57  ;;  %v1004_v52 = vsub.f32 1.5, %v1003_v39  ;;  %v888_v15 = vpop.xlane.xlu2 %887  ;;  %v1235_v30 = vadd.f32 %v1234_v37, %v1171_v23  ;;  %v6095_v22 = vld [vmem:[#allocation49_spill] sm:$0xff] }
 0x177   :  { %6006 = vst [vmem:[#allocation85_spill] sm:$0xff] %v4025_v57  ;;  %v4043_v45 = vmul.f32 %v4019_v51, %v4019_v51  ;;  %v2961_v1 = vpop.eup %2960  ;;  %v4048_v27 = vmax.f32 %v888_v15, 1e-24  ;;  %v1580_v35 = vmul.f32 %v3683_v8, %v4028_v46  ;;  %v919_v47 = vadd.f32 %v3865_v18, %v3832_v24  ;;  %v6012_v51 = vld [vmem:[#allocation16_spill] sm:$0xff] }
 0x178   :  { %6007 = vst [vmem:[#allocation86_spill] sm:$0xff] %v4028_v46  ;;  %v1647_v4 = vadd.f32 %v1579_v54, %v1578_v53  ;;  %v1005_v14 = vmul.f32 %v2959_v50, %v1004_v52  ;;  %v1011_v23 = vmul.f32 %v2961_v1, %v4001_v7  ;;  %v1581_v26 = vmul.f32 %v3713_v33, %v4031_v59  ;;  %v679_v53 = vpop.f32.mrf.mxu2 }
 0x179   :  { %6008 = vst [vmem:[#allocation87_spill] sm:$0xff] %v4031_v59  ;;  %v1177_v37 = vmul.f32 %v4034_v44, %v4034_v44  ;;  %2962 = vrsqrt.f32 %v4048_v27  ;;  %v4061_v20 = vadd.f32 %v676_v34, %v3820_v32  ;;  %v843_v39 = vmul.f32 %v3872_v38, %v3872_v38 }
 0x17a   :  { %6009 = vst [vmem:[#allocation88_spill] sm:$0xff] %v4034_v44  ;;  %v1648_v19 = vadd.f32 %v1647_v4, %v1580_v35  ;;  %v1009_v24 = vsel %vm1008_vm5, %v2959_v50, %v1005_v14  ;;  %v1012_v18 = vmul.f32 %v2961_v1, %v1011_v23  ;;  %v920_v54 = vadd.f32 %v919_v47, %v3877_v61  ;;  %v6014_v50 = vld [vmem:[#allocation17_spill] sm:$0xff]  ;;  %v6016_v61 = vld [vmem:[#allocation18_spill] sm:$0xff] }
 0x17b   :  { %6010 = vst [vmem:[#allocation89_spill] sm:$0xff] %v4061_v20  ;;  %v1238_v52 = vadd.f32 %v1173_v43, %v3991_v36  ;;  %vm1017_vm6 = vweird.f32 %v2961_v1  ;;  %v4068_v44 = vmul.f32 %v1009_v24, %v3488_v62  ;;  %v4071_v35 = vmul.f32 %v1009_v24, %v6012_v51 }
 0x17c   :  { %v1649_v15 = vadd.f32 %v1648_v19, %v1581_v26  ;;  %v1013_v34 = vmul.f32 0.5, %v1012_v18  ;;  %v1175_v4 = vmul.f32 %v4016_v12, %v4016_v12  ;;  %v4077_v14 = vmul.f32 %v1009_v24, %v6014_v50  ;;  %vm1018_vm8 = vmor %vm1016_vm4, %vm1017_vm6 }
 0x17d   :  { %6011 = vst [vmem:[#allocation90_spill] sm:$0xff] %v4068_v44  ;;  %v1239_v59 = vadd.f32 %v1238_v52, %v3997_v56  ;;  %917 = vadd.xlane.f32.xlu0 %v916_v9  ;;  %v4080_v36 = vmul.f32 %v1009_v24, %v6016_v61  ;;  %v1582_v62 = vmul.f32 %v3677_v58, %v4068_v44  ;;  %vm1026_vm7 = vweird.f32 %v4048_v27  ;;  %v744_v9 = vpop.f32.mrf.mxu3 }
 0x17e   :  { %6013 = vst [vmem:[#allocation16_spill] sm:$0xff] %v4071_v35  ;;  %1650 = vadd.xlane.f32.xlu1 %v1649_v15  ;;  %v1583_v51 = vmul.f32 %v3681_v16, %v4071_v35  ;;  %v1014_v43 = vsub.f32 1.5, %v1013_v34  ;;  %1236 = vadd.xlane.f32.xlu2 %v1235_v30  ;;  %v893_v47 = vpop.xlane.xlu0 %892  ;;  %v1178_v56 = vmul.f32 %v4061_v20, %v4061_v20  ;;  %v552_v30 = vpop.f32.mrf.mxu0 }
 0x17f   :  { %6015 = vst [vmem:[#allocation17_spill] sm:$0xff] %v4077_v14  ;;  %v921_v23 = vadd.f32 %v920_v54, %v843_v39  ;;  %v2963_v26 = vpop.eup %2962  ;;  %v4092_v19 = vmax.f32 %v893_v47, 1e-24  ;;  %v1584_v24 = vmul.f32 %v3683_v8, %v4077_v14  ;;  %v4097_v52 = vadd.f32 %v741_v5, %v3883_v28  ;;  %v617_v15 = vpop.f32.mrf.mxu1  ;;  %v6026_v14 = vld [vmem:[#allocation21_spill] sm:$0xff] }
 0x180   :  { %6017 = vst [vmem:[#allocation18_spill] sm:$0xff] %v4080_v36  ;;  %v1652_v18 = vadd.f32 %v1583_v51, %v1582_v62  ;;  %v1015_v34 = vmul.f32 %v2961_v1, %v1014_v43  ;;  %v1021_v39 = vmul.f32 %v2963_v26, %v4048_v27  ;;  %v1240_v54 = vadd.f32 %v1239_v59, %v1175_v4  ;;  %v6022_v59 = vld [vmem:[#allocation19_spill] sm:$0xff] }
 0x181   :  { %6018 = vst [vmem:[#allocation91_spill] sm:$0xff] %v4097_v52  ;;  %v4101_v50 = vadd.f32 %v549_v11, %v3807_v13  ;;  %2964 = vrsqrt.f32 %v4092_v19  ;;  %v1585_v7 = vmul.f32 %v3713_v33, %v4080_v36  ;;  %v4107_v62 = vadd.f32 %v614_v60, %v3817_v2  ;;  %v6024_v11 = vld [vmem:[#allocation20_spill] sm:$0xff] }
 0x182   :  { %v1653_v61 = vadd.f32 %v1652_v18, %v1584_v24  ;;  %v1019_v5 = vsel %vm1018_vm8, %v2961_v1, %v1015_v34  ;;  %v1022_v51 = vmul.f32 %v2963_v26, %v1021_v39  ;;  %vm1027_vm9 = vweird.f32 %v2963_v26  ;;  %v682_v24 = vpop.f32.mrf.mxu2  ;;  %v6028_v1 = vld [vmem:[#allocation22_spill] sm:$0xff] }
 0x183   :  { %6019 = vst [vmem:[#allocation92_spill] sm:$0xff] %v4101_v50  ;;  %v4110_v43 = vadd.f32 %v679_v53, %v3820_v32  ;;  %v4113_v4 = vmul.f32 %v1019_v5, %v6022_v59  ;;  %v4116_v20 = vmul.f32 %v1019_v5, %v6024_v11  ;;  %v4119_v35 = vmul.f32 %v1019_v5, %v6026_v14  ;;  %vm4141_vm11 = vmor %vm1026_vm7, %vm1027_vm9 }
 0x184   :  { %6020 = vst [vmem:[#allocation93_spill] sm:$0xff] %v4107_v62  ;;  %v1654_v47 = vadd.f32 %v1653_v61, %v1585_v7  ;;  %v1023_v18 = vmul.f32 0.5, %v1022_v51  ;;  %v1180_v60 = vmul.f32 %v4101_v50, %v4101_v50  ;;  %v4124_v34 = vmul.f32 %v1019_v5, %v6028_v1 }
 0x185   :  { %6021 = vst [vmem:[#allocation94_spill] sm:$0xff] %v4110_v43  ;;  %v1243_v53 = vadd.f32 %v1177_v37, %v4043_v45  ;;  %vm1036_vm10 = vweird.f32 %v4092_v19  ;;  %v1586_v39 = vmul.f32 %v3677_v58, %v4113_v4  ;;  %v1587_v14 = vmul.f32 %v3681_v16, %v4116_v20 }
 0x186   :  { %6023 = vst [vmem:[#allocation19_spill] sm:$0xff] %v4113_v4  ;;  %922 = vadd.xlane.f32.xlu1 %v921_v23  ;;  %1655 = vadd.xlane.f32.xlu0 %v1654_v47  ;;  %v1179_v7 = vmul.f32 %v4097_v52, %v4097_v52  ;;  %v1024_v61 = vsub.f32 1.5, %v1023_v18  ;;  %v898_v51 = vpop.xlane.xlu0 %897  ;;  %v1181_v5 = vmul.f32 %v4107_v62, %v4107_v62  ;;  %v555_v52 = vpop.f32.mrf.mxu0  ;;  %v2285_v4 = vld [vmem:[#allocation10 + $0x138] sm:$0xff] }
 0x187   :  { %6025 = vst [vmem:[#allocation20_spill] sm:$0xff] %v4116_v20  ;;  %1241 = vadd.xlane.f32.xlu2 %v1240_v54  ;;  %v1182_v45 = vmul.f32 %v4110_v43, %v4110_v43  ;;  %v1244_v37 = vadd.f32 %v1243_v53, %v1178_v56  ;;  %v2965_v23 = vpop.eup %2964  ;;  %v4145_v59 = vmax.f32 %v898_v51, 1e-24  ;;  %v1588_v54 = vmul.f32 %v3683_v8, %v4119_v35  ;;  %v747_v43 = vpop.f32.mrf.mxu3  ;;  %v6038_v20 = vld [vmem:[#allocation24_spill] sm:$0xff] }
 0x188   :  { %6027 = vst [vmem:[#allocation21_spill] sm:$0xff] %v4119_v35  ;;  %v1589_v11 = vmul.f32 %v3713_v33, %v4124_v34  ;;  %v1657_v18 = vadd.f32 %v1587_v14, %v1586_v39  ;;  %v1025_v1 = vmul.f32 %v2963_v26, %v1024_v61  ;;  %v1031_v56 = vmul.f32 %v2965_v23, %v4092_v19  ;;  %v6036_v61 = vld [vmem:[#allocation23_spill] sm:$0xff] }
 0x189   :  { %6029 = vst [vmem:[#allocation22_spill] sm:$0xff] %v4124_v34  ;;  %v4153_v53 = vadd.f32 %v552_v30, %v3807_v13  ;;  %v4156_v27 = vadd.f32 %v617_v15, %v3817_v2  ;;  %2966 = vrsqrt.f32 %v4145_v59  ;;  %v1245_v62 = vadd.f32 %v1244_v37, %v1179_v7  ;;  %v620_v34 = vpop.f32.mrf.mxu1  ;;  %v6040_v7 = vld [vmem:[#allocation25_spill] sm:$0xff] }
 0x18a   :  { %v1658_v51 = vadd.f32 %v1657_v18, %v1588_v54  ;;  %v4160_v50 = vadd.f32 %v744_v9, %v3883_v28  ;;  %v1029_v39 = vsel %vm4141_vm11, %v2963_v26, %v1025_v1  ;;  %v1032_v14 = vmul.f32 %v2965_v23, %v1031_v56  ;;  %v6042_v18 = vld [vmem:[#allocation26_spill] sm:$0xff]  ;;  %v685_v56 = vpop.f32.mrf.mxu2 }
 0x18b   :  { %6032 = vst [vmem:[#allocation95_spill] sm:$0xff] %v4153_v53  ;;  %vm1037_vm12 = vweird.f32 %v2965_v23  ;;  %v4165_v30 = vadd.f32 %v682_v24, %v3820_v32  ;;  %v4168_v35 = vmul.f32 %v1029_v39, %v6036_v61  ;;  %v4171_v54 = vmul.f32 %v1029_v39, %v6038_v20 }
 0x18c   :  { %6033 = vst [vmem:[#allocation96_spill] sm:$0xff] %v4156_v27  ;;  %v1659_v15 = vadd.f32 %v1658_v51, %v1589_v11  ;;  %v4174_v9 = vmul.f32 %v1029_v39, %v6040_v7  ;;  %v1033_v37 = vmul.f32 0.5, %v1032_v14  ;;  %v1184_v47 = vmul.f32 %v4153_v53, %v4153_v53  ;;  %vm1038_vm14 = vmor %vm1036_vm10, %vm1037_vm12 }
 0x18d   :  { %6034 = vst [vmem:[#allocation97_spill] sm:$0xff] %v4160_v50  ;;  %v1185_v26 = vmul.f32 %v4156_v27, %v4156_v27  ;;  %v4181_v24 = vmul.f32 %v1029_v39, %v6042_v18  ;;  %vm1046_vm13 = vweird.f32 %v4145_v59  ;;  %v1186_v20 = vmul.f32 %v4165_v30, %v4165_v30 }
 0x18e   :  { %6035 = vst [vmem:[#allocation98_spill] sm:$0xff] %v4165_v30  ;;  %1660 = vadd.xlane.f32.xlu1 %v1659_v15  ;;  %1246 = vadd.xlane.f32.xlu0 %v1245_v62  ;;  %v1590_v11 = vmul.f32 %v3677_v58, %v4168_v35  ;;  %v1591_v1 = vmul.f32 %v3681_v16, %v4171_v54  ;;  %v1034_v51 = vsub.f32 1.5, %v1033_v37 }
 0x18f   :  { %6037 = vst [vmem:[#allocation23_spill] sm:$0xff] %v4168_v35  ;;  %v1592_v14 = vmul.f32 %v3683_v8, %v4174_v9  ;;  %v1183_v39 = vmul.f32 %v4160_v50, %v4160_v50  ;;  %v1248_v61 = vadd.f32 %v1181_v5, %v1180_v60  ;;  %v2967_v15 = vpop.eup %2966  ;;  %v1593_v62 = vmul.f32 %v3713_v33, %v4181_v24  ;;  %v2269_v35 = vld [vmem:[#allocation10 + $0xb8] sm:$0xff] }
 0x190   :  { %6039 = vst [vmem:[#allocation24_spill] sm:$0xff] %v4171_v54  ;;  %v1662_v7 = vadd.f32 %v1591_v1, %v1590_v11  ;;  %v4200_v18 = vadd.f32 %v555_v52, %v3807_v13  ;;  %v4203_v37 = vadd.f32 %v620_v34, %v3817_v2  ;;  %v1035_v30 = vmul.f32 %v2965_v23, %v1034_v51  ;;  %v750_v51 = vpop.f32.mrf.mxu3 }
 0x191   :  { %6041 = vst [vmem:[#allocation25_spill] sm:$0xff] %v4174_v9  ;;  %v1041_v27 = vmul.f32 %v2967_v15, %v4145_v59  ;;  %v1249_v53 = vadd.f32 %v1248_v61, %v1182_v45  ;;  %v4207_v60 = vadd.f32 %v747_v43, %v3883_v28  ;;  %vm1047_vm15 = vweird.f32 %v2967_v15  ;;  %v6048_v61 = vld [vmem:[#allocation27_spill] sm:$0xff]  ;;  %v6050_v9 = vld [vmem:[#allocation28_spill] sm:$0xff] }
 0x192   :  { %6043 = vst [vmem:[#allocation26_spill] sm:$0xff] %v4181_v24  ;;  %v1663_v19 = vadd.f32 %v1662_v7, %v1592_v14  ;;  %v1188_v5 = vmul.f32 %v4200_v18, %v4200_v18  ;;  %v4212_v11 = vadd.f32 %v685_v56, %v3820_v32  ;;  %v1039_v52 = vsel %vm1038_vm14, %v2965_v23, %v1035_v30  ;;  %v558_v7 = vpop.f32.mrf.mxu0  ;;  %v6054_v30 = vld [vmem:[#allocation30_spill] sm:$0xff]  ;;  %vm1048_vm0 = vmor %vm1046_vm13, %vm1047_vm15 }
 0x193   :  { %6044 = vst [vmem:[#allocation99_spill] sm:$0xff] %v4200_v18  ;;  %v1042_v1 = vmul.f32 %v2967_v15, %v1041_v27  ;;  %v1250_v50 = vadd.f32 %v1249_v53, %v1183_v39  ;;  %v1189_v34 = vmul.f32 %v4203_v37, %v4203_v37  ;;  %v1253_v45 = vadd.f32 %v1185_v26, %v1184_v47  ;;  %v623_v18 = vpop.f32.mrf.mxu1  ;;  %v6052_v27 = vld [vmem:[#allocation29_spill] sm:$0xff] }
 0x194   :  { %6045 = vst [vmem:[#allocation100_spill] sm:$0xff] %v4203_v37  ;;  %v1664_v24 = vadd.f32 %v1663_v19, %v1593_v62  ;;  %v4217_v43 = vmul.f32 %v1039_v52, %v6048_v61  ;;  %v4220_v14 = vmul.f32 %v1039_v52, %v6050_v9  ;;  %v1187_v23 = vmul.f32 %v4207_v60, %v4207_v60  ;;  %v6064_v37 = vld [vmem:[#allocation33_spill] sm:$0xff] }
 0x195   :  { %6046 = vst [vmem:[#allocation101_spill] sm:$0xff] %v4207_v60  ;;  %v1043_v54 = vmul.f32 0.5, %v1042_v1  ;;  %v4225_v53 = vmul.f32 %v1039_v52, %v6052_v27  ;;  %v4228_v56 = vmul.f32 %v1039_v52, %v6054_v30  ;;  %v1254_v47 = vadd.f32 %v1253_v45, %v1186_v20  ;;  %v688_v20 = vpop.f32.mrf.mxu2 }
 0x196   :  { %6047 = vst [vmem:[#allocation102_spill] sm:$0xff] %v4212_v11  ;;  %1665 = vadd.xlane.f32.xlu1 %v1664_v24  ;;  %1251 = vadd.xlane.f32.xlu0 %v1250_v50  ;;  %v1594_v26 = vmul.f32 %v3677_v58, %v4217_v43  ;;  %v1595_v9 = vmul.f32 %v3681_v16, %v4220_v14 }
 0x197   :  { %6049 = vst [vmem:[#allocation27_spill] sm:$0xff] %v4217_v43  ;;  %v1044_v39 = vsub.f32 1.5, %v1043_v54  ;;  %v1190_v62 = vmul.f32 %v4212_v11, %v4212_v11  ;;  %v1596_v19 = vmul.f32 %v3683_v8, %v4225_v53  ;;  %v4242_v50 = vadd.f32 %v750_v51, %v3883_v28  ;;  %v2302_v43 = vld [vmem:[#allocation10 + $0x1c0] sm:$0xff] }
 0x198   :  { %6051 = vst [vmem:[#allocation28_spill] sm:$0xff] %v4220_v14  ;;  %v1667_v24 = vadd.f32 %v1595_v9, %v1594_v26  ;;  %v4245_v1 = vadd.f32 %v558_v7, %v3807_v13  ;;  %v4248_v54 = vadd.f32 %v623_v18, %v3817_v2  ;;  %v1258_v59 = vadd.f32 %v1189_v34, %v1188_v5  ;;  %v6060_v9 = vld [vmem:[#allocation31_spill] sm:$0xff] }
 0x199   :  { %6053 = vst [vmem:[#allocation29_spill] sm:$0xff] %v4225_v53  ;;  %v1045_v52 = vmul.f32 %v2967_v15, %v1044_v39  ;;  %v1255_v45 = vadd.f32 %v1254_v47, %v1187_v23  ;;  %v1597_v61 = vmul.f32 %v3713_v33, %v4228_v56  ;;  %v4253_v26 = vadd.f32 %v688_v20, %v3820_v32  ;;  %v6062_v39 = vld [vmem:[#allocation32_spill] sm:$0xff]  ;;  %v753_v47 = vpop.f32.mrf.mxu3  ;;  %v6083_v14 = vld [vmem:[#allocation39_spill] sm:$0xff] }
 0x19a   :  { %6055 = vst [vmem:[#allocation30_spill] sm:$0xff] %v4228_v56  ;;  %v1668_v27 = vadd.f32 %v1667_v24, %v1596_v19  ;;  %v1192_v5 = vmul.f32 %v4245_v1, %v4245_v1  ;;  %v1193_v34 = vmul.f32 %v4248_v54, %v4248_v54  ;;  %v1259_v23 = vadd.f32 %v1258_v59, %v1190_v62  ;;  %v6066_v19 = vld [vmem:[#allocation34_spill] sm:$0xff] }
 0x19b   :  { %6056 = vst [vmem:[#allocation103_spill] sm:$0xff] %v4242_v50  ;;  %v1049_v30 = vsel %vm1048_vm0, %v2967_v15, %v1045_v52  ;;  %v1191_v15 = vmul.f32 %v4242_v50, %v4242_v50  ;;  %v561_v52 = vpop.f32.mrf.mxu0  ;;  %v1194_v62 = vmul.f32 %v4253_v26, %v4253_v26  ;;  %v4282_v59 = vadd.f32 %v753_v47, %v3883_v28 }
 0x19c   :  { %6057 = vst [vmem:[#allocation104_spill] sm:$0xff] %v4245_v1  ;;  %v1669_v51 = vadd.f32 %v1668_v27, %v1597_v61  ;;  %v4256_v11 = vmul.f32 %v1049_v30, %v6060_v9  ;;  %v4259_v7 = vmul.f32 %v1049_v30, %v6062_v39  ;;  %v4262_v18 = vmul.f32 %v1049_v30, %v6064_v37  ;;  %v626_v61 = vpop.f32.mrf.mxu1  ;;  %v2303_v1 = vld [vmem:[#allocation10 + $0x1c8] sm:$0xff] }
 0x19d   :  { %6058 = vst [vmem:[#allocation105_spill] sm:$0xff] %v4248_v54  ;;  %v4271_v24 = vmul.f32 %v1049_v30, %v6066_v19  ;;  %v4288_v30 = vadd.f32 %v626_v61, %v3817_v2  ;;  %v2287_v54 = vld [vmem:[#allocation10 + $0x148] sm:$0xff] }
 0x19e   :  { %6059 = vst [vmem:[#allocation106_spill] sm:$0xff] %v4253_v26  ;;  %1256 = vadd.xlane.f32.xlu1 %v1255_v45  ;;  %1670 = vadd.xlane.f32.xlu2 %v1669_v51  ;;  %v1598_v37 = vmul.f32 %v3677_v58, %v4256_v11  ;;  %v1599_v20 = vmul.f32 %v3681_v16, %v4259_v7 }
 0x19f   :  { %6061 = vst [vmem:[#allocation31_spill] sm:$0xff] %v4256_v11  ;;  %v1600_v27 = vmul.f32 %v3683_v8, %v4262_v18  ;;  %v4285_v45 = vadd.f32 %v561_v52, %v3807_v13  ;;  %v1260_v51 = vadd.f32 %v1259_v23, %v1191_v15  ;;  %v1601_v39 = vmul.f32 %v3713_v33, %v4271_v24 }
 0x1a0   :  { %6063 = vst [vmem:[#allocation32_spill] sm:$0xff] %v4259_v7  ;;  %v1672_v9 = vadd.f32 %v1599_v20, %v1598_v37  ;;  %v1263_v7 = vadd.f32 %v1193_v34, %v1192_v5  ;;  %v1197_v47 = vmul.f32 %v4288_v30, %v4288_v30  ;;  %v1195_v15 = vmul.f32 %v4282_v59, %v4282_v59 }
 0x1a1   :  { %6065 = vst [vmem:[#allocation33_spill] sm:$0xff] %v4262_v18  ;;  %v691_v18 = vpop.f32.mrf.mxu2  ;;  %v1196_v20 = vmul.f32 %v4285_v45, %v4285_v45  ;;  %v756_v61 = vpop.f32.mrf.mxu3 }
 0x1a2   :  { %6067 = vst [vmem:[#allocation34_spill] sm:$0xff] %v4271_v24  ;;  %v1673_v19 = vadd.f32 %v1672_v9, %v1600_v27  ;;  %v4297_v52 = vadd.f32 %v691_v18, %v3820_v32  ;;  %v1264_v23 = vadd.f32 %v1263_v7, %v1194_v62  ;;  %v4304_v27 = vadd.f32 %v756_v61, %v3883_v28  ;;  %v2261_v24 = vld [vmem:[#allocation10 + $0x78] sm:$0xff]  ;;  %v2308_v61 = vld [vmem:[#allocation10 + $0x1f0] sm:$0xff] }
 0x1a3   :  { %6068 = vst [vmem:[#allocation107_spill] sm:$0xff] %v4282_v59  ;;  %v1268_v9 = vadd.f32 %v1197_v47, %v1196_v20  ;;  %v2309_v7 = vld [vmem:[#allocation10 + $0x1f8] sm:$0xff]  ;;  %2378 = vmatpush.msra.mxu0 %v2261_v24  ;;  %v2276_v47 = vld [vmem:[#allocation10 + $0xf0] sm:$0xff]  ;;  %v2291_v24 = vld [vmem:[#allocation10 + $0x168] sm:$0xff] }
 0x1a4   :  { %6069 = vst [vmem:[#allocation108_spill] sm:$0xff] %v4285_v45  ;;  %v1674_v37 = vadd.f32 %v1673_v19, %v1601_v39  ;;  %v1198_v5 = vmul.f32 %v4297_v52, %v4297_v52  ;;  %v1265_v34 = vadd.f32 %v1264_v23, %v1195_v15  ;;  %v2277_v62 = vld [vmem:[#allocation10 + $0xf8] sm:$0xff]  ;;  %2573 = vmatpush.msra.mxu3 %v2309_v7  ;;  %v2292_v15 = vld [vmem:[#allocation10 + $0x170] sm:$0xff]  ;;  %v2275_v7 = vld [vmem:[#allocation10 + $0xe8] sm:$0xff] }
 0x1a5   :  { %6070 = vst [vmem:[#allocation109_spill] sm:$0xff] %v4288_v30  ;;  %2443 = vmatpush.msra.mxu1 %v2277_v62  ;;  %v2260_v23 = vld [vmem:[#allocation10 + $0x70] sm:$0xff] }
 0x1a6   :  { %1261 = vadd.xlane.f32.xlu1 %v1260_v51  ;;  %1675 = vadd.xlane.f32.xlu2 %v1674_v37  ;;  %6071 = vst [vmem:[#allocation110_spill] sm:$0xff] %v4297_v52  ;;  %v1199_v51 = vmul.f32 %v4304_v27, %v4304_v27  ;;  %v1269_v39 = vadd.f32 %v1268_v9, %v1198_v5  ;;  %v2293_v37 = vld [vmem:[#allocation10 + $0x178] sm:$0xff]  ;;  %v2288_v59 = vld [vmem:[#allocation10 + $0x150] sm:$0xff] }
 0x1a7   :  { %6072 = vst [vmem:[#allocation111_spill] sm:$0xff] %v4304_v27  ;;  %2508 = vmatpush.msra.mxu2 %v2293_v37  ;;  %2379 = vmatpush.msra.mxu0 %v2260_v23  ;;  %v2258_v23 = vld [vmem:[#allocation10 + $0x60] sm:$0xff] }
 0x1a8   :  { %v1270_v18 = vadd.f32 %v1269_v39, %v1199_v51  ;;  %2574 = vmatpush.msra.mxu3 %v2308_v61  ;;  %2444 = vmatpush.msra.mxu1 %v2276_v47  ;;  %v2259_v39 = vld [vmem:[#allocation10 + $0x68] sm:$0xff]  ;;  %v2306_v61 = vld [vmem:[#allocation10 + $0x1e0] sm:$0xff] }
 0x1a9   :  { %2509 = vmatpush.msra.mxu2 %v2292_v15  ;;  %2380 = vmatpush.msra.mxu0 %v2259_v39  ;;  %v2290_v15 = vld [vmem:[#allocation10 + $0x160] sm:$0xff] }
 0x1aa   :  { %2445 = vmatpush.msra.mxu1 %v2275_v7  ;;  %v2257_v7 = vld [vmem:[#allocation10 + $0x58] sm:$0xff] }
 0x1ab   :  { %2510 = vmatpush.msra.mxu2 %v2291_v24  ;;  %2381 = vmatpush.msra.mxu0 %v2258_v23  ;;  %v2289_v23 = vld [vmem:[#allocation10 + $0x158] sm:$0xff] }
 0x1ad   :  { %2511 = vmatpush.msra.mxu2 %v2290_v15  ;;  %v2273_v15 = vld [vmem:[#allocation10 + $0xd8] sm:$0xff]  ;;  %2382 = vmatpush.msra.mxu0 %v2257_v7 }
 0x1ae   :  { %1266 = vadd.xlane.f32.xlu2 %v1265_v34 }
 0x1af   :  { %2512 = vmatpush.msra.mxu2 %v2289_v23  ;;  %v2271_v23 = vld [vmem:[#allocation10 + $0xc8] sm:$0xff] }
 0x1b1   :  { %2513 = vmatpush.msra.mxu2 %v2288_v59 }
 0x1b3   :  { %2514 = vmatpush.msra.mxu2 %v2287_v54 }
 0x1b6   :  { %1271 = vadd.xlane.f32.xlu2 %v1270_v18  ;;  %v2307_v18 = vld [vmem:[#allocation10 + $0x1e8] sm:$0xff] }
 0x1b7   :  { %2575 = vmatpush.msra.mxu3 %v2307_v18  ;;  %v2274_v18 = vld [vmem:[#allocation10 + $0xe0] sm:$0xff] }
 0x1b8   :  { %2446 = vmatpush.msra.mxu1 %v2274_v18 }
 0x1b9   :  { %2576 = vmatpush.msra.mxu3 %v2306_v61  ;;  %v2305_v61 = vld [vmem:[#allocation10 + $0x1d8] sm:$0xff] }
 0x1ba   :  { %2447 = vmatpush.msra.mxu1 %v2273_v15  ;;  %v2255_v15 = vld [vmem:[#allocation10 + $0x48] sm:$0xff] }
 0x1bb   :  { %2577 = vmatpush.msra.mxu3 %v2305_v61 }
 0x1c8   :  { %v1626_v19 = vpop.xlane.xlu1 %1625 }
 0x1c9   :  { %v4308_v20 = vmul.f32 0.088388346, %v1626_v19 }
 0x1cb   :  { %v1718_v19 = vmul.f32 %v4308_v20, %v4308_v20 }
 0x1d0   :  { %v903_v5 = vpop.xlane.xlu1 %902  ;;  %v1631_v34 = vpop.xlane.xlu2 %1630 }
 0x1d1   :  { %v4310_v9 = vmax.f32 %v903_v5, 1e-24  ;;  %v4312_v51 = vmul.f32 0.088388346, %v1631_v34 }
 0x1d3   :  { %2968 = vrsqrt.f32 %v4310_v9  ;;  %v1719_v37 = vmul.f32 %v4312_v51, %v4312_v51  ;;  %vm1056_vm1 = vweird.f32 %v4310_v9 }
 0x1d5   :  { %v1734_v62 = vadd.f32 %v1719_v37, %v1718_v19 }
 0x1d7   :  { %v1735_v47 = vrot.slane %v1734_v62, 4 }
 0x1d8   :  { %v908_v5 = vpop.xlane.xlu1 %907  ;;  %v1636_v34 = vpop.xlane.xlu2 %1635 }
 0x1d9   :  { %v2969_v24 = vpop.eup %2968  ;;  %v1736_v39 = vadd.f32 %v1735_v47, %v1734_v62  ;;  %v4319_v11 = vmax.f32 %v908_v5, 1e-24  ;;  %v4323_v62 = vmul.f32 0.088388346, %v1636_v34  ;;  %v2256_v47 = vld [vmem:[#allocation10 + $0x50] sm:$0xff] }
 0x1da   :  { %v1051_v27 = vmul.f32 %v2969_v24, %v4310_v9  ;;  %v2272_v5 = vld [vmem:[#allocation10 + $0xd0] sm:$0xff]  ;;  %vm1057_vm2 = vweird.f32 %v2969_v24  ;;  %2383 = vmatpush.msra.mxu0 %v2256_v47  ;;  %v6073_v9 = vld [vmem:[#allocation35_spill] sm:$0xff] }
 0x1db   :  { %v1737_v52 = vrot.slane %v1736_v39, 2  ;;  %2970 = vrsqrt.f32 %v4319_v11  ;;  %2448 = vmatpush.msra.mxu1 %v2272_v5  ;;  %vm1058_vm3 = vmor %vm1056_vm1, %vm1057_vm2  ;;  %vm1066_vm4 = vweird.f32 %v4319_v11 }
 0x1dc   :  { %v1052_v19 = vmul.f32 %v2969_v24, %v1051_v27  ;;  %2384 = vmatpush.msra.mxu0 %v2255_v15 }
 0x1dd   :  { %v1738_v37 = vadd.f32 %v1737_v52, %v1736_v39  ;;  %v2304_v39 = vld [vmem:[#allocation10 + $0x1d0] sm:$0xff]  ;;  %2449 = vmatpush.msra.mxu1 %v2271_v23  ;;  %v6077_v23 = vld [vmem:[#allocation37_spill] sm:$0xff] }
 0x1de   :  { %v1053_v30 = vmul.f32 0.5, %v1052_v19  ;;  %2578 = vmatpush.msra.mxu3 %v2304_v39  ;;  %v6075_v39 = vld [vmem:[#allocation36_spill] sm:$0xff] }
 0x1df   :  { %v1739_v45 = vrot.slane %v1738_v37, 1 }
 0x1e0   :  { %v1054_v26 = vsub.f32 1.5, %v1053_v30  ;;  %v913_v52 = vpop.xlane.xlu2 %912  ;;  %v1641_v27 = vpop.xlane.xlu0 %1640  ;;  %2579 = vmatpush.msra.mxu3 %v2303_v1 }
 0x1e1   :  { %v2971_v18 = vpop.eup %2970  ;;  %v1740_v19 = vadd.f32 %v1739_v45, %v1738_v37  ;;  %v4326_v7 = vmax.f32 %v913_v52, 1e-24  ;;  %v4328_v34 = vmul.f32 0.088388346, %v1641_v27  ;;  %v1720_v37 = vmul.f32 %v4323_v62, %v4323_v62 }
 0x1e2   :  { %v1055_v61 = vmul.f32 %v2969_v24, %v1054_v26  ;;  %v1061_v30 = vmul.f32 %v2971_v18, %v4319_v11  ;;  %vm1067_vm5 = vweird.f32 %v2971_v18  ;;  %v2286_v11 = vld [vmem:[#allocation10 + $0x140] sm:$0xff]  ;;  %2580 = vmatpush.msra.mxu3 %v2302_v43 }
 0x1e3   :  { %v4334_v45 = vmax.f32 %v1740_v19, 1e-24  ;;  %2972 = vrsqrt.f32 %v4326_v7  ;;  %v1721_v26 = vmul.f32 %v4328_v34, %v4328_v34  ;;  %vm1068_vm6 = vmor %vm1066_vm4, %vm1067_vm5  ;;  %2515 = vmatpush.msra.mxu2 %v2286_v11  ;;  %vm1076_vm10 = vweird.f32 %v4326_v7 }
 0x1e4   :  { %v1059_v59 = vsel %vm1058_vm3, %v2969_v24, %v1055_v61  ;;  %v1062_v47 = vmul.f32 %v2971_v18, %v1061_v30  ;;  %v6079_v24 = vld [vmem:[#allocation40_spill] sm:$0xff] }
 0x1e5   :  { %2974 = vrsqrt.f32 %v4334_v45  ;;  %v1741_v5 = vadd.f32 %v1721_v26, %v1720_v37  ;;  %v4343_v27 = vmul.f32 %v1059_v59, %v6073_v9  ;;  %v4346_v19 = vmul.f32 %v1059_v59, %v6075_v39  ;;  %2516 = vmatpush.msra.mxu2 %v2285_v4  ;;  %v6091_v4 = vld [vmem:[#allocation42_spill] sm:$0xff] }
 0x1e6   :  { %v1063_v52 = vmul.f32 0.5, %v1062_v47  ;;  %v4350_v50 = vmul.f32 %v1059_v59, %v6077_v23  ;;  %v4353_v61 = vmul.f32 %v1059_v59, %v6079_v24  ;;  %v2254_v24 = vld [vmem:[#allocation10 + $0x40] sm:$0xff]  ;;  %vm1804_vm8 = vweird.f32 %v4334_v45 }
 0x1e7   :  { %6074 = vst [vmem:[#allocation35_spill] sm:$0xff] %v4343_v27  ;;  %v1742_v15 = vrot.slane %v1741_v5, 4  ;;  %v1602_v30 = vmul.f32 %v3677_v58, %v4343_v27  ;;  %v1603_v37 = vmul.f32 %v3681_v16, %v4346_v19  ;;  %v6081_v27 = vld [vmem:[#allocation38_spill] sm:$0xff]  ;;  %2385 = vmatpush.msra.mxu0 %v2254_v24 }
 0x1e8   :  { %6076 = vst [vmem:[#allocation36_spill] sm:$0xff] %v4346_v19  ;;  %v1064_v1 = vsub.f32 1.5, %v1063_v52  ;;  %v1232_v54 = vpop.xlane.xlu2 %1231  ;;  %v1646_v39 = vpop.xlane.xlu0 %1645  ;;  %v1604_v52 = vmul.f32 %v3683_v8, %v4350_v50 }
 0x1e9   :  { %6078 = vst [vmem:[#allocation37_spill] sm:$0xff] %v4350_v50  ;;  %v4359_v26 = vpop.eup %2972  ;;  %v1743_v47 = vadd.f32 %v1742_v15, %v1741_v5  ;;  %v4361_v9 = vmax.f32 %v1232_v54, 1e-24  ;;  %v1677_v23 = vadd.f32 %v1603_v37, %v1602_v30  ;;  %v1605_v54 = vmul.f32 %v3713_v33, %v4353_v61  ;;  %v2270_v30 = vld [vmem:[#allocation10 + $0xc0] sm:$0xff] }
 0x1ea   :  { %6080 = vst [vmem:[#allocation40_spill] sm:$0xff] %v4353_v61  ;;  %v1065_v60 = vmul.f32 %v2971_v18, %v1064_v1  ;;  %v1071_v1 = vmul.f32 %v4359_v26, %v4326_v7  ;;  %2450 = vmatpush.msra.mxu1 %v2270_v30  ;;  %v2253_v61 = vld [vmem:[#allocation10 + $0x38] sm:$0xff]  ;;  %v6087_v30 = vld [vmem:[#allocation41_spill] sm:$0xff]  ;;  %vm1077_vm11 = vweird.f32 %v4359_v26 }
 0x1eb   :  { %v4363_v56 = vpop.eup %2974  ;;  %v1744_v59 = vrot.slane %v1743_v47, 2  ;;  %2976 = vrsqrt.f32 %v4361_v9  ;;  %v1678_v19 = vadd.f32 %v1677_v23, %v1604_v52  ;;  %2386 = vmatpush.msra.mxu0 %v2253_v61  ;;  %vm1330_vm12 = vweird.f32 %v4361_v9  ;;  %vm4506_vm14 = vmor %vm1076_vm10, %vm1077_vm11 }
 0x1ec   :  { %v1799_v5 = vmul.f32 %v4363_v56, %v4334_v45  ;;  %v1069_v15 = vsel %vm1068_vm6, %v2971_v18, %v1065_v60  ;;  %v4384_v18 = vmul.f32 0.088388346, %v1646_v39  ;;  %2451 = vmatpush.msra.mxu1 %v2269_v35  ;;  %v1072_v43 = vmul.f32 %v4359_v26, %v1071_v1 }
 0x1ed   :  { %v1745_v37 = vadd.f32 %v1744_v59, %v1743_v47  ;;  %v4378_v53 = vmul.f32 %v1069_v15, %v6081_v27  ;;  %v4381_v50 = vmul.f32 %v1069_v15, %v6083_v14  ;;  %v564_v47 = vpop.f32.mrf.mxu0  ;;  %v1679_v23 = vadd.f32 %v1678_v19, %v1605_v54  ;;  %v2301_v59 = vld [vmem:[#allocation10 + $0x1b8] sm:$0xff]  ;;  %v2252_v19 = vld [vmem:[#allocation10 + $0x30] sm:$0xff] }
 0x1ee   :  { %v1800_v60 = vmul.f32 %v4363_v56, %v1799_v5  ;;  %6085 = vst [vmem:[#allocation112_spill] sm:$0xff] %v4384_v18  ;;  %v4391_v39 = vadd.f32 %v564_v47, %v3807_v13  ;;  %v629_v5 = vpop.f32.mrf.mxu1  ;;  %v4394_v11 = vmul.f32 %v1069_v15, %v6087_v30  ;;  %v2268_v54 = vld [vmem:[#allocation10 + $0xb0] sm:$0xff]  ;;  %2581 = vmatpush.msra.mxu3 %v2301_v59  ;;  %vm1805_vm7 = vweird.f32 %v4363_v56 }
 0x1ef   :  { %6082 = vst [vmem:[#allocation38_spill] sm:$0xff] %v4378_v53  ;;  %v1746_v36 = vrot.slane %v1745_v37, 1  ;;  %v1606_v27 = vmul.f32 %v3677_v58, %v4378_v53  ;;  %v1607_v14 = vmul.f32 %v3681_v16, %v4381_v50  ;;  %v2284_v53 = vld [vmem:[#allocation10 + $0x130] sm:$0xff]  ;;  %1680 = vadd.xlane.f32.xlu0 %v1679_v23  ;;  %v4406_v12 = vmul.f32 %v1069_v15, %v6091_v4  ;;  %vm1806_vm9 = vmor %vm1804_vm8, %vm1805_vm7 }
 0x1f0   :  { %6084 = vst [vmem:[#allocation39_spill] sm:$0xff] %v4381_v50  ;;  %v1801_v52 = vmul.f32 0.5, %v1800_v60  ;;  %v4400_v60 = vadd.f32 %v629_v5, %v3817_v2  ;;  %v2300_v50 = vld [vmem:[#allocation10 + $0x1b0] sm:$0xff]  ;;  %2387 = vmatpush.msra.mxu0 %v2252_v19  ;;  %2452 = vmatpush.msra.mxu1 %v2268_v54  ;;  %v1722_v23 = vmul.f32 %v4384_v18, %v4384_v18  ;;  %v4425_v5 = vmul.f32 0.5, %v1072_v43  ;;  %v2278_v18 = vld [vmem:[#allocation10 + $0x100] sm:$0xff] }
 0x1f1   :  { %6086 = vst [vmem:[#allocation113_spill] sm:$0xff] %v4391_v39  ;;  %v1651_v24 = vpop.xlane.xlu1 %1650  ;;  %v4396_v44 = vpop.eup %2976  ;;  %v1747_v61 = vadd.f32 %v1746_v36, %v1745_v37  ;;  %v1682_v46 = vadd.f32 %v1607_v14, %v1606_v27  ;;  %2517 = vmatpush.msra.mxu2 %v2284_v53  ;;  %2582 = vmatpush.msra.mxu3 %v2300_v50 }
 0x1f2   :  { %6088 = vst [vmem:[#allocation41_spill] sm:$0xff] %v4394_v11  ;;  %v4402_v47 = vmul.f32 0.088388346, %v1651_v24  ;;  %v1802_v30 = vsub.f32 1.5, %v1801_v52  ;;  %v1237_v35 = vpop.xlane.xlu2 %1236  ;;  %v694_v36 = vpop.f32.mrf.mxu2  ;;  %v1325_v37 = vmul.f32 %v4396_v44, %v4361_v9  ;;  %v1608_v14 = vmul.f32 %v3683_v8, %v4394_v11 }
 0x1f3   :  { %6089 = vst [vmem:[#allocation114_spill] sm:$0xff] %v4400_v60  ;;  %v4408_v1 = vmax.f32 %v1747_v61, 1e-24  ;;  %v918_v52 = vpop.xlane.xlu0 %917  ;;  %v4419_v27 = vadd.f32 %v694_v36, %v3820_v32  ;;  %v4428_v24 = vpop.f32.mrf.mxu3  ;;  %v4430_v50 = vmax.f32 %v1237_v35, 1e-24  ;;  %v1609_v54 = vmul.f32 %v3713_v33, %v4406_v12 }
 0x1f4   :  { %6090 = vst [vmem:[#allocation115_spill] sm:$0xff] %v4402_v47  ;;  %v1723_v59 = vmul.f32 %v4402_v47, %v4402_v47  ;;  %v1803_v15 = vmul.f32 %v4363_v56, %v1802_v30  ;;  %v4433_v19 = vmax.f32 %v918_v52, 1e-24  ;;  %v1683_v61 = vadd.f32 %v1682_v46, %v1608_v14 }
 0x1f5   :  { %6092 = vst [vmem:[#allocation42_spill] sm:$0xff] %v4406_v12  ;;  %2978 = vrsqrt.f32 %v4408_v1  ;;  %v1326_v4 = vmul.f32 %v4396_v44, %v1325_v37  ;;  %v4442_v35 = vmul.f32 %v4391_v39, %v4391_v39  ;;  %v1074_v52 = vsub.f32 1.5, %v4425_v5  ;;  %v2250_v12 = vld [vmem:[#allocation10 + $0x20] sm:$0xff] }
 0x1f6   :  { %6093 = vst [vmem:[#allocation116_spill] sm:$0xff] %v4419_v27  ;;  %v1748_v53 = vadd.f32 %v1723_v59, %v1722_v23  ;;  %v1807_v45 = vsel %vm1806_vm9, %v4363_v56, %v1803_v15  ;;  %v1684_v11 = vadd.f32 %v1683_v61, %v1609_v54  ;;  %2980 = vrsqrt.f32 %v4430_v50  ;;  %v2251_v56 = vld [vmem:[#allocation10 + $0x28] sm:$0xff]  ;;  %v632_v37 = vpop.f32.mrf.mxu1  ;;  %v6094_v39 = vld [vmem:[#allocation48_spill] sm:$0xff] }
 0x1f7   :  { %v1878_v30 = vmul.f32 %v1807_v45, %v4308_v20  ;;  %v1879_v43 = vmul.f32 %v1807_v45, %v4312_v51  ;;  %v2267_v23 = vld [vmem:[#allocation10 + $0xa8] sm:$0xff]  ;;  %v4448_v46 = vmul.f32 %v4400_v60, %v4400_v60  ;;  %v4452_v20 = vmul.f32 %v4419_v27, %v4419_v27  ;;  %v567_v51 = vpop.f32.mrf.mxu0  ;;  %2388 = vmatpush.msra.mxu0 %v2251_v56  ;;  %v2266_v27 = vld [vmem:[#allocation10 + $0xa0] sm:$0xff] }
 0x1f8   :  { %v1749_v36 = vrot.slane %v1748_v53, 4  ;;  %v2283_v59 = vld [vmem:[#allocation10 + $0x128] sm:$0xff]  ;;  %2982 = vrsqrt.f32 %v4433_v19  ;;  %1685 = vadd.xlane.f32.xlu0 %v1684_v11  ;;  %v4459_v54 = vmul.f32 0.5, %v1326_v4  ;;  %2453 = vmatpush.msra.mxu1 %v2267_v23  ;;  %v2282_v60 = vld [vmem:[#allocation10 + $0x120] sm:$0xff]  ;;  %v6096_v11 = vld [vmem:[#allocation55_spill] sm:$0xff]  ;;  %vm1331_vm13 = vweird.f32 %v4396_v44 }
 0x1f9   :  { %v2299_v15 = vld [vmem:[#allocation10 + $0x1a8] sm:$0xff]  ;;  %v1894_v45 = vmul.f32 %v1878_v30, %v3727_v0  ;;  %v1898_v5 = vmul.f32 %v1879_v43, %v3790_v42  ;;  %v1895_v57 = vmul.f32 %v1878_v30, %v6094_v39  ;;  %v1896_v38 = vmul.f32 %v1878_v30, %v6095_v22  ;;  %2518 = vmatpush.msra.mxu2 %v2283_v59  ;;  %v2298_v0 = vld [vmem:[#allocation10 + $0x1a0] sm:$0xff]  ;;  %v2249_v23 = vld [vmem:[#allocation10 + $0x18] sm:$0xff] }
 0x1fa   :  { %v1750_v61 = vadd.f32 %v1749_v36, %v1748_v53  ;;  %v1899_v3 = vmul.f32 %v1879_v43, %v6096_v11  ;;  %v1900_v10 = vmul.f32 %v1879_v43, %v6097_v49  ;;  %v1897_v42 = vmul.f32 %v1878_v30, %v6098_v55  ;;  %v697_v36 = vpop.f32.mrf.mxu2  ;;  %2583 = vmatpush.msra.mxu3 %v2299_v15  ;;  %v2248_v22 = vld [vmem:[#allocation10 + $0x10] sm:$0xff]  ;;  %vm4519_vm15 = vmor %vm1330_vm12, %vm1331_vm13 }
 0x1fb   :  { %v4455_v14 = vpop.eup %2978  ;;  %v1901_v4 = vmul.f32 %v1879_v43, %v3810_v21  ;;  %2389 = vmatpush.msra.mxu0 %v2250_v12  ;;  %v4471_v11 = vadd.f32 %v567_v51, %v3807_v13  ;;  %v4474_v59 = vadd.f32 %v632_v37, %v3817_v2  ;;  %v4477_v30 = vadd.f32 %v697_v36, %v3820_v32  ;;  %v2265_v43 = vld [vmem:[#allocation10 + $0x98] sm:$0xff]  ;;  %v762_v55 = vpop.f32.mrf.mxu3 }
 0x1fc   :  { %v1809_v53 = vmul.f32 %v4455_v14, %v4408_v1  ;;  %v1751_v56 = vrot.slane %v1750_v61, 2  ;;  %2454 = vmatpush.msra.mxu1 %v2266_v27  ;;  %2519 = vmatpush.msra.mxu2 %v2282_v60  ;;  %v2281_v21 = vld [vmem:[#allocation10 + $0x118] sm:$0xff]  ;;  %v4479_v49 = vpop.eup %2980  ;;  %v4481_v15 = vadd.f32 %v1898_v5, %v1894_v45  ;;  %v1328_v51 = vsub.f32 1.5, %v4459_v54  ;;  %v2264_v45 = vld [vmem:[#allocation10 + $0x90] sm:$0xff] }
 0x1fd   :  { %6099 = vst [vmem:[#allocation117_spill] sm:$0xff] %v4471_v11  ;;  %2584 = vmatpush.msra.mxu3 %v2298_v0  ;;  %v2297_v37 = vld [vmem:[#allocation10 + $0x198] sm:$0xff]  ;;  %v1965_v27 = vadd.f32 %v1899_v3, %v1895_v57  ;;  %v1972_v60 = vadd.f32 %v1900_v10, %v1896_v38  ;;  %v1075_v39 = vmul.f32 %v4359_v26, %v1074_v52  ;;  %v2280_v5 = vld [vmem:[#allocation10 + $0x110] sm:$0xff]  ;;  %v2263_v3 = vld [vmem:[#allocation10 + $0x88] sm:$0xff]  ;;  %vm1814_vm0 = vweird.f32 %v4408_v1 }
 0x1fe   :  { %6100 = vst [vmem:[#allocation118_spill] sm:$0xff] %v4474_v59  ;;  %v1810_v12 = vmul.f32 %v4455_v14, %v1809_v53  ;;  %v4486_v36 = vpop.eup %2982  ;;  %2390 = vmatpush.msra.mxu0 %v2249_v23  ;;  %v1979_v63 = vadd.f32 %v1901_v4, %v1897_v42  ;;  %v1752_v54 = vadd.f32 %v1751_v56, %v1750_v61  ;;  %v2296_v0 = vld [vmem:[#allocation10 + $0x190] sm:$0xff]  ;;  %v2247_v42 = vld [vmem:[#allocation10 + $0x8] sm:$0xff]  ;;  %v1959_v57 = vrot.slane %v4481_v15, 4 }
 0x1ff   :  { %6101 = vst [vmem:[#allocation119_spill] sm:$0xff] %v4477_v30  ;;  %2455 = vmatpush.msra.mxu1 %v2265_v43  ;;  %2520 = vmatpush.msra.mxu2 %v2281_v21  ;;  %v4493_v53 = vadd.f32 %v4428_v24, %v3883_v28  ;;  %v4497_v38 = vmul.f32 %v4471_v11, %v4471_v11  ;;  %v2279_v4 = vld [vmem:[#allocation10 + $0x108] sm:$0xff]  ;;  %v1966_v23 = vrot.slane %v1965_v27, 4  ;;  %v1973_v43 = vrot.slane %v1972_v60, 4 }
 0x200   :  { %v1811_v47 = vmul.f32 0.5, %v1810_v12  ;;  %v1335_v10 = vmul.f32 %v4479_v49, %v4430_v50  ;;  %2585 = vmatpush.msra.mxu3 %v2297_v37  ;;  %2391 = vmatpush.msra.mxu0 %v2248_v22  ;;  %v1329_v24 = vmul.f32 %v4396_v44, %v1328_v51  ;;  %v4513_v52 = vmul.f32 %v4474_v59, %v4474_v59  ;;  %v923_v22 = vpop.xlane.xlu1 %922  ;;  %v2295_v56 = vld [vmem:[#allocation10 + $0x188] sm:$0xff]  ;;  %v570_v37 = vpop.f32.mrf.mxu0  ;;  %v2262_v59 = vld [vmem:[#allocation10 + $0x80] sm:$0xff] }
 0x201   :  { %6102 = vst [vmem:[#allocation120_spill] sm:$0xff] %v4493_v53  ;;  %v1753_v61 = vrot.slane %v1752_v54, 1  ;;  %2456 = vmatpush.msra.mxu1 %v2264_v45  ;;  %2521 = vmatpush.msra.mxu2 %v2280_v5  ;;  %v4525_v51 = vmul.f32 %v4477_v30, %v4477_v30  ;;  %v635_v45 = vpop.f32.mrf.mxu1  ;;  %v2246_v5 = vld [vmem:[#allocation10] sm:$0xff]  ;;  %v1980_v11 = vrot.slane %v1979_v63, 4  ;;  %v4533_v9 = vadd.f32 %v762_v55, %v3883_v28 }
 0x202   :  { %6105 = vst [vmem:[#allocation121_spill] sm:$0xff] %v4513_v52  ;;  %v1812_v12 = vsub.f32 1.5, %v1811_v47  ;;  %2586 = vmatpush.msra.mxu3 %v2296_v0  ;;  %v4530_v47 = vsel %vm4506_vm14, %v4359_v26, %v1075_v39  ;;  %2392 = vmatpush.msra.mxu0 %v2247_v42  ;;  %v2294_v30 = vld [vmem:[#allocation10 + $0x180] sm:$0xff]  ;;  %v1336_v0 = vmul.f32 %v4479_v49, %v1335_v10  ;;  %v4539_v52 = vmax.f32 %v923_v22, 1e-24 }
 0x203   :  { %6108 = vst [vmem:[#allocation122_spill] sm:$0xff] %v4525_v51  ;;  %v1754_v17 = vadd.f32 %v1753_v61, %v1752_v54  ;;  %2457 = vmatpush.msra.mxu1 %v2263_v3  ;;  %v1081_v51 = vmul.f32 %v4486_v36, %v4433_v19  ;;  %2522 = vmatpush.msra.mxu2 %v2279_v4  ;;  %vm1815_vm1 = vweird.f32 %v4455_v14  ;;  %v700_v54 = vpop.f32.mrf.mxu2  ;;  %vm1340_vm3 = vweird.f32 %v4430_v50 }
 0x204   :  { %6109 = vst [vmem:[#allocation123_spill] sm:$0xff] %v4533_v9  ;;  %2587 = vmatpush.msra.mxu3 %v2295_v56  ;;  %v4542_v26 = vadd.f32 %v1959_v57, %v4481_v15  ;;  %v1333_v55 = vsel %vm4519_vm15, %v4396_v44, %v1329_v24  ;;  %2393 = vmatpush.msra.mxu0 %v2246_v5  ;;  %2984 = vrsqrt.f32 %v4539_v52  ;;  %v1337_v57 = vmul.f32 0.5, %v1336_v0  ;;  %vm1816_vm2 = vmor %vm1814_vm0, %vm1815_vm1 }
 0x205   :  { %v4548_v39 = vmax.f32 %v1754_v17, 1e-24  ;;  %2458 = vmatpush.msra.mxu1 %v2262_v59  ;;  %v4550_v10 = vadd.f32 %v1966_v23, %v1965_v27  ;;  %v4552_v42 = vadd.f32 %v1973_v43, %v1972_v60  ;;  %v1813_v3 = vmul.f32 %v4455_v14, %v1812_v12  ;;  %2523 = vmatpush.msra.mxu2 %v2278_v18  ;;  %v765_v59 = vpop.f32.mrf.mxu3  ;;  %v1656_v27 = vpop.xlane.xlu0 %1655 }
 0x206   :  { %2588 = vmatpush.msra.mxu3 %v2294_v30  ;;  %v4556_v15 = vadd.f32 %v1980_v11, %v1979_v63  ;;  %v4560_v17 = vadd.f32 %v570_v37, %v3807_v13  ;;  %v4563_v44 = vadd.f32 %v635_v45, %v3817_v2  ;;  %v4566_v60 = vmul.f32 %v1333_v55, %v3849_v31  ;;  %v1242_v18 = vpop.xlane.xlu2 %1241  ;;  %v6112_v30 = vld [vmem:[#allocation43_spill] sm:$0xff]  ;;  %v6116_v37 = vld [vmem:[#allocation44_spill] sm:$0xff] }
 0x207   :  { %2986 = vrsqrt.f32 %v4548_v39  ;;  %v1082_v21 = vmul.f32 %v4486_v36, %v1081_v51  ;;  %v4571_v63 = vmul.f32 %v4530_v47, %v6112_v30  ;;  %v4579_v24 = vmul.f32 %v1333_v55, %v3852_v48 }
 0x208   :  { %6110 = vst [vmem:[#allocation124_spill] sm:$0xff] %v4560_v17  ;;  %v4582_v31 = vmul.f32 %v1333_v55, %v3894_v29  ;;  %v4585_v61 = vmul.f32 %v1333_v55, %v3907_v25  ;;  %v1817_v56 = vsel %vm1816_vm2, %v4455_v14, %v1813_v3  ;;  %v4592_v1 = vadd.f32 %v700_v54, %v3820_v32  ;;  %v573_v7 = vpop.f32.mrf.mxu0  ;;  %v6118_v3 = vld [vmem:[#allocation45_spill] sm:$0xff] }
 0x209   :  { %6111 = vst [vmem:[#allocation125_spill] sm:$0xff] %v4563_v44  ;;  %vm1341_vm4 = vweird.f32 %v4479_v49  ;;  %v4598_v29 = vmul.f32 %v4560_v17, %v4560_v17  ;;  %v4600_v25 = vmax.f32 %v1242_v18, 1e-24  ;;  %v1338_v43 = vsub.f32 1.5, %v1337_v57  ;;  %v638_v51 = vpop.f32.mrf.mxu1 }
 0x20a   :  { %6113 = vst [vmem:[#allocation43_spill] sm:$0xff] %v4571_v63  ;;  %v4602_v23 = vpop.eup %2984  ;;  %v1083_v12 = vmul.f32 0.5, %v1082_v21  ;;  %v4606_v14 = vmul.f32 %v4563_v44, %v4563_v44  ;;  %v4610_v45 = vmul.f32 %v4530_v47, %v6116_v37  ;;  %v1880_v0 = vmul.f32 %v1817_v56, %v4323_v62  ;;  %vm4677_vm7 = vmor %vm1340_vm3, %vm1341_vm4 }
 0x20b   :  { %6114 = vst [vmem:[#allocation126_spill] sm:$0xff] %v4592_v1  ;;  %vm1087_vm5 = vweird.f32 %v4486_v36  ;;  %v4617_v55 = vadd.f32 %v765_v59, %v3883_v28  ;;  %v1091_v54 = vmul.f32 %v4602_v23, %v4539_v52  ;;  %v4623_v57 = vmul.f32 %v4530_v47, %v6118_v3  ;;  %v703_v37 = vpop.f32.mrf.mxu2  ;;  %v6121_v3 = vld [vmem:[#allocation46_spill] sm:$0xff] }
 0x20c   :  { %6115 = vst [vmem:[#allocation127_spill] sm:$0xff] %v4606_v14  ;;  %v1881_v21 = vmul.f32 %v1817_v56, %v4328_v34  ;;  %v4628_v18 = vmul.f32 %v4592_v1, %v4592_v1  ;;  %v4630_v30 = vmul.f32 0.088388346, %v1656_v27  ;;  %v1610_v62 = vmul.f32 %v3677_v58, %v4571_v63  ;;  %v1661_v27 = vpop.xlane.xlu1 %1660  ;;  %v6123_v1 = vld [vmem:[#allocation62_spill] sm:$0xff] }
 0x20d   :  { %6117 = vst [vmem:[#allocation44_spill] sm:$0xff] %v4610_v45  ;;  %v4612_v5 = vpop.eup %2986  ;;  %vm1086_vm6 = vweird.f32 %v4433_v19  ;;  %2988 = vrsqrt.f32 %v4600_v25  ;;  %v4640_v34 = vmul.f32 %v4530_v47, %v6121_v3  ;;  %v1611_v56 = vmul.f32 %v3681_v16, %v4610_v45  ;;  %v768_v45 = vpop.f32.mrf.mxu3 }
 0x20e   :  { %6119 = vst [vmem:[#allocation45_spill] sm:$0xff] %v4623_v57  ;;  %v1819_v59 = vmul.f32 %v4612_v5, %v4548_v39  ;;  %v1339_v48 = vmul.f32 %v4479_v49, %v1338_v43  ;;  %v1084_v4 = vsub.f32 1.5, %v1083_v12  ;;  %v1203_v22 = vmul.f32 %v4493_v53, %v4493_v53  ;;  %v1247_v63 = vpop.xlane.xlu0 %1246  ;;  %v6125_v12 = vld [vmem:[#allocation64_spill] sm:$0xff]  ;;  %vm1088_vm8 = vmor %vm1086_vm6, %vm1087_vm5 }
 0x20f   :  { %6120 = vst [vmem:[#allocation128_spill] sm:$0xff] %v4628_v18  ;;  %v1273_v11 = vadd.f32 %v4448_v46, %v4442_v35  ;;  %v4650_v44 = vmul.f32 %v1880_v0, %v6123_v1  ;;  %v1092_v17 = vmul.f32 %v4602_v23, %v1091_v54  ;;  %v1612_v47 = vmul.f32 %v3683_v8, %v4623_v57  ;;  %v6124_v18 = vld [vmem:[#allocation63_spill] sm:$0xff]  ;;  %v6127_v46 = vld [vmem:[#allocation65_spill] sm:$0xff] }
 0x210   :  { %6122 = vst [vmem:[#allocation46_spill] sm:$0xff] %v4640_v34  ;;  %v1687_v3 = vadd.f32 %v1611_v56, %v1610_v62  ;;  %v4656_v43 = vmul.f32 %v1880_v0, %v6124_v18  ;;  %v4659_v14 = vmul.f32 %v1880_v0, %v6125_v12  ;;  %v4662_v35 = vmul.f32 0.088388346, %v1661_v27  ;;  %v6131_v12 = vld [vmem:[#allocation73_spill] sm:$0xff] }
 0x211   :  { %v1274_v53 = vadd.f32 %v1273_v11, %v4452_v20  ;;  %v4665_v1 = vmul.f32 %v1880_v0, %v6127_v46  ;;  %v1820_v54 = vmul.f32 %v4612_v5, %v1819_v59  ;;  %v1613_v62 = vmul.f32 %v3713_v33, %v4640_v34  ;;  %v576_v34 = vpop.f32.mrf.mxu0 }
 0x212   :  { %6126 = vst [vmem:[#allocation129_spill] sm:$0xff] %v4662_v35  ;;  %v1688_v56 = vadd.f32 %v1687_v3, %v1612_v47  ;;  %v4671_v57 = vmul.f32 %v1881_v21, %v3919_v6  ;;  %v1724_v11 = vmul.f32 %v4630_v30, %v4630_v30  ;;  %v1725_v59 = vmul.f32 %v4662_v35, %v4662_v35 }
 0x213   :  { %6128 = vst [vmem:[#allocation130_spill] sm:$0xff] %v4665_v1  ;;  %v1275_v0 = vadd.f32 %v1274_v53, %v1203_v22  ;;  %v4685_v27 = vpop.eup %2988  ;;  %v4688_v47 = vmul.f32 %v1881_v21, %v3922_v41  ;;  %v1085_v3 = vmul.f32 %v4486_v36, %v1084_v4  ;;  %v1093_v6 = vmul.f32 0.5, %v1092_v17  ;;  %v641_v1 = vpop.f32.mrf.mxu1 }
 0x214   :  { %v1689_v50 = vadd.f32 %v1688_v56, %v1613_v62  ;;  %v4692_v46 = vmul.f32 %v1881_v21, %v3925_v40  ;;  %v4695_v18 = vmul.f32 %v1881_v21, %v6131_v12  ;;  %v4698_v53 = vadd.f32 %v573_v7, %v3807_v13  ;;  %v706_v20 = vpop.f32.mrf.mxu2 }
 0x215   :  { %1276 = vadd.xlane.f32.xlu0 %v1275_v0  ;;  %v1755_v22 = vadd.f32 %v1725_v59, %v1724_v11  ;;  %v1821_v35 = vmul.f32 0.5, %v1820_v54  ;;  %v4703_v4 = vsel %vm4677_vm7, %v4479_v49, %v1339_v48  ;;  %v4706_v17 = vadd.f32 %v638_v51, %v3817_v2  ;;  %v6135_v49 = vld [vmem:[#allocation121_spill] sm:$0xff]  ;;  %v6139_v0 = vld [vmem:[#allocation122_spill] sm:$0xff] }
 0x216   :  { %6132 = vst [vmem:[#allocation131_spill] sm:$0xff] %v4698_v53  ;;  %v4709_v62 = vadd.f32 %v703_v37, %v3820_v32  ;;  %1690 = vadd.xlane.f32.xlu1 %v1689_v50  ;;  %v1345_v7 = vmul.f32 %v4685_v27, %v4600_v25  ;;  %v4717_v54 = vmax.f32 %v1247_v63, 1e-24  ;;  %v1278_v48 = vadd.f32 %v6135_v49, %v4497_v38 }
 0x217   :  { %6133 = vst [vmem:[#allocation132_spill] sm:$0xff] %v4706_v17  ;;  %v1756_v21 = vrot.slane %v1755_v22, 4  ;;  %vm1824_vm9 = vweird.f32 %v4548_v39  ;;  %v4723_v51 = vsel %vm1088_vm8, %v4486_v36, %v1085_v3  ;;  %v1094_v37 = vsub.f32 1.5, %v1093_v6  ;;  %v1252_v3 = vpop.xlane.xlu0 %1251 }
 0x218   :  { %6134 = vst [vmem:[#allocation133_spill] sm:$0xff] %v4709_v62  ;;  %v4726_v56 = vadd.f32 %v576_v34, %v3807_v13  ;;  %v4729_v19 = vadd.f32 %v641_v1, %v3817_v2  ;;  %v4733_v63 = vmul.f32 %v4698_v53, %v4698_v53  ;;  %v1207_v38 = vmul.f32 %v4533_v9, %v4533_v9  ;;  %v771_v34 = vpop.f32.mrf.mxu3 }
 0x219   :  { %v1757_v11 = vadd.f32 %v1756_v21, %v1755_v22  ;;  %v1279_v59 = vadd.f32 %v1278_v48, %v6139_v0  ;;  %v1822_v36 = vsub.f32 1.5, %v1821_v35  ;;  %vm1825_vm10 = vweird.f32 %v4612_v5  ;;  %v1666_v21 = vpop.xlane.xlu1 %1665 }
 0x21a   :  { %6136 = vst [vmem:[#allocation121_spill] sm:$0xff] %v4726_v56  ;;  %vm1097_vm11 = vweird.f32 %v4602_v23  ;;  %v4742_v6 = vmul.f32 %v4706_v17, %v4706_v17  ;;  %v4746_v1 = vmul.f32 %v4709_v62, %v4709_v62  ;;  %v1346_v50 = vmul.f32 %v4685_v27, %v1345_v7  ;;  %vm1826_vm13 = vmor %vm1824_vm9, %vm1825_vm10 }
 0x21b   :  { %6137 = vst [vmem:[#allocation134_spill] sm:$0xff] %v4729_v19  ;;  %v4750_v22 = vadd.f32 %v768_v45, %v3883_v28  ;;  %2990 = vrsqrt.f32 %v4717_v54  ;;  %v4754_v35 = vadd.f32 %v706_v20, %v3820_v32  ;;  %v1095_v49 = vmul.f32 %v4602_v23, %v1094_v37 }
 0x21c   :  { %6138 = vst [vmem:[#allocation135_spill] sm:$0xff] %v4733_v63  ;;  %vm1096_vm12 = vweird.f32 %v4539_v52  ;;  %v1758_v48 = vrot.slane %v1757_v11, 2  ;;  %v1216_v0 = vmul.f32 %v4726_v56, %v4726_v56  ;;  %v1217_v7 = vmul.f32 %v4729_v19, %v4729_v19 }
 0x21d   :  { %6140 = vst [vmem:[#allocation122_spill] sm:$0xff] %v4742_v6  ;;  %v1280_v12 = vadd.f32 %v1279_v59, %v1207_v38  ;;  %v4763_v45 = vadd.f32 %v771_v34, %v3883_v28  ;;  %v4765_v40 = vmax.f32 %v1252_v3, 1e-24  ;;  %v6144_v20 = vrot.slane %v4542_v26, 2  ;;  %v6148_v6 = vld [vmem:[#allocation51_spill] sm:$0xff]  ;;  %vm1098_vm14 = vmor %vm1096_vm12, %vm1097_vm11 }
 0x21e   :  { %6141 = vst [vmem:[#allocation136_spill] sm:$0xff] %v4746_v1  ;;  %v1823_v37 = vmul.f32 %v4612_v5, %v1822_v36  ;;  %v1759_v62 = vadd.f32 %v1758_v48, %v1757_v11  ;;  %v6145_v17 = vrot.slane %v4550_v10, 2  ;;  %v6146_v19 = vrot.slane %v4552_v42, 2 }
 0x21f   :  { %6142 = vst [vmem:[#allocation137_spill] sm:$0xff] %v4754_v35  ;;  %v1962_v41 = vadd.f32 %v6144_v20, %v4542_v26  ;;  %v1218_v59 = vmul.f32 %v4754_v35, %v4754_v35  ;;  %1281 = vadd.xlane.f32.xlu0 %v1280_v12  ;;  %2992 = vrsqrt.f32 %v4765_v40  ;;  %v6147_v26 = vrot.slane %v4556_v15, 2 }
 0x220   :  { %6143 = vst [vmem:[#allocation138_spill] sm:$0xff] %v4763_v45  ;;  %v1969_v56 = vadd.f32 %v6145_v17, %v4550_v10  ;;  %v1976_v38 = vadd.f32 %v6146_v19, %v4552_v42  ;;  %v4783_v11 = vmul.f32 0.5, %v1346_v50  ;;  %v1760_v3 = vrot.slane %v1759_v62, 1 }
 0x221   :  { %v1963_v34 = vrot.slane %v1962_v41, 1  ;;  %v1983_v36 = vadd.f32 %v6147_v26, %v4556_v15  ;;  %v4785_v17 = vpop.eup %2990  ;;  %v1219_v19 = vmul.f32 %v4763_v45, %v4763_v45  ;;  %v1293_v20 = vadd.f32 %v1217_v7, %v1216_v0  ;;  %v1671_v7 = vpop.xlane.xlu2 %1670 }
 0x222   :  { %v1970_v48 = vrot.slane %v1969_v56, 1  ;;  %v1977_v10 = vrot.slane %v1976_v38, 1  ;;  %v1827_v15 = vsel %vm1826_vm13, %v4612_v5, %v1823_v37  ;;  %v1761_v50 = vadd.f32 %v1760_v3, %v1759_v62  ;;  %v6154_v37 = vld [vmem:[#allocation112_spill] sm:$0xff] }
 0x223   :  { %v1964_v42 = vadd.f32 %v1963_v34, %v1962_v41  ;;  %v1984_v12 = vrot.slane %v1983_v36, 1  ;;  %v1294_v1 = vadd.f32 %v1293_v20, %v1218_v59  ;;  %v4797_v63 = vmul.f32 %v4723_v51, %v6148_v6  ;;  %v6158_v20 = vld [vmem:[#allocation67_spill] sm:$0xff] }
 0x224   :  { %v1971_v26 = vadd.f32 %v1970_v48, %v1969_v56  ;;  %v1978_v35 = vadd.f32 %v1977_v10, %v1976_v38  ;;  %v4799_v39 = vmax.f32 %v1761_v50, 1e-24  ;;  %v4801_v41 = vmul.f32 0.088388346, %v1666_v21  ;;  %v6150_v56 = vld [vmem:[#allocation52_spill] sm:$0xff]  ;;  %v6152_v21 = vld [vmem:[#allocation53_spill] sm:$0xff] }
 0x225   :  { %v2182_v53 = vmul.f32 %v1964_v42, %v4566_v60  ;;  %v1985_v9 = vadd.f32 %v1984_v12, %v1983_v36  ;;  %6149 = vst [vmem:[#allocation51_spill] sm:$0xff] %v4797_v63  ;;  %v4805_v5 = vpop.eup %2992  ;;  %v1295_v62 = vadd.f32 %v1294_v1, %v1219_v19  ;;  %v4814_v6 = vmul.f32 %v4723_v51, %v6150_v56 }
 0x226   :  { %v2183_v34 = vmul.f32 %v1971_v26, %v4579_v24  ;;  %v2184_v0 = vmul.f32 %v1978_v35, %v4582_v31  ;;  %v4818_v24 = vmul.f32 %v4723_v51, %v6152_v21  ;;  %v1257_v31 = vpop.xlane.xlu1 %1256  ;;  %v1882_v38 = vmul.f32 %v1827_v15, %v6154_v37 }
 0x227   :  { %2394 = vmatmul.f32.vlgmr.msra.gmra.mxu0 %v2182_v53  ;;  %v2185_v60 = vmul.f32 %v1985_v9, %v4585_v61  ;;  %6151 = vst [vmem:[#allocation52_spill] sm:$0xff] %v4814_v6  ;;  %v4822_v59 = vsel %vm1098_vm14, %v4602_v23, %v1095_v49  ;;  %2994 = vrsqrt.f32 %v4799_v39  ;;  %v1355_v52 = vmul.f32 %v4785_v17, %v4717_v54  ;;  %v6155_v53 = vld [vmem:[#allocation57_spill] sm:$0xff]  ;;  %v6157_v49 = vld [vmem:[#allocation115_spill] sm:$0xff] }
 0x228   :  { %6153 = vst [vmem:[#allocation53_spill] sm:$0xff] %v4818_v24  ;;  %2459 = vmatmul.f32.vlgmr.msra.gmra.mxu1 %v2183_v34  ;;  %2524 = vmatmul.f32.vlgmr.msra.gmra.mxu2 %v2184_v0  ;;  %v1348_v61 = vsub.f32 1.5, %v4783_v11  ;;  %v4830_v1 = vmul.f32 %v4723_v51, %v6155_v53  ;;  %v1614_v36 = vmul.f32 %v3677_v58, %v4797_v63  ;;  %v4841_v10 = vmax.f32 %v1257_v31, 1e-24  ;;  %v6159_v0 = vld [vmem:[#allocation68_spill] sm:$0xff]  ;;  %v6160_v31 = vld [vmem:[#allocation69_spill] sm:$0xff] }
 0x229   :  { %2589 = vmatmul.f32.vlgmr.msra.gmra.mxu3 %v2185_v60  ;;  %1296 = vadd.xlane.f32.xlu0 %v1295_v62  ;;  %v1615_v23 = vmul.f32 %v3681_v16, %v4814_v6  ;;  %v4837_v3 = vmul.f32 %v1827_v15, %v6157_v49  ;;  %v1365_v48 = vmul.f32 %v4805_v5, %v4765_v40  ;;  %v4843_v11 = vmul.f32 0.088388346, %v1671_v7 }
 0x22a   :  { %6156 = vst [vmem:[#allocation112_spill] sm:$0xff] %v4830_v1  ;;  %v1726_v51 = vmul.f32 %v4801_v41, %v4801_v41  ;;  %v1616_v12 = vmul.f32 %v3683_v8, %v4818_v24  ;;  %v1488_v50 = vmul.f32 %v4703_v4, %v6158_v20  ;;  %v1356_v15 = vmul.f32 %v4785_v17, %v1355_v52 }
 0x22b   :  { %v1692_v19 = vadd.f32 %v1615_v23, %v1614_v36  ;;  %2996 = vrsqrt.f32 %v4841_v10  ;;  %v1727_v34 = vmul.f32 %v4843_v11, %v4843_v11  ;;  %v1489_v60 = vmul.f32 %v4703_v4, %v6159_v0  ;;  %v6161_v23 = vld [vmem:[#allocation74_spill] sm:$0xff] }
 0x22c   :  { %v1617_v62 = vmul.f32 %v3713_v33, %v4830_v1  ;;  %v2186_v21 = vmul.f32 %v1964_v42, %v1488_v50  ;;  %v1490_v7 = vmul.f32 %v4703_v4, %v6160_v31  ;;  %vm1350_vm15 = vweird.f32 %v4600_v25  ;;  %v6162_v50 = vld [vmem:[#allocation78_spill] sm:$0xff] }
 0x22d   :  { %v1693_v56 = vadd.f32 %v1692_v19, %v1616_v12  ;;  %v4861_v37 = vpop.eup %2994  ;;  %vm1351_vm0 = vweird.f32 %v4685_v27  ;;  %v1366_v52 = vmul.f32 %v4805_v5, %v1365_v48  ;;  %v1762_v53 = vadd.f32 %v1727_v34, %v1726_v51 }
 0x22e   :  { %v2187_v36 = vmul.f32 %v1971_v26, %v1489_v60  ;;  %v1491_v49 = vmul.f32 %v4703_v4, %v6161_v23  ;;  %v4869_v20 = vmul.f32 %v4685_v27, %v1348_v61  ;;  %v1829_v42 = vmul.f32 %v4861_v37, %v4799_v39  ;;  %v6163_v26 = vld [vmem:[#allocation79_spill] sm:$0xff]  ;;  %v6164_v4 = vld [vmem:[#allocation80_spill] sm:$0xff]  ;;  %vm4929_vm5 = vmor %vm1350_vm15, %vm1351_vm0 }
 0x22f   :  { %v1694_v12 = vadd.f32 %v1693_v56, %v1617_v62  ;;  %2397 = vmatmul.f32.gmra.mxu0 %v2186_v21  ;;  %v2188_v19 = vmul.f32 %v1978_v35, %v1490_v7  ;;  %v4874_v0 = vmul.f32 %v1882_v38, %v6162_v50  ;;  %v1357_v31 = vmul.f32 0.5, %v1356_v15  ;;  %v1262_v35 = vpop.xlane.xlu1 %1261  ;;  %v6165_v56 = vld [vmem:[#allocation58_spill] sm:$0xff]  ;;  %v6167_v21 = vld [vmem:[#allocation60_spill] sm:$0xff] }
 0x230   :  { %v1763_v45 = vrot.slane %v1762_v53, 4  ;;  %2462 = vmatmul.f32.gmra.mxu1 %v2187_v36  ;;  %v2189_v48 = vmul.f32 %v1985_v9, %v1491_v49  ;;  %v4877_v51 = vmul.f32 %v1882_v38, %v6163_v26  ;;  %v4880_v34 = vmul.f32 %v1882_v38, %v6164_v4  ;;  %v6169_v36 = vld [vmem:[#allocation81_spill] sm:$0xff]  ;;  %v579_v4 = vpop.f32.mrf.mxu0 }
 0x231   :  { %v1830_v61 = vmul.f32 %v4861_v37, %v1829_v42  ;;  %vm1360_vm1 = vweird.f32 %v4717_v54  ;;  %1695 = vadd.xlane.f32.xlu1 %v1694_v12  ;;  %2527 = vmatmul.f32.gmra.mxu2 %v2188_v19  ;;  %v4884_v60 = vpop.eup %2996  ;;  %v1367_v62 = vmul.f32 0.5, %v1366_v52  ;;  %v4888_v9 = vmul.f32 %v4822_v59, %v6165_v56 }
 0x232   :  { %v1764_v15 = vadd.f32 %v1763_v45, %v1762_v53  ;;  %2592 = vmatmul.f32.gmra.mxu3 %v2189_v48  ;;  %v4892_v7 = vmul.f32 %v4822_v59, %v6167_v21  ;;  %v4895_v23 = vmul.f32 %v1882_v38, %v6169_v36  ;;  %vm1361_vm2 = vweird.f32 %v4785_v17  ;;  %v6170_v53 = vld [vmem:[#allocation61_spill] sm:$0xff]  ;;  %v6172_v48 = vld [vmem:[#allocation66_spill] sm:$0xff] }
 0x233   :  { %6166 = vst [vmem:[#allocation57_spill] sm:$0xff] %v4888_v9  ;;  %v1831_v49 = vmul.f32 0.5, %v1830_v61  ;;  %v1375_v42 = vmul.f32 %v4884_v60, %v4841_v10  ;;  %v1358_v52 = vsub.f32 1.5, %v1357_v31  ;;  %v4902_v12 = vmul.f32 %v4822_v59, %v6170_v53  ;;  %vm4945_vm7 = vmor %vm1360_vm1, %vm1361_vm2 }
 0x234   :  { %6168 = vst [vmem:[#allocation115_spill] sm:$0xff] %v4892_v7  ;;  %v1765_v45 = vrot.slane %v1764_v15, 2  ;;  %v4904_v19 = vmax.f32 %v1262_v35, 1e-24  ;;  %vm1370_vm3 = vweird.f32 %v4765_v40  ;;  %v4909_v38 = vmul.f32 %v4822_v59, %v6172_v48  ;;  %v6174_v48 = vld [vmem:[#allocation127_spill] sm:$0xff] }
 0x235   :  { %6171 = vst [vmem:[#allocation67_spill] sm:$0xff] %v4902_v12  ;;  %v1618_v61 = vmul.f32 %v3677_v58, %v4888_v9  ;;  %v1619_v56 = vmul.f32 %v3681_v16, %v4892_v7  ;;  %v1832_v31 = vsub.f32 1.5, %v1831_v49  ;;  %v1368_v21 = vsub.f32 1.5, %v1367_v62  ;;  %v644_v62 = vpop.f32.mrf.mxu1  ;;  %v6197_v7 = vld [vmem:[#allocation82_spill] sm:$0xff] }
 0x236   :  { %6173 = vst [vmem:[#allocation68_spill] sm:$0xff] %v4909_v38  ;;  %v1376_v36 = vmul.f32 %v4884_v60, %v1375_v42  ;;  %v1766_v53 = vadd.f32 %v1765_v45, %v1764_v15  ;;  %v1620_v35 = vmul.f32 %v3683_v8, %v4902_v12  ;;  %v1211_v59 = vmul.f32 %v4617_v55, %v4617_v55 }
 0x237   :  { %v1697_v26 = vadd.f32 %v1619_v56, %v1618_v61  ;;  %v1283_v50 = vadd.f32 %v6174_v48, %v4598_v29  ;;  %v1359_v58 = vmul.f32 %v4785_v17, %v1358_v52  ;;  %vm1371_vm4 = vweird.f32 %v4805_v5  ;;  %v709_v29 = vpop.f32.mrf.mxu2  ;;  %v6178_v52 = vld [vmem:[#allocation128_spill] sm:$0xff] }
 0x238   :  { %v1767_v16 = vrot.slane %v1766_v53, 1  ;;  %2998 = vrsqrt.f32 %v4904_v19  ;;  %v4934_v15 = vadd.f32 %v579_v4, %v3807_v13  ;;  %v1621_v49 = vmul.f32 %v3713_v33, %v4909_v38  ;;  %vm4966_vm9 = vmor %vm1370_vm3, %vm1371_vm4  ;;  %v6196_v38 = vld [vmem:[#allocation122_spill] sm:$0xff] }
 0x239   :  { %v1698_v42 = vadd.f32 %v1697_v26, %v1620_v35  ;;  %v1284_v45 = vadd.f32 %v1283_v50, %v6178_v52  ;;  %v1833_v61 = vmul.f32 %v4861_v37, %v1832_v31  ;;  %vm1835_vm6 = vweird.f32 %v4861_v37  ;;  %v6182_v31 = vld [vmem:[#allocation84_spill] sm:$0xff]  ;;  %v6183_v52 = vld [vmem:[#allocation85_spill] sm:$0xff] }
 0x23a   :  { %6177 = vst [vmem:[#allocation69_spill] sm:$0xff] %v4934_v15  ;;  %v1369_v4 = vmul.f32 %v4805_v5, %v1368_v21  ;;  %v1768_v56 = vadd.f32 %v1767_v16, %v1766_v53  ;;  %v1377_v48 = vmul.f32 0.5, %v1376_v36  ;;  %v4951_v33 = vadd.f32 %v644_v62, %v3817_v2  ;;  %v6187_v53 = vld [vmem:[#allocation86_spill] sm:$0xff]  ;;  %v6188_v16 = vld [vmem:[#allocation87_spill] sm:$0xff] }
 0x23b   :  { %v1699_v50 = vadd.f32 %v1698_v42, %v1621_v49  ;;  %v1285_v26 = vadd.f32 %v1284_v45, %v1211_v59  ;;  %v4955_v35 = vmul.f32 %v4837_v3, %v6182_v31  ;;  %v4959_v54 = vmul.f32 %v4837_v3, %v6183_v52 }
 0x23c   :  { %6181 = vst [vmem:[#allocation74_spill] sm:$0xff] %v4951_v33  ;;  %vm1834_vm8 = vweird.f32 %v4799_v39  ;;  %v4971_v21 = vadd.f32 %v709_v29, %v3820_v32  ;;  %v4975_v59 = vmul.f32 %v4837_v3, %v6187_v53  ;;  %v4979_v62 = vmul.f32 %v4837_v3, %v6188_v16  ;;  %v774_v29 = vpop.f32.mrf.mxu3  ;;  %v6191_v16 = vld [vmem:[#allocation75_spill] sm:$0xff] }
 0x23d   :  { %v1353_v40 = vsel %vm4929_vm5, %v4685_v27, %v4869_v20  ;;  %vm1836_vm10 = vmor %vm1834_vm8, %vm1835_vm6  ;;  %v4990_v39 = vsel %vm4945_vm7, %v4785_v17, %v1359_v58  ;;  %1700 = vadd.xlane.f32.xlu2 %v1699_v50  ;;  %v4995_v42 = vmax.f32 %v1768_v56, 1e-24  ;;  %v1220_v8 = vmul.f32 %v4934_v15, %v4934_v15  ;;  %1286 = vadd.xlane.f32.xlu1 %v1285_v26  ;;  %v1676_v27 = vpop.xlane.xlu2 %1675  ;;  %v6190_v26 = vld [vmem:[#allocation130_spill] sm:$0xff] }
 0x23e   :  { %6186 = vst [vmem:[#allocation58_spill] sm:$0xff] %v4971_v21  ;;  %v4992_v49 = vpop.eup %2998  ;;  %v1837_v3 = vsel %vm1836_vm10, %v4861_v37, %v1833_v61  ;;  %v1986_v20 = vadd.f32 %v4671_v57, %v4650_v44  ;;  %v5004_v17 = vsel %vm4966_vm9, %v4805_v5, %v1369_v4  ;;  %v1378_v58 = vsub.f32 1.5, %v1377_v48 }
 0x23f   :  { %v1221_v45 = vmul.f32 %v4951_v33, %v4951_v33  ;;  %v1993_v37 = vadd.f32 %v4688_v47, %v4656_v43  ;;  %3000 = vrsqrt.f32 %v4995_v42  ;;  %v5013_v61 = vmul.f32 %v4971_v21, %v4971_v21  ;;  %v6189_v47 = vld [vmem:[#allocation129_spill] sm:$0xff]  ;;  %v6192_v33 = vld [vmem:[#allocation76_spill] sm:$0xff] }
 0x240   :  { %v5016_v44 = vadd.f32 %v774_v29, %v3883_v28  ;;  %v1987_v57 = vrot.slane %v1986_v20, 4  ;;  %v5019_v5 = vmul.f32 %v1837_v3, %v4630_v30  ;;  %v1385_v25 = vmul.f32 %v4992_v49, %v4904_v19  ;;  %v582_v29 = vpop.f32.mrf.mxu0 }
 0x241   :  { %v1994_v4 = vrot.slane %v1993_v37, 4  ;;  %v2000_v43 = vadd.f32 %v4692_v46, %v4659_v14  ;;  %v5026_v56 = vmul.f32 %v1837_v3, %v6189_v47  ;;  %v5028_v48 = vmul.f32 0.088388346, %v1676_v27  ;;  %v6193_v46 = vld [vmem:[#allocation77_spill] sm:$0xff]  ;;  %v647_v27 = vpop.f32.mrf.mxu1 }
 0x242   :  { %v1988_v50 = vadd.f32 %v1987_v57, %v1986_v20  ;;  %v2007_v36 = vadd.f32 %v4695_v18, %v6190_v26  ;;  %v5033_v30 = vmul.f32 %v4884_v60, %v1378_v58  ;;  %v1492_v53 = vmul.f32 %v1353_v40, %v6191_v16 }
 0x243   :  { %v1995_v52 = vadd.f32 %v1994_v4, %v1993_v37  ;;  %v2001_v31 = vrot.slane %v2000_v43, 4  ;;  %v1493_v14 = vmul.f32 %v1353_v40, %v6192_v33  ;;  %v1494_v3 = vmul.f32 %v1353_v40, %v6193_v46  ;;  %v712_v37 = vpop.f32.mrf.mxu2  ;;  %v6195_v33 = vld [vmem:[#allocation135_spill] sm:$0xff] }
 0x244   :  { %v1989_v21 = vrot.slane %v1988_v50, 2  ;;  %v2008_v47 = vrot.slane %v2007_v36, 4  ;;  %v1386_v20 = vmul.f32 %v4992_v49, %v1385_v25  ;;  %v5040_v18 = vadd.f32 %v582_v29, %v3807_v13  ;;  %v777_v24 = vpop.f32.mrf.mxu3 }
 0x245   :  { %v1996_v57 = vrot.slane %v1995_v52, 2  ;;  %v2002_v15 = vadd.f32 %v2001_v31, %v2000_v43  ;;  %v5042_v58 = vpop.eup %3000  ;;  %v1215_v4 = vmul.f32 %v4750_v22, %v4750_v22  ;;  %v1288_v46 = vadd.f32 %v6196_v38, %v6195_v33 }
 0x246   :  { %6194 = vst [vmem:[#allocation60_spill] sm:$0xff] %v5040_v18  ;;  %v1990_v26 = vadd.f32 %v1989_v21, %v1988_v50  ;;  %v2009_v16 = vadd.f32 %v2008_v47, %v2007_v36  ;;  %v1839_v12 = vmul.f32 %v5042_v58, %v4995_v42  ;;  %v1495_v31 = vmul.f32 %v1353_v40, %v6197_v7  ;;  %v6198_v50 = vld [vmem:[#allocation136_spill] sm:$0xff]  ;;  %v1267_v47 = vpop.xlane.xlu2 %1266 }
 0x247   :  { %v1997_v25 = vadd.f32 %v1996_v57, %v1995_v52  ;;  %v5052_v13 = vadd.f32 %v647_v27, %v3817_v2  ;;  %v2003_v29 = vrot.slane %v2002_v15, 2  ;;  %v1289_v36 = vadd.f32 %v1288_v46, %v6198_v50 }
 0x248   :  { %v1991_v43 = vrot.slane %v1990_v26, 1  ;;  %v2010_v21 = vrot.slane %v2009_v16, 2  ;;  %vm1380_vm11 = vweird.f32 %v4841_v10  ;;  %vm1381_vm12 = vweird.f32 %v4884_v60 }
 0x249   :  { %v1840_v38 = vmul.f32 %v5042_v58, %v1839_v12  ;;  %v1998_v33 = vrot.slane %v1997_v25, 1  ;;  %v1224_v52 = vmul.f32 %v5040_v18, %v5040_v18  ;;  %v5061_v7 = vadd.f32 %v712_v37, %v3820_v32  ;;  %vm1382_vm1 = vmor %vm1380_vm11, %vm1381_vm12 }
 0x24a   :  { %v1992_v2 = vadd.f32 %v1991_v43, %v1990_v26  ;;  %v2004_v40 = vadd.f32 %v2003_v29, %v2002_v15  ;;  %v2011_v27 = vadd.f32 %v2010_v21, %v2009_v16  ;;  %v1290_v57 = vadd.f32 %v1289_v36, %v1215_v4  ;;  %v6202_v43 = vld [vmem:[#allocation18_spill] sm:$0xff] }
 0x24b   :  { %v1841_v9 = vmul.f32 0.5, %v1840_v38  ;;  %v1999_v46 = vadd.f32 %v1998_v33, %v1997_v25  ;;  %v1223_v50 = vmul.f32 %v5016_v44, %v5016_v44  ;;  %v1298_v1 = vadd.f32 %v1221_v45, %v1220_v8  ;;  %v6204_v33 = vld [vmem:[#allocation19_spill] sm:$0xff] }
 0x24c   :  { %vm1390_vm13 = vweird.f32 %v4904_v19  ;;  %v2190_v12 = vmul.f32 %v1992_v2, %v1492_v53  ;;  %v2005_v6 = vrot.slane %v2004_v40, 1  ;;  %v2012_v63 = vrot.slane %v2011_v27, 1  ;;  %1291 = vadd.xlane.f32.xlu2 %v1290_v57  ;;  %v6199_v53 = vld [vmem:[#allocation90_spill] sm:$0xff]  ;;  %v6206_v57 = vld [vmem:[#allocation20_spill] sm:$0xff] }
 0x24d   :  { %v5066_v18 = vmax.f32 %v1267_v47, 1e-24  ;;  %v1842_v32 = vsub.f32 1.5, %v1841_v9  ;;  %v2191_v26 = vmul.f32 %v1999_v46, %v1493_v14  ;;  %v1225_v15 = vmul.f32 %v5052_v13, %v5052_v13 }
 0x24e   :  { %v1299_v16 = vadd.f32 %v1298_v1, %v5013_v61  ;;  %v1387_v37 = vmul.f32 0.5, %v1386_v20  ;;  %2400 = vmatmul.f32.gmra.mxu0 %v2190_v12  ;;  %v2006_v4 = vadd.f32 %v2005_v6, %v2004_v40  ;;  %v2013_v8 = vadd.f32 %v2012_v63, %v2011_v27  ;;  %v6200_v61 = vld [vmem:[#allocation16_spill] sm:$0xff]  ;;  %v1272_v38 = vpop.xlane.xlu2 %1271 }
 0x24f   :  { %v5072_v45 = vadd.f32 %v777_v24, %v3883_v28  ;;  %v5076_v25 = vmul.f32 %v5019_v5, %v6199_v53  ;;  %2465 = vmatmul.f32.gmra.mxu1 %v2191_v26  ;;  %v1226_v9 = vmul.f32 %v5061_v7, %v5061_v7  ;;  %3002 = vrsqrt.f32 %v5066_v18  ;;  %v6201_v24 = vld [vmem:[#allocation17_spill] sm:$0xff] }
 0x250   :  { %v1300_v14 = vadd.f32 %v1299_v16, %v1223_v50  ;;  %v1843_v1 = vmul.f32 %v5042_v58, %v1842_v32  ;;  %vm1845_vm14 = vweird.f32 %v5042_v58  ;;  %v2192_v6 = vmul.f32 %v2006_v4, %v1494_v3  ;;  %v6203_v3 = vld [vmem:[#allocation83_spill] sm:$0xff] }
 0x251   :  { %v2193_v63 = vmul.f32 %v2013_v8, %v1495_v31  ;;  %v5085_v28 = vmul.f32 %v5019_v5, %v6200_v61  ;;  %v5089_v20 = vmul.f32 %v5019_v5, %v6201_v24  ;;  %v5093_v29 = vmul.f32 %v5019_v5, %v6202_v43  ;;  %v6205_v5 = vld [vmem:[#allocation88_spill] sm:$0xff] }
 0x252   :  { %1301 = vadd.xlane.f32.xlu1 %v1300_v14  ;;  %v1303_v21 = vadd.f32 %v1225_v15, %v1224_v52  ;;  %vm1844_vm15 = vweird.f32 %v4995_v42  ;;  %v1388_v36 = vsub.f32 1.5, %v1387_v37  ;;  %2530 = vmatmul.f32.gmra.mxu2 %v2192_v6  ;;  %v1496_v31 = vmul.f32 %v4990_v39, %v6203_v3  ;;  %v6207_v15 = vld [vmem:[#allocation21_spill] sm:$0xff] }
 0x253   :  { %2595 = vmatmul.f32.gmra.mxu3 %v2193_v63  ;;  %v1227_v47 = vmul.f32 %v5072_v45, %v5072_v45  ;;  %v1922_v40 = vmul.f32 %v5026_v56, %v6204_v33  ;;  %vm1846_vm0 = vmor %vm1844_vm15, %vm1845_vm14  ;;  %v1497_v52 = vmul.f32 %v4990_v39, %v6205_v5  ;;  %v2014_v27 = vadd.f32 %v4955_v35, %v4874_v0  ;;  %v6208_v0 = vld [vmem:[#allocation22_spill] sm:$0xff]  ;;  %v6212_v5 = vld [vmem:[#allocation23_spill] sm:$0xff] }
 0x254   :  { %v1304_v42 = vadd.f32 %v1303_v21, %v1226_v9  ;;  %v5110_v50 = vmul.f32 %v5026_v56, %v6206_v57  ;;  %v1847_v12 = vsel %vm1846_vm0, %v5042_v58, %v1843_v1  ;;  %vm1391_vm2 = vweird.f32 %v4992_v49  ;;  %v6209_v58 = vld [vmem:[#allocation89_spill] sm:$0xff] }
 0x255   :  { %v2194_v32 = vmul.f32 %v1992_v2, %v1496_v31  ;;  %v5118_v26 = vpop.eup %3002  ;;  %v5122_v16 = vmul.f32 %v5026_v56, %v6207_v15  ;;  %v5126_v35 = vmul.f32 %v5026_v56, %v6208_v0  ;;  %v2195_v37 = vmul.f32 %v1999_v46, %v1497_v52  ;;  %v6210_v2 = vld [vmem:[#allocation91_spill] sm:$0xff]  ;;  %vm1392_vm3 = vmor %vm1390_vm13, %vm1391_vm2 }
 0x256   :  { %v5128_v9 = vmax.f32 %v1272_v38, 1e-24  ;;  %v1389_v10 = vmul.f32 %v4992_v49, %v1388_v36  ;;  %v1498_v14 = vmul.f32 %v4990_v39, %v6209_v58  ;;  %v1499_v1 = vmul.f32 %v4990_v39, %v6210_v2 }
 0x257   :  { %2403 = vmatmul.f32.gmra.mxu0 %v2194_v32  ;;  %v1305_v6 = vadd.f32 %v1304_v42, %v1227_v47  ;;  %v5137_v63 = vsel %vm1382_vm1, %v4884_v60, %v5033_v30  ;;  %v1886_v56 = vmul.f32 %v1847_v12, %v4801_v41  ;;  %2468 = vmatmul.f32.gmra.mxu1 %v2195_v37  ;;  %v2015_v46 = vrot.slane %v2014_v27, 4  ;;  %v6214_v42 = vld [vmem:[#allocation25_spill] sm:$0xff] }
 0x258   :  { %v2021_v21 = vadd.f32 %v4959_v54, %v4877_v51  ;;  %v1395_v36 = vmul.f32 %v5118_v26, %v5066_v18  ;;  %v2196_v3 = vmul.f32 %v2006_v4, %v1498_v14  ;;  %v2197_v39 = vmul.f32 %v2013_v8, %v1499_v1 }
 0x259   :  { %1306 = vadd.xlane.f32.xlu2 %v1305_v6  ;;  %v2028_v60 = vadd.f32 %v4975_v59, %v4880_v34  ;;  %3004 = vrsqrt.f32 %v5128_v9  ;;  %v2016_v41 = vadd.f32 %v2015_v46, %v2014_v27  ;;  %v2035_v19 = vadd.f32 %v4979_v62, %v4895_v23  ;;  %v6211_v34 = vld [vmem:[#allocation92_spill] sm:$0xff]  ;;  %v6216_v46 = vld [vmem:[#allocation27_spill] sm:$0xff] }
 0x25a   :  { %v2022_v30 = vrot.slane %v2021_v21, 4  ;;  %v1887_v31 = vmul.f32 %v1847_v12, %v4843_v11  ;;  %v5153_v51 = vsel %vm1392_vm3, %v4992_v49, %v1389_v10  ;;  %v5157_v54 = vmul.f32 %v5028_v48, %v5028_v48  ;;  %2533 = vmatmul.f32.gmra.mxu2 %v2196_v3  ;;  %v6213_v11 = vld [vmem:[#allocation24_spill] sm:$0xff]  ;;  %v6215_v10 = vld [vmem:[#allocation26_spill] sm:$0xff] }
 0x25b   :  { %2598 = vmatmul.f32.gmra.mxu3 %v2197_v39  ;;  %v2029_v4 = vrot.slane %v2028_v60, 4  ;;  %v1500_v59 = vmul.f32 %v5004_v17, %v6211_v34  ;;  %v2017_v8 = vrot.slane %v2016_v41, 2  ;;  %v2036_v38 = vrot.slane %v2035_v19, 4  ;;  %v6217_v3 = vld [vmem:[#allocation28_spill] sm:$0xff] }
 0x25c   :  { %v2023_v47 = vadd.f32 %v2022_v30, %v2021_v21  ;;  %v5162_v23 = vmul.f32 %v1886_v56, %v6212_v5  ;;  %v5165_v62 = vmul.f32 %v1886_v56, %v6213_v11  ;;  %v2042_v52 = vadd.f32 %v1922_v40, %v5076_v25  ;;  %v2372_v11 = vld [vmem:[#allocation10 + $0x3f0] sm:$0xff] }
 0x25d   :  { %v2030_v49 = vadd.f32 %v2029_v4, %v2028_v60  ;;  %v5169_v27 = vmul.f32 %v1886_v56, %v6214_v42  ;;  %v1396_v12 = vmul.f32 %v5118_v26, %v1395_v36  ;;  %v2018_v32 = vadd.f32 %v2017_v8, %v2016_v41  ;;  %v6218_v60 = vld [vmem:[#allocation29_spill] sm:$0xff]  ;;  %v6219_v42 = vld [vmem:[#allocation30_spill] sm:$0xff] }
 0x25e   :  { %v2024_v37 = vrot.slane %v2023_v47, 2  ;;  %v5173_v58 = vmul.f32 %v1886_v56, %v6215_v10  ;;  %v2037_v2 = vadd.f32 %v2036_v38, %v2035_v19  ;;  %v2043_v1 = vrot.slane %v2042_v52, 4 }
 0x25f   :  { %v2031_v14 = vrot.slane %v2030_v49, 2  ;;  %v5175_v6 = vpop.eup %3004  ;;  %v5178_v21 = vmul.f32 %v1887_v31, %v6216_v46  ;;  %v5181_v25 = vmul.f32 %v1887_v31, %v6217_v3  ;;  %v2019_v40 = vrot.slane %v2018_v32, 1 }
 0x260   :  { %v2025_v39 = vadd.f32 %v2024_v37, %v2023_v47  ;;  %v5184_v36 = vmul.f32 %v1887_v31, %v6218_v60  ;;  %v2038_v30 = vrot.slane %v2037_v2, 2  ;;  %v2044_v56 = vadd.f32 %v2043_v1, %v2042_v52  ;;  %v6220_v60 = vld [vmem:[#allocation93_spill] sm:$0xff] }
 0x261   :  { %v2032_v41 = vadd.f32 %v2031_v14, %v2030_v49  ;;  %v1397_v4 = vmul.f32 0.5, %v1396_v12  ;;  %v2020_v34 = vadd.f32 %v2019_v40, %v2018_v32  ;;  %v2049_v8 = vadd.f32 %v5110_v50, %v5085_v28  ;;  %v6221_v12 = vld [vmem:[#allocation94_spill] sm:$0xff]  ;;  %v6222_v40 = vld [vmem:[#allocation97_spill] sm:$0xff] }
 0x262   :  { %v2026_v19 = vrot.slane %v2025_v39, 1  ;;  %v1405_v38 = vmul.f32 %v5175_v6, %v5128_v9  ;;  %v2039_v3 = vadd.f32 %v2038_v30, %v2037_v2  ;;  %v2045_v10 = vrot.slane %v2044_v56, 2 }
 0x263   :  { %v2033_v46 = vrot.slane %v2032_v41, 1  ;;  %v5191_v47 = vmul.f32 %v1887_v31, %v6219_v42  ;;  %v2198_v37 = vmul.f32 %v2020_v34, %v1500_v59  ;;  %v1501_v49 = vmul.f32 %v5004_v17, %v6220_v60 }
 0x264   :  { %v2027_v52 = vadd.f32 %v2026_v19, %v2025_v39  ;;  %v1502_v32 = vmul.f32 %v5004_v17, %v6221_v12  ;;  %v2040_v1 = vrot.slane %v2039_v3, 1  ;;  %v2050_v28 = vrot.slane %v2049_v8, 4  ;;  %v6223_v19 = vld [vmem:[#allocation95_spill] sm:$0xff] }
 0x265   :  { %v2034_v14 = vadd.f32 %v2033_v46, %v2032_v41  ;;  %2406 = vmatmul.f32.gmra.mxu0 %v2198_v37  ;;  %v1503_v2 = vmul.f32 %v5004_v17, %v6222_v40  ;;  %v2046_v30 = vadd.f32 %v2045_v10, %v2044_v56  ;;  %v2056_v31 = vadd.f32 %v5122_v16, %v5089_v20  ;;  %v6224_v41 = vld [vmem:[#allocation96_spill] sm:$0xff]  ;;  %v6225_v20 = vld [vmem:[#allocation98_spill] sm:$0xff]  ;;  %v6226_v10 = vld [vmem:[#allocation101_spill] sm:$0xff] }
 0x266   :  { %v2199_v50 = vmul.f32 %v2027_v52, %v1501_v49  ;;  %v1398_v59 = vsub.f32 1.5, %v1397_v4  ;;  %v1406_v42 = vmul.f32 %v5175_v6, %v1405_v38  ;;  %v2041_v39 = vadd.f32 %v2040_v1, %v2039_v3  ;;  %v6227_v4 = vld [vmem:[#allocation99_spill] sm:$0xff]  ;;  %v6228_v40 = vld [vmem:[#allocation100_spill] sm:$0xff] }
 0x267   :  { %v2200_v60 = vmul.f32 %v2034_v14, %v1502_v32  ;;  %v1504_v46 = vmul.f32 %v5137_v63, %v6223_v19  ;;  %v1505_v37 = vmul.f32 %v5137_v63, %v6224_v41  ;;  %v2051_v49 = vadd.f32 %v2050_v28, %v2049_v8  ;;  %v2325_v19 = vld [vmem:[#allocation10 + $0x278] sm:$0xff] }
 0x268   :  { %2471 = vmatmul.f32.gmra.mxu1 %v2199_v50  ;;  %v2057_v12 = vrot.slane %v2056_v31, 4  ;;  %vm1400_vm4 = vweird.f32 %v5066_v18  ;;  %vm1401_vm5 = vweird.f32 %v5118_v26  ;;  %v2201_v17 = vmul.f32 %v2041_v39, %v1503_v2  ;;  %v2373_v41 = vld [vmem:[#allocation10 + $0x3f8] sm:$0xff]  ;;  %2638 = vmatpush.msrb.mxu0 %v2325_v19 }
 0x269   :  { %2536 = vmatmul.f32.gmra.mxu2 %v2200_v60  ;;  %v1506_v16 = vmul.f32 %v5137_v63, %v6225_v20  ;;  %v1507_v3 = vmul.f32 %v5137_v63, %v6226_v10  ;;  %v2063_v56 = vadd.f32 %v5126_v35, %v5093_v29  ;;  %v1508_v38 = vmul.f32 %v5153_v51, %v6227_v4  ;;  %v2357_v63 = vld [vmem:[#allocation10 + $0x378] sm:$0xff]  ;;  %vm1402_vm6 = vmor %vm1400_vm4, %vm1401_vm5 }
 0x26a   :  { %v2047_v8 = vrot.slane %v2046_v30, 1  ;;  %v2052_v32 = vrot.slane %v2051_v49, 2  ;;  %v2058_v1 = vadd.f32 %v2057_v12, %v2056_v31  ;;  %v5217_v28 = vmul.f32 %v5118_v26, %v1398_v59  ;;  %2601 = vmatmul.f32.gmra.mxu3 %v2201_v17  ;;  %2768 = vmatpush.msrb.mxu2 %v2357_v63  ;;  %v2341_v31 = vld [vmem:[#allocation10 + $0x2f8] sm:$0xff]  ;;  %v2356_v12 = vld [vmem:[#allocation10 + $0x370] sm:$0xff] }
 0x26b   :  { %v5219_v50 = vmul.f32 0.5, %v1406_v42  ;;  %v1509_v2 = vmul.f32 %v5153_v51, %v6228_v40  ;;  %v2064_v60 = vrot.slane %v2063_v56, 4  ;;  %v2202_v29 = vmul.f32 %v2020_v34, %v1504_v46  ;;  %v2324_v59 = vld [vmem:[#allocation10 + $0x270] sm:$0xff]  ;;  %2833 = vmatpush.msrb.mxu3 %v2373_v41  ;;  %2703 = vmatpush.msrb.mxu1 %v2341_v31 }
 0x26c   :  { %v2203_v35 = vmul.f32 %v2027_v52, %v1505_v37  ;;  %v2053_v20 = vadd.f32 %v2052_v32, %v2051_v49  ;;  %v2059_v10 = vrot.slane %v2058_v1, 2  ;;  %v2204_v4 = vmul.f32 %v2034_v14, %v1506_v16  ;;  %v2340_v49 = vld [vmem:[#allocation10 + $0x2f0] sm:$0xff]  ;;  %v1681_v14 = vpop.xlane.xlu0 %1680  ;;  %2769 = vmatpush.msrb.mxu2 %v2356_v12  ;;  %2639 = vmatpush.msrb.mxu0 %v2324_v59 }
 0x26d   :  { %v2065_v42 = vadd.f32 %v2064_v60, %v2063_v56  ;;  %v2070_v17 = vadd.f32 %v5178_v21, %v5162_v23  ;;  %v2077_v40 = vadd.f32 %v5181_v25, %v5165_v62  ;;  %2409 = vmatmul.f32.gmra.mxu0 %v2202_v29  ;;  %v5227_v34 = vadd.f32 %v2047_v8, %v2046_v30 }
 0x26e   :  { %v2054_v52 = vrot.slane %v2053_v20, 1  ;;  %v2060_v46 = vadd.f32 %v2059_v10, %v2058_v1  ;;  %v2084_v37 = vadd.f32 %v5184_v36, %v5169_v27  ;;  %v2205_v16 = vmul.f32 %v2041_v39, %v1507_v3  ;;  %2834 = vmatpush.msrb.mxu3 %v2372_v11  ;;  %2704 = vmatpush.msrb.mxu1 %v2340_v49  ;;  %v6229_v1 = vld [vmem:[#allocation102_spill] sm:$0xff] }
 0x26f   :  { %v2066_v56 = vrot.slane %v2065_v42, 2  ;;  %v2071_v32 = vrot.slane %v2070_v17, 4  ;;  %v2078_v23 = vrot.slane %v2077_v40, 4  ;;  %v2091_v30 = vadd.f32 %v5191_v47, %v5173_v58 }
 0x270   :  { %2474 = vmatmul.f32.gmra.mxu1 %v2203_v35  ;;  %v5231_v62 = vadd.f32 %v2054_v52, %v2053_v20  ;;  %v2061_v21 = vrot.slane %v2060_v46, 1  ;;  %v2085_v25 = vrot.slane %v2084_v37, 4  ;;  %v5235_v39 = vmul.f32 0.088388346, %v1681_v14  ;;  %v6230_v35 = vld [vmem:[#allocation103_spill] sm:$0xff]  ;;  %v2355_v14 = vld [vmem:[#allocation10 + $0x368] sm:$0xff] }
 0x271   :  { %2539 = vmatmul.f32.gmra.mxu2 %v2204_v4  ;;  %v2067_v27 = vadd.f32 %v2066_v56, %v2065_v42  ;;  %v2072_v36 = vadd.f32 %v2071_v32, %v2070_v17  ;;  %v2079_v8 = vadd.f32 %v2078_v23, %v2077_v40  ;;  %v2206_v3 = vmul.f32 %v5227_v34, %v1508_v38  ;;  %v2371_v56 = vld [vmem:[#allocation10 + $0x3e8] sm:$0xff] }
 0x272   :  { %v1510_v60 = vmul.f32 %v5153_v51, %v6229_v1  ;;  %v2062_v63 = vadd.f32 %v2061_v21, %v2060_v46  ;;  %v2086_v19 = vadd.f32 %v2085_v25, %v2084_v37  ;;  %v1408_v41 = vsub.f32 1.5, %v5219_v50  ;;  %2604 = vmatmul.f32.gmra.mxu3 %v2205_v16  ;;  %v2323_v16 = vld [vmem:[#allocation10 + $0x268] sm:$0xff]  ;;  %2770 = vmatpush.msrb.mxu2 %v2355_v14 }
 0x273   :  { %v2068_v29 = vrot.slane %v2067_v27, 1  ;;  %v2073_v58 = vrot.slane %v2072_v36, 2  ;;  %v2092_v11 = vrot.slane %v2091_v30, 4  ;;  %v2207_v47 = vmul.f32 %v5231_v62, %v1509_v2  ;;  %v6234_v23 = vld [vmem:[#allocation105_spill] sm:$0xff]  ;;  %2640 = vmatpush.msrb.mxu0 %v2323_v16  ;;  %2835 = vmatpush.msrb.mxu3 %v2371_v56 }
 0x274   :  { %v1511_v38 = vmul.f32 %v5153_v51, %v6230_v35  ;;  %v2080_v20 = vrot.slane %v2079_v8, 2  ;;  %v1729_v10 = vmul.f32 %v5235_v39, %v5235_v39  ;;  %v2208_v31 = vmul.f32 %v2062_v63, %v1510_v60  ;;  %v6236_v35 = vld [vmem:[#allocation107_spill] sm:$0xff] }
 0x275   :  { %v2069_v50 = vadd.f32 %v2068_v29, %v2067_v27  ;;  %v2087_v12 = vrot.slane %v2086_v19, 2  ;;  %v2093_v59 = vadd.f32 %v2092_v11, %v2091_v30  ;;  %2412 = vmatmul.f32.gmra.mxu0 %v2206_v3  ;;  %v2074_v4 = vadd.f32 %v2073_v58, %v2072_v36  ;;  %v2339_v27 = vld [vmem:[#allocation10 + $0x2e8] sm:$0xff]  ;;  %v2354_v36 = vld [vmem:[#allocation10 + $0x360] sm:$0xff]  ;;  %v6235_v3 = vld [vmem:[#allocation106_spill] sm:$0xff] }
 0x276   :  { %v1769_v42 = vadd.f32 %v1729_v10, %v5157_v54  ;;  %v1403_v18 = vsel %vm1402_vm6, %v5118_v26, %v5217_v28  ;;  %vm1410_vm7 = vweird.f32 %v5128_v9  ;;  %vm1411_vm8 = vweird.f32 %v5175_v6  ;;  %v6233_v54 = vld [vmem:[#allocation104_spill] sm:$0xff]  ;;  %2705 = vmatpush.msrb.mxu1 %v2339_v27  ;;  %2771 = vmatpush.msrb.mxu2 %v2354_v36 }
 0x277   :  { %v2209_v51 = vmul.f32 %v2069_v50, %v1511_v38  ;;  %v2081_v2 = vadd.f32 %v2080_v20, %v2079_v8  ;;  %v2094_v17 = vrot.slane %v2093_v59, 2  ;;  %v1409_v52 = vmul.f32 %v5175_v6, %v1408_v41  ;;  %vm5256_vm9 = vmor %vm1410_vm7, %vm1411_vm8  ;;  %v2370_v41 = vld [vmem:[#allocation10 + $0x3e0] sm:$0xff] }
 0x278   :  { %2477 = vmatmul.f32.gmra.mxu1 %v2207_v47  ;;  %v1770_v40 = vrot.slane %v1769_v42, 4  ;;  %v2088_v46 = vadd.f32 %v2087_v12, %v2086_v19  ;;  %v1512_v49 = vmul.f32 %v1403_v18, %v6233_v54  ;;  %v2075_v26 = vrot.slane %v2074_v4, 1  ;;  %v2322_v19 = vld [vmem:[#allocation10 + $0x260] sm:$0xff]  ;;  %2836 = vmatpush.msrb.mxu3 %v2370_v41  ;;  %v6240_v54 = vld [vmem:[#allocation111_spill] sm:$0xff] }
 0x279   :  { %2542 = vmatmul.f32.gmra.mxu2 %v2208_v31  ;;  %v2095_v9 = vadd.f32 %v2094_v17, %v2093_v59  ;;  %v1513_v21 = vmul.f32 %v1403_v18, %v6234_v23  ;;  %v2082_v25 = vrot.slane %v2081_v2, 1  ;;  %v1413_v8 = vsel %vm5256_vm9, %v5175_v6, %v1409_v52  ;;  %v2338_v11 = vld [vmem:[#allocation10 + $0x2e0] sm:$0xff]  ;;  %2641 = vmatpush.msrb.mxu0 %v2322_v19  ;;  %v2321_v19 = vld [vmem:[#allocation10 + $0x258] sm:$0xff] }
 0x27a   :  { %v1771_v28 = vadd.f32 %v1770_v40, %v1769_v42  ;;  %2607 = vmatmul.f32.gmra.mxu3 %v2209_v51  ;;  %v2210_v32 = vmul.f32 %v5227_v34, %v1512_v49  ;;  %v1514_v1 = vmul.f32 %v1403_v18, %v6235_v3  ;;  %v2089_v60 = vrot.slane %v2088_v46, 1  ;;  %v6237_v6 = vld [vmem:[#allocation108_spill] sm:$0xff]  ;;  %2706 = vmatpush.msrb.mxu1 %v2338_v11  ;;  %v6238_v42 = vld [vmem:[#allocation109_spill] sm:$0xff]  ;;  %v1686_v49 = vpop.xlane.xlu0 %1685  ;;  %v2369_v41 = vld [vmem:[#allocation10 + $0x3d8] sm:$0xff] }
 0x27b   :  { %v2211_v34 = vmul.f32 %v5231_v62, %v1513_v21  ;;  %v5268_v29 = vadd.f32 %v2075_v26, %v2074_v4  ;;  %v1515_v38 = vmul.f32 %v1403_v18, %v6236_v35  ;;  %v2096_v20 = vrot.slane %v2095_v9, 1  ;;  %v6239_v18 = vld [vmem:[#allocation110_spill] sm:$0xff]  ;;  %2642 = vmatpush.msrb.mxu0 %v2321_v19  ;;  %2837 = vmatpush.msrb.mxu3 %v2369_v41 }
 0x27c   :  { %v1772_v30 = vrot.slane %v1771_v28, 2  ;;  %v2212_v47 = vmul.f32 %v2062_v63, %v1514_v1  ;;  %v1516_v10 = vmul.f32 %v1413_v8, %v6237_v6  ;;  %v5272_v31 = vadd.f32 %v2082_v25, %v2081_v2  ;;  %v2320_v11 = vld [vmem:[#allocation10 + $0x250] sm:$0xff]  ;;  %v2351_v6 = vld [vmem:[#allocation10 + $0x348] sm:$0xff] }
 0x27d   :  { %2415 = vmatmul.f32.gmra.mxu0 %v2210_v32  ;;  %v2213_v59 = vmul.f32 %v2069_v50, %v1515_v38  ;;  %v5274_v62 = vadd.f32 %v2089_v60, %v2088_v46  ;;  %v1517_v63 = vmul.f32 %v1413_v8, %v6238_v42  ;;  %v1518_v17 = vmul.f32 %v1413_v8, %v6239_v18  ;;  %v2353_v60 = vld [vmem:[#allocation10 + $0x358] sm:$0xff]  ;;  %v2368_v35 = vld [vmem:[#allocation10 + $0x3d0] sm:$0xff]  ;;  %v2335_v42 = vld [vmem:[#allocation10 + $0x2c8] sm:$0xff] }
 0x27e   :  { %v1773_v58 = vadd.f32 %v1772_v30, %v1771_v28  ;;  %v2214_v4 = vmul.f32 %v5268_v29, %v1516_v10  ;;  %v5279_v40 = vadd.f32 %v2096_v20, %v2095_v9  ;;  %v1519_v50 = vmul.f32 %v1413_v8, %v6240_v54  ;;  %2772 = vmatpush.msrb.mxu2 %v2353_v60  ;;  %v2336_v38 = vld [vmem:[#allocation10 + $0x2d0] sm:$0xff]  ;;  %v2319_v10 = vld [vmem:[#allocation10 + $0x248] sm:$0xff]  ;;  %v6245_v60 = vld [vmem:[#allocation32_spill] sm:$0xff] }
 0x27f   :  { %v2215_v52 = vmul.f32 %v5272_v31, %v1517_v63  ;;  %v2216_v37 = vmul.f32 %v5274_v62, %v1518_v17  ;;  %v5285_v26 = vmul.f32 0.088388346, %v1686_v49  ;;  %2643 = vmatpush.msrb.mxu0 %v2320_v11  ;;  %2838 = vmatpush.msrb.mxu3 %v2368_v35 }
 0x280   :  { %2480 = vmatmul.f32.gmra.mxu1 %v2211_v34  ;;  %v1774_v12 = vrot.slane %v1773_v58, 1  ;;  %v2217_v46 = vmul.f32 %v5279_v40, %v1519_v50  ;;  %v2337_v34 = vld [vmem:[#allocation10 + $0x2d8] sm:$0xff] }
 0x281   :  { %2545 = vmatmul.f32.gmra.mxu2 %v2212_v47  ;;  %v1730_v32 = vmul.f32 %v5285_v26, %v5285_v26  ;;  %2707 = vmatpush.msrb.mxu1 %v2337_v34  ;;  %v6247_v34 = vld [vmem:[#allocation36_spill] sm:$0xff] }
 0x282   :  { %v1775_v51 = vadd.f32 %v1774_v12, %v1773_v58  ;;  %2610 = vmatmul.f32.gmra.mxu3 %v2213_v59  ;;  %v2352_v58 = vld [vmem:[#allocation10 + $0x350] sm:$0xff]  ;;  %2644 = vmatpush.msrb.mxu0 %v2319_v10 }
 0x283   :  { %2773 = vmatpush.msrb.mxu2 %v2352_v58  ;;  %2708 = vmatpush.msrb.mxu1 %v2336_v38 }
 0x284   :  { %v1795_v2 = vmax.f32 %v1775_v51, 1e-24 }
 0x285   :  { %2418 = vmatmul.f32.gmra.mxu0 %v2214_v4  ;;  %v2367_v4 = vld [vmem:[#allocation10 + $0x3c8] sm:$0xff]  ;;  %2774 = vmatpush.msrb.mxu2 %v2351_v6 }
 0x286   :  { %3006 = vrsqrt.f32 %v1795_v2  ;;  %vm1854_vm11 = vweird.f32 %v1795_v2  ;;  %2839 = vmatpush.msrb.mxu3 %v2367_v4  ;;  %2709 = vmatpush.msrb.mxu1 %v2335_v42 }
 0x288   :  { %2483 = vmatmul.f32.gmra.mxu1 %v2215_v52  ;;  %v1277_v25 = vpop.xlane.xlu0 %1276 }
 0x289   :  { %2548 = vmatmul.f32.gmra.mxu2 %v2216_v37  ;;  %v1691_v9 = vpop.xlane.xlu1 %1690  ;;  %v1317_v36 = vmax.f32 %v1277_v25, 1e-24 }
 0x28a   :  { %2613 = vmatmul.f32.gmra.mxu3 %v2217_v46  ;;  %v5287_v16 = vmul.f32 0.088388346, %v1691_v9 }
 0x28b   :  { %3008 = vrsqrt.f32 %v1317_v36  ;;  %vm1420_vm13 = vweird.f32 %v1317_v36 }
 0x28c   :  { %v3007_v28 = vpop.eup %3006  ;;  %v1731_v23 = vmul.f32 %v5287_v16, %v5287_v16 }
 0x28d   :  { %v1849_v14 = vmul.f32 %v3007_v28, %v1795_v2  ;;  %vm1855_vm10 = vweird.f32 %v3007_v28 }
 0x28e   :  { %v1776_v21 = vadd.f32 %v1731_v23, %v1730_v32  ;;  %vm1856_vm12 = vmor %vm1854_vm11, %vm1855_vm10  ;;  %v6241_v32 = vld [vmem:[#allocation31_spill] sm:$0xff] }
 0x28f   :  { %v1850_v56 = vmul.f32 %v3007_v28, %v1849_v14 }
 0x290   :  { %v1777_v27 = vrot.slane %v1776_v21, 4 }
 0x291   :  { %v1851_v30 = vmul.f32 0.5, %v1850_v56  ;;  %v3009_v12 = vpop.eup %3008 }
 0x292   :  { %v1778_v8 = vadd.f32 %v1777_v27, %v1776_v21  ;;  %v1282_v20 = vpop.xlane.xlu0 %1281  ;;  %v1415_v51 = vmul.f32 %v3009_v12, %v1317_v36  ;;  %vm1421_vm14 = vweird.f32 %v3009_v12 }
 0x293   :  { %v1852_v3 = vsub.f32 1.5, %v1851_v30  ;;  %v5293_v18 = vmax.f32 %v1282_v20, 1e-24  ;;  %vm1422_vm15 = vmor %vm1420_vm13, %vm1421_vm14  ;;  %v6242_v30 = vld [vmem:[#allocation113_spill] sm:$0xff] }
 0x294   :  { %v1779_v1 = vrot.slane %v1778_v8, 2  ;;  %v1416_v52 = vmul.f32 %v3009_v12, %v1415_v51 }
 0x295   :  { %v1853_v59 = vmul.f32 %v3007_v28, %v1852_v3  ;;  %3010 = vrsqrt.f32 %v5293_v18  ;;  %vm1430_vm0 = vweird.f32 %v5293_v18 }
 0x296   :  { %v1780_v47 = vadd.f32 %v1779_v1, %v1778_v8  ;;  %v1417_v50 = vmul.f32 0.5, %v1416_v52  ;;  %v6244_v8 = vld [vmem:[#allocation116_spill] sm:$0xff] }
 0x297   :  { %v1857_v37 = vsel %vm1856_vm12, %v3007_v28, %v1853_v59 }
 0x298   :  { %v1781_v63 = vrot.slane %v1780_v47, 1  ;;  %v1888_v46 = vmul.f32 %v1857_v37, %v5028_v48  ;;  %v1418_v49 = vsub.f32 1.5, %v1417_v50  ;;  %v1889_v9 = vmul.f32 %v1857_v37, %v5235_v39  ;;  %v6243_v48 = vld [vmem:[#allocation114_spill] sm:$0xff]  ;;  %v6246_v39 = vld [vmem:[#allocation35_spill] sm:$0xff] }
 0x29a   :  { %v1782_v17 = vadd.f32 %v1781_v63, %v1780_v47  ;;  %v1419_v14 = vmul.f32 %v3009_v12, %v1418_v49  ;;  %v1934_v23 = vmul.f32 %v1888_v46, %v6241_v32  ;;  %v1935_v19 = vmul.f32 %v1888_v46, %v6245_v60  ;;  %v6248_v47 = vld [vmem:[#allocation120_spill] sm:$0xff]  ;;  %v6249_v63 = vld [vmem:[#allocation33_spill] sm:$0xff] }
 0x29b   :  { %v5297_v2 = vpop.eup %3010  ;;  %v1938_v41 = vmul.f32 %v1889_v9, %v6246_v39  ;;  %v1939_v58 = vmul.f32 %v1889_v9, %v6247_v34  ;;  %v1936_v51 = vmul.f32 %v1888_v46, %v6249_v63 }
 0x29c   :  { %v1796_v54 = vmax.f32 %v1782_v17, 1e-24  ;;  %v1425_v56 = vmul.f32 %v5297_v2, %v5293_v18  ;;  %v1423_v28 = vsel %vm1422_vm15, %v3009_v12, %v1419_v14  ;;  %v1297_v21 = vpop.xlane.xlu0 %1296  ;;  %v6250_v17 = vld [vmem:[#allocation37_spill] sm:$0xff]  ;;  %vm1431_vm1 = vweird.f32 %v5297_v2  ;;  %v6254_v18 = vld [vmem:[#allocation40_spill] sm:$0xff] }
 0x29d   :  { %v1520_v27 = vmul.f32 %v1423_v28, %v6242_v30  ;;  %v1521_v36 = vmul.f32 %v1423_v28, %v6243_v48  ;;  %v1522_v3 = vmul.f32 %v1423_v28, %v6244_v8  ;;  %v1523_v35 = vmul.f32 %v1423_v28, %v6248_v47  ;;  %vm5324_vm4 = vmor %vm1430_vm0, %vm1431_vm1 }
 0x29e   :  { %3012 = vrsqrt.f32 %v1796_v54  ;;  %v1426_v25 = vmul.f32 %v5297_v2, %v1425_v56  ;;  %v5311_v6 = vmax.f32 %v1297_v21, 1e-24  ;;  %v1940_v52 = vmul.f32 %v1889_v9, %v6250_v17  ;;  %v2333_v17 = vld [vmem:[#allocation10 + $0x2b8] sm:$0xff] }
 0x29f   :  { %v2218_v10 = vmul.f32 %v5268_v29, %v1520_v27  ;;  %v2219_v12 = vmul.f32 %v5272_v31, %v1521_v36  ;;  %v2220_v59 = vmul.f32 %v5274_v62, %v1522_v3  ;;  %v2221_v4 = vmul.f32 %v5279_v40, %v1523_v35  ;;  %v6251_v40 = vld [vmem:[#allocation34_spill] sm:$0xff] }
 0x2a0   :  { %v1427_v20 = vmul.f32 0.5, %v1426_v25  ;;  %3014 = vrsqrt.f32 %v5311_v6  ;;  %v2098_v29 = vadd.f32 %v1938_v41, %v1934_v23  ;;  %v2105_v49 = vadd.f32 %v1939_v58, %v1935_v19 }
 0x2a1   :  { %2421 = vmatmul.f32.gmra.mxu0 %v2218_v10  ;;  %2486 = vmatmul.f32.gmra.mxu1 %v2219_v12  ;;  %v1937_v14 = vmul.f32 %v1888_v46, %v6251_v40  ;;  %vm1864_vm3 = vweird.f32 %v1796_v54  ;;  %v2112_v27 = vadd.f32 %v1940_v52, %v1936_v51  ;;  %v1941_v48 = vmul.f32 %v1889_v9, %v6254_v18  ;;  %v6255_v12 = vld [vmem:[#allocation38_spill] sm:$0xff]  ;;  %v6258_v52 = vld [vmem:[#allocation119_spill] sm:$0xff] }
 0x2a2   :  { %v1428_v37 = vsub.f32 1.5, %v1427_v20  ;;  %2551 = vmatmul.f32.gmra.mxu2 %v2220_v59  ;;  %2616 = vmatmul.f32.gmra.mxu3 %v2221_v4  ;;  %v2099_v62 = vrot.slane %v2098_v29, 4  ;;  %v2106_v28 = vrot.slane %v2105_v49, 4  ;;  %vm1460_vm9 = vweird.f32 %v5311_v6 }
 0x2a4   :  { %v3013_v1 = vpop.eup %3012  ;;  %v1696_v11 = vpop.xlane.xlu1 %1695  ;;  %v1429_v56 = vmul.f32 %v5297_v2, %v1428_v37  ;;  %v2100_v30 = vadd.f32 %v2099_v62, %v2098_v29  ;;  %v2107_v3 = vadd.f32 %v2106_v28, %v2105_v49  ;;  %v6260_v49 = vld [vmem:[#allocation41_spill] sm:$0xff]  ;;  %v6261_v62 = vld [vmem:[#allocation42_spill] sm:$0xff]  ;;  %v6262_v28 = vld [vmem:[#allocation43_spill] sm:$0xff] }
 0x2a5   :  { %v1859_v38 = vmul.f32 %v3013_v1, %v1796_v54  ;;  %vm1865_vm2 = vweird.f32 %v3013_v1  ;;  %v5329_v36 = vmul.f32 0.088388346, %v1696_v11 }
 0x2a6   :  { %vm1866_vm5 = vmor %vm1864_vm3, %vm1865_vm2  ;;  %v5333_v19 = vpop.eup %3014  ;;  %v2101_v58 = vrot.slane %v2100_v30, 2  ;;  %v5342_v9 = vsel %vm5324_vm4, %v5297_v2, %v1429_v56  ;;  %v2108_v20 = vrot.slane %v2107_v3, 2  ;;  %v6256_v2 = vld [vmem:[#allocation117_spill] sm:$0xff] }
 0x2a7   :  { %v1860_v42 = vmul.f32 %v3013_v1, %v1859_v38  ;;  %v1732_v10 = vmul.f32 %v5329_v36, %v5329_v36  ;;  %v1524_v4 = vmul.f32 %v5342_v9, %v6256_v2  ;;  %v5360_v37 = vmul.f32 %v5342_v9, %v6258_v52 }
 0x2a8   :  { %v2102_v38 = vadd.f32 %v2101_v58, %v2100_v30  ;;  %vm1461_vm10 = vweird.f32 %v5333_v19 }
 0x2a9   :  { %v1861_v50 = vmul.f32 0.5, %v1860_v42  ;;  %v6257_v42 = vld [vmem:[#allocation118_spill] sm:$0xff]  ;;  %vm1462_vm13 = vmor %vm1460_vm9, %vm1461_vm10 }
 0x2aa   :  { %v1525_v51 = vmul.f32 %v5342_v9, %v6257_v42  ;;  %v2103_v25 = vrot.slane %v2102_v38, 1 }
 0x2ab   :  { %v1862_v31 = vsub.f32 1.5, %v1861_v50  ;;  %v6259_v50 = vld [vmem:[#allocation39_spill] sm:$0xff] }
 0x2ad   :  { %v1863_v21 = vmul.f32 %v3013_v1, %v1862_v31 }
 0x2af   :  { %v1867_v41 = vsel %vm1866_vm5, %v3013_v1, %v1863_v21  ;;  %v2113_v1 = vrot.slane %v2112_v27, 4 }
 0x2b0   :  { %v1701_v23 = vpop.xlane.xlu2 %1700  ;;  %v1287_v46 = vpop.xlane.xlu1 %1286  ;;  %v1890_v47 = vmul.f32 %v1867_v41, %v5285_v26  ;;  %v1891_v35 = vmul.f32 %v1867_v41, %v5287_v16  ;;  %v5351_v26 = vmul.f32 %v5333_v19, %v5311_v6  ;;  %v2119_v16 = vadd.f32 %v1941_v48, %v1937_v14  ;;  %v6263_v48 = vld [vmem:[#allocation44_spill] sm:$0xff]  ;;  %v6264_v41 = vld [vmem:[#allocation45_spill] sm:$0xff]  ;;  %v6279_v6 = vld [vmem:[#allocation131_spill] sm:$0xff] }
 0x2b1   :  { %v5331_v8 = vmul.f32 0.088388346, %v1701_v23  ;;  %v5335_v54 = vmax.f32 %v1287_v46, 1e-24  ;;  %v2109_v23 = vadd.f32 %v2108_v20, %v2107_v3  ;;  %v2114_v30 = vadd.f32 %v2113_v1, %v2112_v27  ;;  %v5382_v20 = vpop.f32.mrf.mxu1  ;;  %v2350_v1 = vld [vmem:[#allocation10 + $0x340] sm:$0xff] }
 0x2b2   :  { %v1942_v59 = vmul.f32 %v1890_v47, %v6255_v12  ;;  %v1943_v29 = vmul.f32 %v1890_v47, %v6259_v50  ;;  %v1944_v31 = vmul.f32 %v1890_v47, %v6260_v49  ;;  %v5365_v56 = vmul.f32 %v1890_v47, %v6261_v62  ;;  %v6265_v50 = vld [vmem:[#allocation46_spill] sm:$0xff]  ;;  %v5375_v49 = vpop.f32.mrf.mxu0  ;;  %6267 = vst [vmem:[#allocation66_spill] sm:$0xff] %v5382_v20  ;;  %v2349_v62 = vld [vmem:[#allocation10 + $0x338] sm:$0xff] }
 0x2b3   :  { %v1733_v11 = vmul.f32 %v5331_v8, %v5331_v8  ;;  %3016 = vrsqrt.f32 %v5335_v54  ;;  %v1946_v21 = vmul.f32 %v1891_v35, %v6262_v28  ;;  %v1947_v46 = vmul.f32 %v1891_v35, %v6263_v48  ;;  %6266 = vst [vmem:[#allocation61_spill] sm:$0xff] %v5375_v49  ;;  %2775 = vmatpush.msrb.mxu2 %v2350_v1  ;;  %v2365_v20 = vld [vmem:[#allocation10 + $0x3b8] sm:$0xff] }
 0x2b4   :  { %v1948_v58 = vmul.f32 %v1891_v35, %v6264_v41  ;;  %v2120_v42 = vrot.slane %v2119_v16, 4  ;;  %v5373_v12 = vmul.f32 %v1891_v35, %v6265_v50  ;;  %v5377_v47 = vadd.f32 %v2103_v25, %v2102_v38  ;;  %v2318_v41 = vld [vmem:[#allocation10 + $0x240] sm:$0xff] }
 0x2b5   :  { %v1783_v14 = vadd.f32 %v1733_v11, %v1732_v10  ;;  %v2110_v11 = vrot.slane %v2109_v23, 1  ;;  %v2115_v10 = vrot.slane %v2114_v30, 2  ;;  %vm1440_vm6 = vweird.f32 %v5335_v54  ;;  %2645 = vmatpush.msrb.mxu0 %v2318_v41  ;;  %2776 = vmatpush.msrb.mxu2 %v2349_v62  ;;  %v2348_v62 = vld [vmem:[#allocation10 + $0x330] sm:$0xff] }
 0x2b6   :  { %v2121_v3 = vadd.f32 %v2120_v42, %v2119_v16  ;;  %v2222_v35 = vmul.f32 %v5377_v47, %v1524_v4  ;;  %v2126_v38 = vadd.f32 %v1946_v21, %v1942_v59  ;;  %v2133_v16 = vadd.f32 %v1947_v46, %v1943_v29  ;;  %v2317_v42 = vld [vmem:[#allocation10 + $0x238] sm:$0xff] }
 0x2b7   :  { %v1784_v2 = vrot.slane %v1783_v14, 4  ;;  %v5385_v50 = vadd.f32 %v2110_v11, %v2109_v23  ;;  %v2116_v49 = vadd.f32 %v2115_v10, %v2114_v30  ;;  %v2140_v59 = vadd.f32 %v1948_v58, %v1944_v31  ;;  %2646 = vmatpush.msrb.mxu0 %v2317_v42  ;;  %2777 = vmatpush.msrb.mxu2 %v2348_v62  ;;  %v2332_v58 = vld [vmem:[#allocation10 + $0x2b0] sm:$0xff]  ;;  %v5402_v42 = vpop.f32.mrf.mxu2 }
 0x2b8   :  { %v2122_v18 = vrot.slane %v2121_v3, 2  ;;  %v2127_v30 = vrot.slane %v2126_v38, 4  ;;  %2424 = vmatmul.f32.gmra.mxu0 %v2222_v35 }
 0x2b9   :  { %v5370_v52 = vpop.eup %3016  ;;  %v1785_v28 = vadd.f32 %v1784_v2, %v1783_v14  ;;  %v2366_v14 = vld [vmem:[#allocation10 + $0x3c0] sm:$0xff]  ;;  %v2223_v4 = vmul.f32 %v5385_v50, %v1525_v51  ;;  %v2117_v23 = vrot.slane %v2116_v49, 1 }
 0x2ba   :  { %v1435_v27 = vmul.f32 %v5370_v52, %v5335_v54  ;;  %v2334_v2 = vld [vmem:[#allocation10 + $0x2c0] sm:$0xff]  ;;  %2840 = vmatpush.msrb.mxu3 %v2366_v14  ;;  %v2123_v41 = vadd.f32 %v2122_v18, %v2121_v3  ;;  %v5393_v46 = vadd.f32 %v2127_v30, %v2126_v38  ;;  %v2141_v14 = vrot.slane %v2140_v59, 4  ;;  %v2364_v18 = vld [vmem:[#allocation10 + $0x3b0] sm:$0xff]  ;;  %v2347_v3 = vld [vmem:[#allocation10 + $0x328] sm:$0xff] }
 0x2bb   :  { %v1786_v25 = vrot.slane %v1785_v28, 2  ;;  %2710 = vmatpush.msrb.mxu1 %v2334_v2  ;;  %v5391_v29 = vadd.f32 %v2117_v23, %v2116_v49  ;;  %vm1441_vm7 = vweird.f32 %v5370_v52  ;;  %v6268_v49 = vld [vmem:[#allocation123_spill] sm:$0xff]  ;;  %v2363_v23 = vld [vmem:[#allocation10 + $0x3a8] sm:$0xff]  ;;  %2778 = vmatpush.msrb.mxu2 %v2347_v3 }
 0x2bc   :  { %v1436_v48 = vmul.f32 %v5370_v52, %v1435_v27  ;;  %v2134_v27 = vrot.slane %v2133_v16, 4  ;;  %2841 = vmatpush.msrb.mxu3 %v2365_v20  ;;  %2489 = vmatmul.f32.gmra.mxu1 %v2223_v4  ;;  %v2124_v31 = vrot.slane %v2123_v41, 1  ;;  %v2315_v20 = vld [vmem:[#allocation10 + $0x228] sm:$0xff]  ;;  %vm1442_vm8 = vmor %vm1440_vm6, %vm1441_vm7  ;;  %v2129_v30 = vrot.slane %v5393_v46, 2 }
 0x2bd   :  { %v1787_v21 = vadd.f32 %v1786_v25, %v1785_v28  ;;  %2711 = vmatpush.msrb.mxu1 %v2333_v17  ;;  %v2316_v28 = vld [vmem:[#allocation10 + $0x230] sm:$0xff]  ;;  %v2224_v17 = vmul.f32 %v5391_v29, %v5360_v37  ;;  %v1456_v37 = vmul.f32 %v5333_v19, %v5351_v26  ;;  %v2331_v54 = vld [vmem:[#allocation10 + $0x2a8] sm:$0xff] }
 0x2be   :  { %v1437_v11 = vmul.f32 0.5, %v1436_v48  ;;  %v1527_v48 = vmul.f32 %v5342_v9, %v6268_v49  ;;  %2647 = vmatpush.msrb.mxu0 %v2316_v28  ;;  %v2135_v38 = vadd.f32 %v2134_v27, %v2133_v16  ;;  %v2125_v4 = vadd.f32 %v2124_v31, %v2123_v41  ;;  %2842 = vmatpush.msrb.mxu3 %v2364_v18  ;;  %v5410_v9 = vpop.f32.mrf.mxu0  ;;  %v5416_v41 = vpop.f32.mrf.mxu3  ;;  %v6272_v31 = vld [vmem:[#allocation124_spill] sm:$0xff]  ;;  %v6273_v28 = vld [vmem:[#allocation125_spill] sm:$0xff] }
 0x2bf   :  { %v1292_v10 = vpop.xlane.xlu2 %1291  ;;  %v1788_v51 = vrot.slane %v1787_v21, 1  ;;  %2712 = vmatpush.msrb.mxu1 %v2332_v58  ;;  %6269 = vst [vmem:[#allocation127_spill] sm:$0xff] %v5410_v9  ;;  %2554 = vmatmul.f32.gmra.mxu2 %v2224_v17  ;;  %v2328_v9 = vld [vmem:[#allocation10 + $0x290] sm:$0xff] }
 0x2c0   :  { %v5389_v1 = vmax.f32 %v1292_v10, 1e-24  ;;  %v1438_v2 = vsub.f32 1.5, %v1437_v11  ;;  %2648 = vmatpush.msrb.mxu0 %v2315_v20  ;;  %6270 = vst [vmem:[#allocation128_spill] sm:$0xff] %v5416_v41  ;;  %v2225_v27 = vmul.f32 %v2125_v4, %v1527_v48  ;;  %2843 = vmatpush.msrb.mxu3 %v2363_v23  ;;  %v2136_v17 = vrot.slane %v2135_v38, 2 }
 0x2c1   :  { %v1789_v35 = vadd.f32 %v1788_v51, %v1787_v21  ;;  %v2142_v21 = vadd.f32 %v2141_v14, %v2140_v59  ;;  %v2346_v51 = vld [vmem:[#allocation10 + $0x320] sm:$0xff]  ;;  %v6274_v59 = vld [vmem:[#allocation126_spill] sm:$0xff]  ;;  %2713 = vmatpush.msrb.mxu1 %v2331_v54  ;;  %v1457_v48 = vmul.f32 0.5, %v1456_v37 }
 0x2c2   :  { %3018 = vrsqrt.f32 %v5389_v1  ;;  %v1439_v25 = vmul.f32 %v5370_v52, %v1438_v2  ;;  %v5420_v2 = vpop.f32.mrf.mxu1  ;;  %2619 = vmatmul.f32.gmra.mxu3 %v2225_v27  ;;  %2779 = vmatpush.msrb.mxu2 %v2346_v51  ;;  %v2137_v27 = vadd.f32 %v2136_v17, %v2135_v38  ;;  %vm1450_vm11 = vweird.f32 %v5389_v1 }
 0x2c3   :  { %v5413_v11 = vmax.f32 %v1789_v35, 1e-24  ;;  %6271 = vst [vmem:[#allocation129_spill] sm:$0xff] %v5420_v2 }
 0x2c4   :  { %v1443_v10 = vsel %vm1442_vm8, %v5370_v52, %v1439_v25  ;;  %v2147_v52 = vadd.f32 %v5373_v12, %v5365_v56  ;;  %v2130_v56 = vadd.f32 %v2129_v30, %v5393_v46  ;;  %v2143_v25 = vrot.slane %v2142_v21, 2  ;;  %v2314_v30 = vld [vmem:[#allocation10 + $0x220] sm:$0xff] }
 0x2c5   :  { %v1302_v16 = vpop.xlane.xlu1 %1301  ;;  %v1528_v62 = vmul.f32 %v1443_v10, %v6272_v31  ;;  %v1529_v18 = vmul.f32 %v1443_v10, %v6273_v28  ;;  %v1530_v14 = vmul.f32 %v1443_v10, %v6274_v59  ;;  %3020 = vrsqrt.f32 %v5413_v11  ;;  %v5437_v31 = vpop.f32.mrf.mxu2  ;;  %v2330_v28 = vld [vmem:[#allocation10 + $0x2a0] sm:$0xff]  ;;  %2649 = vmatpush.msrb.mxu0 %v2314_v30 }
 0x2c6   :  { %v5418_v26 = vmax.f32 %v1302_v16, 1e-24  ;;  %v1531_v35 = vmul.f32 %v1443_v10, %v4617_v55  ;;  %v2148_v23 = vrot.slane %v2147_v52, 4  ;;  %6275 = vst [vmem:[#allocation130_spill] sm:$0xff] %v5437_v31  ;;  %v2131_v38 = vrot.slane %v2130_v56, 1  ;;  %2714 = vmatpush.msrb.mxu1 %v2330_v28 }
 0x2c7   :  { %v2226_v58 = vmul.f32 %v5377_v47, %v1528_v62  ;;  %v2227_v3 = vmul.f32 %v5385_v50, %v1529_v18  ;;  %v2228_v12 = vmul.f32 %v5391_v29, %v1530_v14  ;;  %v1458_v47 = vsub.f32 1.5, %v1457_v48 }
 0x2c8   :  { %v3019_v49 = vpop.eup %3018  ;;  %3022 = vrsqrt.f32 %v5418_v26  ;;  %v2144_v50 = vadd.f32 %v2143_v25, %v2142_v21  ;;  %v2229_v10 = vmul.f32 %v2125_v4, %v1531_v35  ;;  %v2149_v62 = vadd.f32 %v2148_v23, %v2147_v52  ;;  %v2362_v21 = vld [vmem:[#allocation10 + $0x3a0] sm:$0xff]  ;;  %v5450_v4 = vpop.f32.mrf.mxu3  ;;  %v2345_v52 = vld [vmem:[#allocation10 + $0x318] sm:$0xff] }
 0x2c9   :  { %v1445_v20 = vmul.f32 %v3019_v49, %v5389_v1  ;;  %2427 = vmatmul.f32.gmra.mxu0 %v2226_v58  ;;  %2492 = vmatmul.f32.gmra.mxu1 %v2227_v3  ;;  %vm1451_vm12 = vweird.f32 %v3019_v49  ;;  %6277 = vst [vmem:[#allocation76_spill] sm:$0xff] %v5450_v4  ;;  %v2138_v14 = vrot.slane %v2137_v27, 1  ;;  %v2132_v23 = vadd.f32 %v2131_v38, %v2130_v56  ;;  %v6281_v1 = vld [vmem:[#allocation133_spill] sm:$0xff]  ;;  %v2312_v4 = vld [vmem:[#allocation10 + $0x210] sm:$0xff] }
 0x2ca   :  { %2557 = vmatmul.f32.gmra.mxu2 %v2228_v12  ;;  %2622 = vmatmul.f32.gmra.mxu3 %v2229_v10  ;;  %v2145_v58 = vrot.slane %v2144_v50, 1  ;;  %v2150_v3 = vrot.slane %v2149_v62, 2  ;;  %vm1452_vm14 = vmor %vm1450_vm11, %vm1451_vm12  ;;  %vm1874_vm0 = vweird.f32 %v5413_v11  ;;  %vm1470_vm2 = vweird.f32 %v5418_v26 }
 0x2cb   :  { %v1446_v16 = vmul.f32 %v3019_v49, %v1445_v20  ;;  %v5435_v54 = vpop.eup %3020  ;;  %v5445_v46 = vpop.f32.mrf.mxu0  ;;  %2844 = vmatpush.msrb.mxu3 %v2362_v21  ;;  %v1459_v20 = vmul.f32 %v5333_v19, %v1458_v47  ;;  %2780 = vmatpush.msrb.mxu2 %v2345_v52  ;;  %v6280_v21 = vld [vmem:[#allocation132_spill] sm:$0xff] }
 0x2cc   :  { %v1307_v37 = vpop.xlane.xlu2 %1306  ;;  %v1869_v29 = vmul.f32 %v5435_v54, %v5413_v11  ;;  %6276 = vst [vmem:[#allocation75_spill] sm:$0xff] %v5445_v46  ;;  %v5453_v48 = vpop.f32.mrf.mxu1  ;;  %v2146_v47 = vadd.f32 %v2145_v58, %v2144_v50  ;;  %vm1875_vm15 = vweird.f32 %v5435_v54  ;;  %v2361_v50 = vld [vmem:[#allocation10 + $0x398] sm:$0xff]  ;;  %v2344_v58 = vld [vmem:[#allocation10 + $0x310] sm:$0xff] }
 0x2cd   :  { %v1447_v51 = vmul.f32 0.5, %v1446_v16  ;;  %v5439_v55 = vmax.f32 %v1307_v37, 1e-24  ;;  %6278 = vst [vmem:[#allocation77_spill] sm:$0xff] %v5453_v48  ;;  %v2139_v37 = vadd.f32 %v2138_v14, %v2137_v27  ;;  %v5469_v30 = vsel %vm1462_vm13, %v5333_v19, %v1459_v20  ;;  %v2313_v27 = vld [vmem:[#allocation10 + $0x218] sm:$0xff]  ;;  %vm1876_vm1 = vmor %vm1874_vm0, %vm1875_vm15  ;;  %2845 = vmatpush.msrb.mxu3 %v2361_v50  ;;  %2781 = vmatpush.msrb.mxu2 %v2344_v58  ;;  %v6290_v50 = vld [vmem:[#allocation53_spill] sm:$0xff] }
 0x2ce   :  { %v5447_v18 = vpop.eup %3022  ;;  %v1870_v17 = vmul.f32 %v5435_v54, %v1869_v29  ;;  %v2151_v29 = vadd.f32 %v2150_v3, %v2149_v62  ;;  %2650 = vmatpush.msrb.mxu0 %v2313_v27  ;;  %v2360_v46 = vld [vmem:[#allocation10 + $0x390] sm:$0xff] }
 0x2cf   :  { %v1448_v59 = vsub.f32 1.5, %v1447_v51  ;;  %3024 = vrsqrt.f32 %v5439_v55  ;;  %v1465_v25 = vmul.f32 %v5447_v18, %v5418_v26  ;;  %vm1471_vm3 = vweird.f32 %v5447_v18  ;;  %2846 = vmatpush.msrb.mxu3 %v2360_v46 }
 0x2d0   :  { %v1871_v12 = vmul.f32 0.5, %v1870_v17  ;;  %v2329_v17 = vld [vmem:[#allocation10 + $0x298] sm:$0xff]  ;;  %v2152_v11 = vrot.slane %v2151_v29, 1  ;;  %2651 = vmatpush.msrb.mxu0 %v2312_v4  ;;  %vm1472_vm4 = vmor %vm1470_vm2, %vm1471_vm3  ;;  %vm1480_vm5 = vweird.f32 %v5439_v55 }
 0x2d1   :  { %v1449_v35 = vmul.f32 %v3019_v49, %v1448_v59  ;;  %2715 = vmatpush.msrb.mxu1 %v2329_v17 }
 0x2d2   :  { %v1872_v51 = vsub.f32 1.5, %v1871_v12 }
 0x2d3   :  { %v1453_v16 = vsel %vm1452_vm14, %v3019_v49, %v1449_v35  ;;  %v1466_v49 = vmul.f32 %v5447_v18, %v1465_v25  ;;  %v6284_v35 = vld [vmem:[#allocation121_spill] sm:$0xff]  ;;  %2716 = vmatpush.msrb.mxu1 %v2328_v9 }
 0x2d4   :  { %v1532_v10 = vmul.f32 %v1453_v16, %v6279_v6  ;;  %v1533_v28 = vmul.f32 %v1453_v16, %v6280_v21  ;;  %v1534_v59 = vmul.f32 %v1453_v16, %v6281_v1  ;;  %v1873_v52 = vmul.f32 %v5435_v54, %v1872_v51  ;;  %v5481_v20 = vpop.f32.mrf.mxu0  ;;  %v5493_v1 = vpop.f32.mrf.mxu1 }
 0x2d5   :  { %v5476_v38 = vpop.eup %3024  ;;  %v5478_v62 = vpop.f32.mrf.mxu2  ;;  %6283 = vst [vmem:[#allocation122_spill] sm:$0xff] %v5481_v20  ;;  %v1536_v12 = vmul.f32 %v5469_v30, %v6284_v35  ;;  %v6292_v35 = vld [vmem:[#allocation57_spill] sm:$0xff]  ;;  %v6294_v20 = vld [vmem:[#allocation67_spill] sm:$0xff] }
 0x2d6   :  { %v2230_v56 = vmul.f32 %v2132_v23, %v1532_v10  ;;  %6282 = vst [vmem:[#allocation135_spill] sm:$0xff] %v5478_v62  ;;  %v2231_v19 = vmul.f32 %v2139_v37, %v1533_v28  ;;  %v2232_v14 = vmul.f32 %v2146_v47, %v1534_v59  ;;  %v1877_v3 = vsel %vm1876_vm1, %v5435_v54, %v1873_v52  ;;  %v5487_v6 = vpop.f32.mrf.mxu3  ;;  %v6286_v10 = vld [vmem:[#allocation134_spill] sm:$0xff] }
 0x2d7   :  { %v1892_v25 = vmul.f32 %v1877_v3, %v5329_v36  ;;  %v1893_v51 = vmul.f32 %v1877_v3, %v5331_v8  ;;  %6285 = vst [vmem:[#allocation82_spill] sm:$0xff] %v5487_v6  ;;  %v1537_v21 = vmul.f32 %v5469_v30, %v6286_v10  ;;  %v1467_v54 = vmul.f32 0.5, %v1466_v49  ;;  %v6288_v36 = vld [vmem:[#allocation51_spill] sm:$0xff] }
 0x2d8   :  { %2430 = vmatmul.f32.gmra.mxu0 %v2230_v56  ;;  %2495 = vmatmul.f32.gmra.mxu1 %v2231_v19  ;;  %v1475_v28 = vmul.f32 %v5476_v38, %v5439_v55  ;;  %6287 = vst [vmem:[#allocation136_spill] sm:$0xff] %v5493_v1  ;;  %v1535_v59 = vmul.f32 %v1453_v16, %v4750_v22  ;;  %v6289_v56 = vld [vmem:[#allocation52_spill] sm:$0xff]  ;;  %v6293_v10 = vld [vmem:[#allocation115_spill] sm:$0xff]  ;;  %vm1481_vm6 = vweird.f32 %v5476_v38 }
 0x2d9   :  { %2560 = vmatmul.f32.gmra.mxu2 %v2232_v14  ;;  %v2153_v52 = vadd.f32 %v2152_v11, %v2151_v29  ;;  %v1950_v8 = vmul.f32 %v1892_v25, %v6288_v36  ;;  %v1951_v27 = vmul.f32 %v1892_v25, %v6289_v56  ;;  %v1952_v19 = vmul.f32 %v1892_v25, %v6290_v50  ;;  %v6291_v14 = vld [vmem:[#allocation112_spill] sm:$0xff]  ;;  %v6296_v29 = vld [vmem:[#allocation137_spill] sm:$0xff]  ;;  %vm1482_vm7 = vmor %vm1480_vm5, %vm1481_vm6 }
 0x2da   :  { %v1953_v3 = vmul.f32 %v1892_v25, %v6291_v14  ;;  %v1954_v49 = vmul.f32 %v1893_v51, %v6292_v35  ;;  %v1955_v6 = vmul.f32 %v1893_v51, %v6293_v10  ;;  %v1956_v62 = vmul.f32 %v1893_v51, %v6294_v20  ;;  %v6295_v1 = vld [vmem:[#allocation68_spill] sm:$0xff] }
 0x2db   :  { %v1957_v48 = vmul.f32 %v1893_v51, %v6295_v1  ;;  %v2233_v22 = vmul.f32 %v2153_v52, %v1535_v59  ;;  %v2234_v16 = vmul.f32 %v2132_v23, %v1536_v12  ;;  %v1538_v17 = vmul.f32 %v5469_v30, %v6296_v29  ;;  %v2343_v59 = vld [vmem:[#allocation10 + $0x308] sm:$0xff] }
 0x2dc   :  { %v1468_v58 = vsub.f32 1.5, %v1467_v54  ;;  %v2235_v11 = vmul.f32 %v2139_v37, %v1537_v21  ;;  %v2154_v31 = vadd.f32 %v1954_v49, %v1950_v8  ;;  %v2161_v2 = vadd.f32 %v1955_v6, %v1951_v27  ;;  %2782 = vmatpush.msrb.mxu2 %v2343_v59  ;;  %v6297_v8 = vld [vmem:[#allocation138_spill] sm:$0xff] }
 0x2dd   :  { %v1476_v25 = vmul.f32 %v5476_v38, %v1475_v28  ;;  %2625 = vmatmul.f32.gmra.mxu3 %v2233_v22  ;;  %v2236_v41 = vmul.f32 %v2146_v47, %v1538_v17  ;;  %v2168_v51 = vadd.f32 %v1956_v62, %v1952_v19  ;;  %v2175_v12 = vadd.f32 %v1957_v48, %v1953_v3  ;;  %v5509_v21 = vpop.f32.mrf.mxu2  ;;  %v2311_v17 = vld [vmem:[#allocation10 + $0x208] sm:$0xff] }
 0x2de   :  { %v2155_v23 = vrot.slane %v2154_v31, 4  ;;  %v2162_v37 = vrot.slane %v2161_v2, 4  ;;  %v1469_v54 = vmul.f32 %v5447_v18, %v1468_v58  ;;  %v5518_v48 = vpop.f32.mrf.mxu3  ;;  %v2359_v58 = vld [vmem:[#allocation10 + $0x388] sm:$0xff]  ;;  %2652 = vmatpush.msrb.mxu0 %v2311_v17 }
 0x2df   :  { %v2169_v6 = vrot.slane %v2168_v51, 4  ;;  %v2176_v62 = vrot.slane %v2175_v12, 4  ;;  %v1477_v46 = vmul.f32 0.5, %v1476_v25  ;;  %2847 = vmatpush.msrb.mxu3 %v2359_v58  ;;  %v2310_v58 = vld [vmem:[#allocation10 + $0x200] sm:$0xff] }
 0x2e0   :  { %2433 = vmatmul.f32.gmra.mxu0 %v2234_v16  ;;  %2498 = vmatmul.f32.gmra.mxu1 %v2235_v11  ;;  %v2156_v4 = vadd.f32 %v2155_v23, %v2154_v31  ;;  %v2163_v47 = vadd.f32 %v2162_v37, %v2161_v2  ;;  %v1473_v22 = vsel %vm1472_vm4, %v5447_v18, %v1469_v54  ;;  %v2327_v11 = vld [vmem:[#allocation10 + $0x288] sm:$0xff] }
 0x2e1   :  { %2563 = vmatmul.f32.gmra.mxu2 %v2236_v41  ;;  %v1539_v41 = vmul.f32 %v5469_v30, %v6297_v8  ;;  %v2170_v27 = vadd.f32 %v2169_v6, %v2168_v51  ;;  %v2177_v31 = vadd.f32 %v2176_v62, %v2175_v12  ;;  %v1478_v25 = vsub.f32 1.5, %v1477_v46  ;;  %v2342_v30 = vld [vmem:[#allocation10 + $0x300] sm:$0xff]  ;;  %2717 = vmatpush.msrb.mxu1 %v2327_v11  ;;  %v6298_v18 = vld [vmem:[#allocation69_spill] sm:$0xff] }
 0x2e2   :  { %v5512_v28 = vpop.f32.mrf.mxu0  ;;  %v2157_v3 = vrot.slane %v2156_v4, 2  ;;  %v2164_v9 = vrot.slane %v2163_v47, 2  ;;  %2783 = vmatpush.msrb.mxu2 %v2342_v30  ;;  %v2358_v11 = vld [vmem:[#allocation10 + $0x380] sm:$0xff]  ;;  %2653 = vmatpush.msrb.mxu0 %v2310_v58  ;;  %v6306_v58 = vld [vmem:[#allocation54_spill] sm:$0xff] }
 0x2e3   :  { %v2237_v2 = vmul.f32 %v2153_v52, %v1539_v41  ;;  %v2171_v49 = vrot.slane %v2170_v27, 2  ;;  %v2178_v26 = vrot.slane %v2177_v31, 2  ;;  %v1540_v52 = vmul.f32 %v1473_v22, %v6298_v18  ;;  %2848 = vmatpush.msrb.mxu3 %v2358_v11  ;;  %v6307_v11 = vld [vmem:[#allocation55_spill] sm:$0xff] }
 0x2e4   :  { %v2158_v16 = vadd.f32 %v2157_v3, %v2156_v4  ;;  %v2165_v29 = vadd.f32 %v2164_v9, %v2163_v47  ;;  %v6299_v4 = vld [vmem:[#allocation74_spill] sm:$0xff]  ;;  %v1479_v8 = vmul.f32 %v5476_v38, %v1478_v25  ;;  %v2326_v25 = vld [vmem:[#allocation10 + $0x280] sm:$0xff] }
 0x2e5   :  { %v5522_v19 = vpop.f32.mrf.mxu1  ;;  %2628 = vmatmul.f32.gmra.mxu3 %v2237_v2  ;;  %v2172_v59 = vadd.f32 %v2171_v49, %v2170_v27  ;;  %v2179_v37 = vadd.f32 %v2178_v26, %v2177_v31  ;;  %v1541_v47 = vmul.f32 %v1473_v22, %v6299_v4  ;;  %v6300_v27 = vld [vmem:[#allocation58_spill] sm:$0xff]  ;;  %v1543_v49 = vmul.f32 %v1473_v22, %v5016_v44  ;;  %v6301_v44 = vld [vmem:[#allocation60_spill] sm:$0xff] }
 0x2e6   :  { %v2159_v51 = vrot.slane %v2158_v16, 1  ;;  %v2166_v23 = vrot.slane %v2165_v29, 1  ;;  %v1542_v3 = vmul.f32 %v1473_v22, %v6300_v27  ;;  %v1483_v30 = vsel %vm1482_vm7, %v5476_v38, %v1479_v8  ;;  %2718 = vmatpush.msrb.mxu1 %v2326_v25  ;;  %v6308_v25 = vld [vmem:[#allocation56_spill] sm:$0xff] }
 0x2e7   :  { %v2173_v12 = vrot.slane %v2172_v59, 1  ;;  %v2180_v46 = vrot.slane %v2179_v37, 1  ;;  %v1544_v22 = vmul.f32 %v1483_v30, %v6301_v44  ;;  %v1547_v38 = vmul.f32 %v1483_v30, %v5072_v45  ;;  %v6304_v45 = vld [vmem:[#allocation49_spill] sm:$0xff] }
 0x2e8   :  { %v2160_v54 = vadd.f32 %v2159_v51, %v2158_v16  ;;  %v2167_v62 = vadd.f32 %v2166_v23, %v2165_v29  ;;  %v1545_v51 = vmul.f32 %v1483_v30, %v5052_v13 }
 0x2e9   :  { %v2174_v55 = vadd.f32 %v2173_v12, %v2172_v59  ;;  %v2181_v26 = vadd.f32 %v2180_v46, %v2179_v37  ;;  %v1546_v37 = vmul.f32 %v1483_v30, %v5061_v7  ;;  %v6309_v30 = vld [vmem:[#allocation59_spill] sm:$0xff] }
 0x2ea   :  { %v5528_v6 = vpop.f32.mrf.mxu0  ;;  %v2238_v31 = vmul.f32 %v2160_v54, %v1540_v52  ;;  %v2239_v2 = vmul.f32 %v2167_v62, %v1541_v47  ;;  %v2242_v52 = vmul.f32 %v2160_v54, %v1544_v22  ;;  %v2243_v12 = vmul.f32 %v2167_v62, %v1545_v51  ;;  %v6302_v54 = vld [vmem:[#allocation47_spill] sm:$0xff]  ;;  %v6303_v62 = vld [vmem:[#allocation48_spill] sm:$0xff] }
 0x2eb   :  { %v2240_v17 = vmul.f32 %v2174_v55, %v1542_v3  ;;  %v2241_v29 = vmul.f32 %v2181_v26, %v1543_v49  ;;  %v2244_v47 = vmul.f32 %v2174_v55, %v1546_v37  ;;  %v2245_v46 = vmul.f32 %v2181_v26, %v1547_v38  ;;  %v6305_v3 = vld [vmem:[#allocation50_spill] sm:$0xff]  ;;  %v6312_v38 = vld [vmem:[#allocation64_spill] sm:$0xff] }
 0x2ec   :  { %v5532_v41 = vpop.f32.mrf.mxu2  ;;  %2436 = vmatmul.f32.gmra.mxu0 %v2238_v31  ;;  %2501 = vmatmul.f32.gmra.mxu1 %v2239_v2  ;;  %v5568_v55 = vld [vmem:[%s5717_s5] ss:$0 sm:$0xff]  ;;  %s3188_s5 = smov [#allocation11]  }
 0x2ed   :  { %v5535_v9 = vpop.f32.mrf.mxu1  ;;  %v5538_v16 = vpop.f32.mrf.mxu3  ;;  %2566 = vmatmul.f32.gmra.mxu2 %v2240_v17  ;;  %2631 = vmatmul.f32.gmra.mxu3 %v2241_v29  ;;  %s2918_s23 = sshll.u32 %s3188_s5, 4  ;;  %s2919_s23 = int_to_ptr.vmem [resolvable:$true] %s2918_s23 }
 0x2f2   :  { %v5541_v59 = vpop.f32.mrf.mxu0 }
 0x2f4   :  { %v5545_v23 = vpop.f32.mrf.mxu2  ;;  %2439 = vmatmul.f32.gmra.mxu0 %v2242_v52  ;;  %2504 = vmatmul.f32.gmra.mxu1 %v2243_v12  ;;  %v6310_v52 = vld [vmem:[#allocation62_spill] sm:$0xff]  ;;  %v6311_v12 = vld [vmem:[#allocation63_spill] sm:$0xff] }
 0x2f5   :  { %v5548_v18 = vpop.f32.mrf.mxu1  ;;  %v5551_v4 = vpop.f32.mrf.mxu3  ;;  %2569 = vmatmul.f32.gmra.mxu2 %v2244_v47  ;;  %2634 = vmatmul.f32.gmra.mxu3 %v2245_v46  ;;  %v6313_v47 = vld [vmem:[#allocation65_spill] sm:$0xff]  ;;  %v6314_v46 = vld [vmem:[#allocation70_spill] sm:$0xff] }
 0x2fa   :  { %v5553_v8 = vpop.f32.mrf.mxu0 }
 0x2fc   :  { %v5555_v13 = vpop.f32.mrf.mxu2  ;;  %2654 = vmatmul.f32.vlgmr.msrb.gmra.mxu0 %v6302_v54  ;;  %2719 = vmatmul.f32.vlgmr.msrb.gmra.mxu1 %v6303_v62  ;;  %v6315_v54 = vld [vmem:[#allocation71_spill] sm:$0xff]  ;;  %v6316_v62 = vld [vmem:[#allocation72_spill] sm:$0xff] }
 0x2fd   :  { %v5557_v27 = vpop.f32.mrf.mxu1  ;;  %v5559_v7 = vpop.f32.mrf.mxu3  ;;  %2784 = vmatmul.f32.vlgmr.msrb.gmra.mxu2 %v6304_v45  ;;  %2849 = vmatmul.f32.vlgmr.msrb.gmra.mxu3 %v6305_v3  ;;  %v6317_v45 = vld [vmem:[#allocation73_spill] sm:$0xff]  ;;  %v6318_v3 = vld [vmem:[#allocation78_spill] sm:$0xff] }
 0x302   :  { %v2419_v31 = vpop.f32.mrf.mxu0 }
 0x303   :  { %v2420_v49 = vadd.f32 %v5568_v55, %v2419_v31  ;;  %v6319_v31 = vld [vmem:[#allocation79_spill] sm:$0xff] }
 0x304   :  { %v5570_v2 = vpop.f32.mrf.mxu2  ;;  %2657 = vmatmul.f32.gmra.mxu0 %v6306_v58  ;;  %2722 = vmatmul.f32.gmra.mxu1 %v6307_v11  ;;  %v6323_v58 = vld [vmem:[#allocation85_spill] sm:$0xff]  ;;  %v6324_v11 = vld [vmem:[#allocation86_spill] sm:$0xff] }
 0x305   :  { %v2484_v26 = vpop.f32.mrf.mxu1  ;;  %v5573_v17 = vpop.f32.mrf.mxu3  ;;  %2787 = vmatmul.f32.gmra.mxu2 %v6308_v25  ;;  %2852 = vmatmul.f32.gmra.mxu3 %v6309_v30  ;;  %v6325_v30 = vld [vmem:[#allocation87_spill] sm:$0xff] }
 0x306   :  { %v2485_v29 = vadd.f32 %v2484_v26, %v2420_v49  ;;  %v6320_v49 = vld [vmem:[#allocation80_spill] sm:$0xff]  ;;  %v6321_v26 = vld [vmem:[#allocation81_spill] sm:$0xff] }
 0x30c   :  { %v2549_v44 = vpop.f32.mrf.mxu2  ;;  %2660 = vmatmul.f32.gmra.mxu0 %v6310_v52  ;;  %2725 = vmatmul.f32.gmra.mxu1 %v6311_v12 }
 0x30d   :  { %v2550_v22 = vadd.f32 %v2549_v44, %v2485_v29  ;;  %v2614_v51 = vpop.f32.mrf.mxu3  ;;  %2790 = vmatmul.f32.gmra.mxu2 %v6312_v38  ;;  %2855 = vmatmul.f32.gmra.mxu3 %v6313_v47  ;;  %v6322_v29 = vld [vmem:[#allocation84_spill] sm:$0xff] }
 0x30f   :  { %v5579_v37 = vadd.f32 %v2614_v51, %v2550_v22 }
 0x314   :  { %2663 = vmatmul.f32.gmra.mxu0 %v6314_v46  ;;  %2728 = vmatmul.f32.gmra.mxu1 %v6315_v54  ;;  %v6328_v54 = vld [vmem:[#allocation26_spill] sm:$0xff] }
 0x315   :  { %2793 = vmatmul.f32.gmra.mxu2 %v6316_v62  ;;  %2858 = vmatmul.f32.gmra.mxu3 %v6317_v45 }
 0x31c   :  { %2666 = vmatmul.f32.gmra.mxu0 %v6318_v3  ;;  %2731 = vmatmul.f32.gmra.mxu1 %v6319_v31 }
 0x31d   :  { %2796 = vmatmul.f32.gmra.mxu2 %v6320_v49  ;;  %2861 = vmatmul.f32.gmra.mxu3 %v6321_v26 }
 0x31e   :  { %v2422_v25 = vpop.f32.mrf.mxu0  ;;  %v2487_v22 = vpop.f32.mrf.mxu1 }
 0x31f   :  { %v2423_v44 = vadd.f32 %v5568_v55, %v2422_v25 }
 0x321   :  { %v2488_v51 = vadd.f32 %v2487_v22, %v2423_v44 }
 0x324   :  { %2669 = vmatmul.f32.gmra.mxu0 %v6322_v29  ;;  %2734 = vmatmul.f32.gmra.mxu1 %v6323_v58 }
 0x325   :  { %2799 = vmatmul.f32.gmra.mxu2 %v6324_v11  ;;  %2864 = vmatmul.f32.gmra.mxu3 %v6325_v30  ;;  %v2552_v52 = vpop.f32.mrf.mxu2  ;;  %v2617_v38 = vpop.f32.mrf.mxu3 }
 0x326   :  { %v2553_v12 = vadd.f32 %v2552_v52, %v2488_v51 }
 0x328   :  { %v5602_v47 = vadd.f32 %v2617_v38, %v2553_v12  ;;  %v6334_v12 = vld [vmem:[#allocation40_spill] sm:$0xff] }
 0x32c   :  { %2672 = vmatmul.f32.gmra.mxu0 %v6199_v53  ;;  %2737 = vmatmul.f32.gmra.mxu1 %v6200_v61  ;;  %v6326_v53 = vld [vmem:[#allocation24_spill] sm:$0xff] }
 0x32d   :  { %2802 = vmatmul.f32.gmra.mxu2 %v6201_v24  ;;  %2867 = vmatmul.f32.gmra.mxu3 %v6202_v43  ;;  %v6327_v24 = vld [vmem:[#allocation25_spill] sm:$0xff] }
 0x334   :  { %2675 = vmatmul.f32.gmra.mxu0 %v6204_v33  ;;  %2740 = vmatmul.f32.gmra.mxu1 %v6206_v57  ;;  %v6329_v33 = vld [vmem:[#allocation27_spill] sm:$0xff]  ;;  %v6330_v57 = vld [vmem:[#allocation28_spill] sm:$0xff] }
 0x335   :  { %2805 = vmatmul.f32.gmra.mxu2 %v6207_v15  ;;  %2870 = vmatmul.f32.gmra.mxu3 %v6208_v0  ;;  %v2425_v61 = vpop.f32.mrf.mxu0  ;;  %v6331_v15 = vld [vmem:[#allocation29_spill] sm:$0xff] }
 0x336   :  { %v2426_v43 = vadd.f32 %v5568_v55, %v2425_v61  ;;  %v6335_v61 = vld [vmem:[#allocation38_spill] sm:$0xff] }
 0x339   :  { %v2490_v46 = vpop.f32.mrf.mxu1 }
 0x33a   :  { %v2491_v62 = vadd.f32 %v2490_v46, %v2426_v43  ;;  %v6337_v46 = vld [vmem:[#allocation41_spill] sm:$0xff] }
 0x33c   :  { %2678 = vmatmul.f32.gmra.mxu0 %v6212_v5  ;;  %2743 = vmatmul.f32.gmra.mxu1 %v6326_v53  ;;  %v6332_v5 = vld [vmem:[#allocation30_spill] sm:$0xff] }
 0x33d   :  { %2808 = vmatmul.f32.gmra.mxu2 %v6327_v24  ;;  %2873 = vmatmul.f32.gmra.mxu3 %v6328_v54  ;;  %v6336_v24 = vld [vmem:[#allocation39_spill] sm:$0xff]  ;;  %v6338_v54 = vld [vmem:[#allocation42_spill] sm:$0xff] }
 0x342   :  { %v2555_v0 = vpop.f32.mrf.mxu2 }
 0x343   :  { %v2556_v3 = vadd.f32 %v2555_v0, %v2491_v62  ;;  %v6340_v0 = vld [vmem:[#allocation44_spill] sm:$0xff] }
 0x344   :  { %2681 = vmatmul.f32.gmra.mxu0 %v6329_v33  ;;  %2746 = vmatmul.f32.gmra.mxu1 %v6330_v57 }
 0x345   :  { %2811 = vmatmul.f32.gmra.mxu2 %v6331_v15  ;;  %2876 = vmatmul.f32.gmra.mxu3 %v6332_v5  ;;  %v2620_v26 = vpop.f32.mrf.mxu3  ;;  %v6339_v15 = vld [vmem:[#allocation43_spill] sm:$0xff]  ;;  %v6342_v5 = vld [vmem:[#allocation46_spill] sm:$0xff] }
 0x346   :  { %v2428_v45 = vpop.f32.mrf.mxu0  ;;  %v2493_v49 = vpop.f32.mrf.mxu1  ;;  %v5618_v58 = vadd.f32 %v2620_v26, %v2556_v3 }
 0x347   :  { %v2429_v31 = vadd.f32 %v5568_v55, %v2428_v45  ;;  %v6341_v45 = vld [vmem:[#allocation45_spill] sm:$0xff] }
 0x349   :  { %v2494_v29 = vadd.f32 %v2493_v49, %v2429_v31 }
 0x34c   :  { %2684 = vmatmul.f32.gmra.mxu0 %v6241_v32  ;;  %2749 = vmatmul.f32.gmra.mxu1 %v6245_v60  ;;  %v6333_v32 = vld [vmem:[#allocation37_spill] sm:$0xff] }
 0x34d   :  { %2814 = vmatmul.f32.gmra.mxu2 %v6249_v63  ;;  %v2558_v11 = vpop.f32.mrf.mxu2  ;;  %2879 = vmatmul.f32.gmra.mxu3 %v6251_v40  ;;  %v2623_v30 = vpop.f32.mrf.mxu3 }
 0x34e   :  { %v2559_v25 = vadd.f32 %v2558_v11, %v2494_v29 }
 0x350   :  { %v5624_v44 = vadd.f32 %v2623_v30, %v2559_v25  ;;  %v6343_v25 = vld [vmem:[#allocation61_spill] sm:$0xff] }
 0x351   :  { %v2396_v30 = vadd.f32 %v5568_v55, %v6343_v25 }
 0x354   :  { %2687 = vmatmul.f32.gmra.mxu0 %v6246_v39  ;;  %2752 = vmatmul.f32.gmra.mxu1 %v6247_v34 }
 0x355   :  { %v2431_v22 = vpop.f32.mrf.mxu0  ;;  %v2496_v52 = vpop.f32.mrf.mxu1  ;;  %2817 = vmatmul.f32.gmra.mxu2 %v6333_v32  ;;  %2882 = vmatmul.f32.gmra.mxu3 %v6334_v12 }
 0x356   :  { %v2432_v51 = vadd.f32 %v5568_v55, %v2431_v22 }
 0x358   :  { %v2497_v60 = vadd.f32 %v2496_v52, %v2432_v51 }
 0x35c   :  { %v2561_v63 = vpop.f32.mrf.mxu2  ;;  %2690 = vmatmul.f32.gmra.mxu0 %v6335_v61  ;;  %2755 = vmatmul.f32.gmra.mxu1 %v6336_v24  ;;  %v6346_v61 = vld [vmem:[#allocation128_spill] sm:$0xff] }
 0x35d   :  { %v2562_v38 = vadd.f32 %v2561_v63, %v2497_v60  ;;  %v2434_v40 = vpop.f32.mrf.mxu0  ;;  %v2499_v43 = vpop.f32.mrf.mxu1  ;;  %2820 = vmatmul.f32.gmra.mxu2 %v6337_v46  ;;  %2885 = vmatmul.f32.gmra.mxu3 %v6338_v54  ;;  %v6344_v63 = vld [vmem:[#allocation66_spill] sm:$0xff] }
 0x35e   :  { %v2435_v53 = vadd.f32 %v5568_v55, %v2434_v40 }
 0x360   :  { %v2500_v39 = vadd.f32 %v2499_v43, %v2435_v53  ;;  %v2626_v34 = vpop.f32.mrf.mxu3 }
 0x361   :  { %v5636_v62 = vadd.f32 %v2626_v34, %v2562_v38  ;;  %v2461_v38 = vadd.f32 %v6344_v63, %v2396_v30  ;;  %v6347_v34 = vld [vmem:[#allocation129_spill] sm:$0xff] }
 0x364   :  { %v2564_v33 = vpop.f32.mrf.mxu2  ;;  %2693 = vmatmul.f32.gmra.mxu0 %v6339_v15  ;;  %2758 = vmatmul.f32.gmra.mxu1 %v6340_v0 }
 0x365   :  { %v2565_v57 = vadd.f32 %v2564_v33, %v2500_v39  ;;  %2823 = vmatmul.f32.gmra.mxu2 %v6341_v45  ;;  %2888 = vmatmul.f32.gmra.mxu3 %v6342_v5  ;;  %v6350_v45 = vld [vmem:[#allocation76_spill] sm:$0xff] }
 0x368   :  { %v2629_v3 = vpop.f32.mrf.mxu3 }
 0x369   :  { %v5642_v31 = vadd.f32 %v2629_v3, %v2565_v57  ;;  %v2437_v49 = vpop.f32.mrf.mxu0  ;;  %v2502_v26 = vpop.f32.mrf.mxu1 }
 0x36a   :  { %v2438_v29 = vadd.f32 %v5568_v55, %v2437_v49 }
 0x36c   :  { %v2503_v11 = vadd.f32 %v2502_v26, %v2438_v29  ;;  %2696 = vmatmul.f32.gmra.mxu0 %v6288_v36  ;;  %2761 = vmatmul.f32.gmra.mxu1 %v6289_v56  ;;  %v2526_v56 = vadd.f32 %v5402_v42, %v2461_v38  ;;  %v6348_v42 = vld [vmem:[#allocation130_spill] sm:$0xff] }
 0x36d   :  { %2826 = vmatmul.f32.gmra.mxu2 %v6290_v50  ;;  %2891 = vmatmul.f32.gmra.mxu3 %v6291_v14  ;;  %v6345_v50 = vld [vmem:[#allocation127_spill] sm:$0xff]  ;;  %v6354_v38 = vld [vmem:[#allocation82_spill] sm:$0xff] }
 0x36e   :  { %v2399_v14 = vadd.f32 %v5568_v55, %v6345_v50  ;;  %v2591_v24 = vadd.f32 %v6346_v61, %v2526_v56  ;;  %v6355_v61 = vld [vmem:[#allocation136_spill] sm:$0xff] }
 0x370   :  { %v2567_v22 = vpop.f32.mrf.mxu2  ;;  %v2632_v52 = vpop.f32.mrf.mxu3 }
 0x371   :  { %v2568_v51 = vadd.f32 %v2567_v22, %v2503_v11  ;;  %v2440_v32 = vpop.f32.mrf.mxu0  ;;  %v2505_v12 = vpop.f32.mrf.mxu1  ;;  %v6351_v11 = vld [vmem:[#allocation77_spill] sm:$0xff] }
 0x372   :  { %v2441_v60 = vadd.f32 %v5568_v55, %v2440_v32  ;;  %v6353_v32 = vld [vmem:[#allocation122_spill] sm:$0xff] }
 0x373   :  { %v5653_v40 = vadd.f32 %v2632_v52, %v2568_v51  ;;  %v6352_v51 = vld [vmem:[#allocation135_spill] sm:$0xff] }
 0x374   :  { %v2506_v36 = vadd.f32 %v2505_v12, %v2441_v60  ;;  %2699 = vmatmul.f32.gmra.mxu0 %v6292_v35  ;;  %2764 = vmatmul.f32.gmra.mxu1 %v6293_v10  ;;  %v2464_v35 = vadd.f32 %v6347_v34, %v2399_v14  ;;  %v2405_v60 = vadd.f32 %v5568_v55, %v6353_v32 }
 0x375   :  { %2829 = vmatmul.f32.gmra.mxu2 %v6294_v20  ;;  %2894 = vmatmul.f32.gmra.mxu3 %v6295_v1  ;;  %v6349_v20 = vld [vmem:[#allocation75_spill] sm:$0xff] }
 0x376   :  { %v2529_v57 = vadd.f32 %v6348_v42, %v2464_v35  ;;  %v2402_v1 = vadd.f32 %v5568_v55, %v6349_v20 }
 0x378   :  { %v2570_v53 = vpop.f32.mrf.mxu2  ;;  %v2635_v46 = vpop.f32.mrf.mxu3  ;;  %v2594_v5 = vadd.f32 %v6350_v45, %v2529_v57  ;;  %v2467_v25 = vadd.f32 %v6351_v11, %v2402_v1 }
 0x379   :  { %v2571_v43 = vadd.f32 %v2570_v53, %v2506_v36  ;;  %v2655_v39 = vpop.f32.mrf.mxu0  ;;  %v2720_v54 = vpop.f32.mrf.mxu1 }
 0x37a   :  { %v2656_v10 = vadd.f32 %v2655_v39, %v2591_v24  ;;  %v2532_v52 = vadd.f32 %v6352_v51, %v2467_v25  ;;  %v2470_v24 = vadd.f32 %v6355_v61, %v2405_v60 }
 0x37b   :  { %v5664_v33 = vadd.f32 %v2635_v46, %v2571_v43 }
 0x37c   :  { %v2721_v15 = vadd.f32 %v2720_v54, %v2656_v10  ;;  %v2597_v36 = vadd.f32 %v6354_v38, %v2532_v52  ;;  %v2535_v39 = vadd.f32 %v5509_v21, %v2470_v24  ;;  %v2408_v54 = vadd.f32 %v5568_v55, %v5512_v28 }
 0x37d   :  { %v2411_v21 = vadd.f32 %v5568_v55, %v5528_v6 }
 0x37e   :  { %v2600_v10 = vadd.f32 %v5518_v48, %v2535_v39 }
 0x37f   :  { %v2476_v25 = vadd.f32 %v5535_v9, %v2411_v21 }
 0x380   :  { %v2785_v0 = vpop.f32.mrf.mxu2  ;;  %v2850_v49 = vpop.f32.mrf.mxu3 }
 0x381   :  { %v2786_v3 = vadd.f32 %v2785_v0, %v2721_v15  ;;  %v2658_v26 = vpop.f32.mrf.mxu0  ;;  %v2723_v29 = vpop.f32.mrf.mxu1  ;;  %v2473_v15 = vadd.f32 %v5522_v19, %v2408_v54 }
 0x382   :  { %v2659_v22 = vadd.f32 %v2658_v26, %v2594_v5 }
 0x383   :  { %v2851_v30 = vadd.f32 %v2850_v49, %v2786_v3  ;;  %v2538_v5 = vadd.f32 %v5532_v41, %v2473_v15  ;;  %v2414_v41 = vadd.f32 %v5568_v55, %v5541_v59 }
 0x384   :  { %v2724_v12 = vadd.f32 %v2723_v29, %v2659_v22  ;;  %v2541_v22 = vadd.f32 %v5545_v23, %v2476_v25  ;;  %v2417_v23 = vadd.f32 %v5568_v55, %v5553_v8 }
 0x385   :  { %2898 = vst [vmem:[#allocation11] sm:$0xff] %v2851_v30  ;;  %v2603_v49 = vadd.f32 %v5538_v16, %v2538_v5 }
 0x386   :  { %v2606_v52 = vadd.f32 %v5551_v4, %v2541_v22  ;;  %v2482_v24 = vadd.f32 %v5557_v27, %v2417_v23 }
 0x388   :  { %v2788_v63 = vpop.f32.mrf.mxu2  ;;  %v2853_v50 = vpop.f32.mrf.mxu3 }
 0x389   :  { %v2789_v56 = vadd.f32 %v2788_v63, %v2724_v12  ;;  %v2661_v14 = vpop.f32.mrf.mxu0  ;;  %v2726_v53 = vpop.f32.mrf.mxu1  ;;  %v2479_v63 = vadd.f32 %v5548_v18, %v2414_v41 }
 0x38a   :  { %v2662_v46 = vadd.f32 %v2661_v14, %v2597_v36 }
 0x38b   :  { %v2854_v43 = vadd.f32 %v2853_v50, %v2789_v56  ;;  %v2544_v36 = vadd.f32 %v5555_v13, %v2479_v63 }
 0x38c   :  { %v2727_v34 = vadd.f32 %v2726_v53, %v2662_v46  ;;  %v2547_v46 = vadd.f32 %v5570_v2, %v2482_v24 }
 0x38d   :  { %2899 = vst [vmem:[#allocation11 + $0x8] sm:$0xff] %v2854_v43  ;;  %v2609_v50 = vadd.f32 %v5559_v7, %v2544_v36 }
 0x38e   :  { %v2612_v54 = vadd.f32 %v5573_v17, %v2547_v46 }
 0x390   :  { %v2791_v35 = vpop.f32.mrf.mxu2  ;;  %v2856_v57 = vpop.f32.mrf.mxu3 }
 0x391   :  { %v2792_v42 = vadd.f32 %v2791_v35, %v2727_v34  ;;  %v2664_v20 = vpop.f32.mrf.mxu0  ;;  %v2729_v1 = vpop.f32.mrf.mxu1 }
 0x392   :  { %v2665_v45 = vadd.f32 %v2664_v20, %v2600_v10 }
 0x393   :  { %v2857_v0 = vadd.f32 %v2856_v57, %v2792_v42 }
 0x394   :  { %v2730_v3 = vadd.f32 %v2729_v1, %v2665_v45 }
 0x395   :  { %2900 = vst [vmem:[#allocation11 + $0x10] sm:$0xff] %v2857_v0 }
 0x398   :  { %v2794_v28 = vpop.f32.mrf.mxu2  ;;  %v2859_v48 = vpop.f32.mrf.mxu3 }
 0x399   :  { %v2795_v26 = vadd.f32 %v2794_v28, %v2730_v3  ;;  %v2667_v29 = vpop.f32.mrf.mxu0  ;;  %v2732_v11 = vpop.f32.mrf.mxu1 }
 0x39a   :  { %v2668_v19 = vadd.f32 %v2667_v29, %v2603_v49 }
 0x39b   :  { %v2860_v30 = vadd.f32 %v2859_v48, %v2795_v26 }
 0x39c   :  { %v2733_v51 = vadd.f32 %v2732_v11, %v2668_v19 }
 0x39d   :  { %2901 = vst [vmem:[#allocation11 + $0x18] sm:$0xff] %v2860_v30 }
 0x3a0   :  { %v2797_v6 = vpop.f32.mrf.mxu2  ;;  %v2862_v16 = vpop.f32.mrf.mxu3 }
 0x3a1   :  { %v2798_v32 = vadd.f32 %v2797_v6, %v2733_v51  ;;  %v2670_v60 = vpop.f32.mrf.mxu0  ;;  %v2735_v12 = vpop.f32.mrf.mxu1 }
 0x3a2   :  { %v2671_v9 = vadd.f32 %v2670_v60, %v2606_v52 }
 0x3a3   :  { %v2863_v38 = vadd.f32 %v2862_v16, %v2798_v32 }
 0x3a4   :  { %v2736_v56 = vadd.f32 %v2735_v12, %v2671_v9 }
 0x3a5   :  { %2902 = vst [vmem:[#allocation11 + $0x20] sm:$0xff] %v2863_v38 }
 0x3a8   :  { %v2800_v59 = vpop.f32.mrf.mxu2  ;;  %v2865_v4 = vpop.f32.mrf.mxu3 }
 0x3a9   :  { %v2801_v14 = vadd.f32 %v2800_v59, %v2736_v56  ;;  %v2673_v53 = vpop.f32.mrf.mxu0  ;;  %v2738_v61 = vpop.f32.mrf.mxu1 }
 0x3aa   :  { %v2674_v18 = vadd.f32 %v2673_v53, %v2609_v50 }
 0x3ab   :  { %v2866_v43 = vadd.f32 %v2865_v4, %v2801_v14 }
 0x3ac   :  { %v2739_v13 = vadd.f32 %v2738_v61, %v2674_v18 }
 0x3ad   :  { %2903 = vst [vmem:[#allocation11 + $0x28] sm:$0xff] %v2866_v43 }
 0x3b0   :  { %v2803_v39 = vpop.f32.mrf.mxu2  ;;  %v2868_v55 = vpop.f32.mrf.mxu3 }
 0x3b1   :  { %v2804_v8 = vadd.f32 %v2803_v39, %v2739_v13  ;;  %v2676_v34 = vpop.f32.mrf.mxu0  ;;  %v2741_v35 = vpop.f32.mrf.mxu1 }
 0x3b2   :  { %v2677_v10 = vadd.f32 %v2676_v34, %v2612_v54 }
 0x3b3   :  { %v2869_v7 = vadd.f32 %v2868_v55, %v2804_v8 }
 0x3b4   :  { %v2742_v42 = vadd.f32 %v2741_v35, %v2677_v10 }
 0x3b5   :  { %2904 = vst [vmem:[#allocation11 + $0x30] sm:$0xff] %v2869_v7 }
 0x3b8   :  { %v2806_v57 = vpop.f32.mrf.mxu2  ;;  %v2871_v27 = vpop.f32.mrf.mxu3 }
 0x3b9   :  { %v2807_v20 = vadd.f32 %v2806_v57, %v2742_v42  ;;  %v2679_v1 = vpop.f32.mrf.mxu0  ;;  %v2744_v15 = vpop.f32.mrf.mxu1 }
 0x3ba   :  { %v2680_v2 = vadd.f32 %v2679_v1, %v5579_v37 }
 0x3bb   :  { %v2872_v0 = vadd.f32 %v2871_v27, %v2807_v20 }
 0x3bc   :  { %v2745_v45 = vadd.f32 %v2744_v15, %v2680_v2 }
 0x3bd   :  { %2905 = vst [vmem:[#allocation11 + $0x38] sm:$0xff] %v2872_v0 }
 0x3c0   :  { %v2809_v5 = vpop.f32.mrf.mxu2  ;;  %v2874_v21 = vpop.f32.mrf.mxu3 }
 0x3c1   :  { %v2810_v17 = vadd.f32 %v2809_v5, %v2745_v45  ;;  %v2682_v3 = vpop.f32.mrf.mxu0  ;;  %v2747_v28 = vpop.f32.mrf.mxu1 }
 0x3c2   :  { %v2683_v26 = vadd.f32 %v2682_v3, %v5602_v47 }
 0x3c3   :  { %v2875_v49 = vadd.f32 %v2874_v21, %v2810_v17 }
 0x3c4   :  { %v2748_v48 = vadd.f32 %v2747_v28, %v2683_v26 }
 0x3c5   :  { %2906 = vst [vmem:[#allocation11 + $0x40] sm:$0xff] %v2875_v49 }
 0x3c8   :  { %v2812_v29 = vpop.f32.mrf.mxu2  ;;  %v2877_v25 = vpop.f32.mrf.mxu3 }
 0x3c9   :  { %v2813_v11 = vadd.f32 %v2812_v29, %v2748_v48  ;;  %v2685_v30 = vpop.f32.mrf.mxu0  ;;  %v2750_v19 = vpop.f32.mrf.mxu1 }
 0x3ca   :  { %v2686_v37 = vadd.f32 %v2685_v30, %v5618_v58 }
 0x3cb   :  { %v2878_v22 = vadd.f32 %v2877_v25, %v2813_v11 }
 0x3cc   :  { %v2751_v41 = vadd.f32 %v2750_v19, %v2686_v37 }
 0x3cd   :  { %2907 = vst [vmem:[#allocation11 + $0x48] sm:$0xff] %v2878_v22 }
 0x3d0   :  { %v2815_v51 = vpop.f32.mrf.mxu2  ;;  %v2880_v52 = vpop.f32.mrf.mxu3 }
 0x3d1   :  { %v2816_v6 = vadd.f32 %v2815_v51, %v2751_v41  ;;  %v2688_v32 = vpop.f32.mrf.mxu0  ;;  %v2753_v16 = vpop.f32.mrf.mxu1 }
 0x3d2   :  { %v2689_v47 = vadd.f32 %v2688_v32, %v5624_v44 }
 0x3d3   :  { %v2881_v60 = vadd.f32 %v2880_v52, %v2816_v6 }
 0x3d4   :  { %v2754_v12 = vadd.f32 %v2753_v16, %v2689_v47 }
 0x3d5   :  { %2908 = vst [vmem:[#allocation11 + $0x50] sm:$0xff] %v2881_v60 }
 0x3d8   :  { %v2818_v63 = vpop.f32.mrf.mxu2  ;;  %v2883_v9 = vpop.f32.mrf.mxu3 }
 0x3d9   :  { %v2819_v38 = vadd.f32 %v2818_v63, %v2754_v12  ;;  %v2691_v36 = vpop.f32.mrf.mxu0  ;;  %v2756_v23 = vpop.f32.mrf.mxu1 }
 0x3da   :  { %v2692_v58 = vadd.f32 %v2691_v36, %v5636_v62 }
 0x3db   :  { %v2884_v56 = vadd.f32 %v2883_v9, %v2819_v38 }
 0x3dc   :  { %v2757_v59 = vadd.f32 %v2756_v23, %v2692_v58 }
 0x3dd   :  { %2909 = vst [vmem:[#allocation11 + $0x58] sm:$0xff] %v2884_v56 }
 0x3e0   :  { %v2821_v50 = vpop.f32.mrf.mxu2  ;;  %v2886_v4 = vpop.f32.mrf.mxu3 }
 0x3e1   :  { %v2822_v14 = vadd.f32 %v2821_v50, %v2757_v59  ;;  %v2694_v53 = vpop.f32.mrf.mxu0  ;;  %v2759_v61 = vpop.f32.mrf.mxu1 }
 0x3e2   :  { %v2695_v44 = vadd.f32 %v2694_v53, %v5642_v31 }
 0x3e3   :  { %v2887_v24 = vadd.f32 %v2886_v4, %v2822_v14 }
 0x3e4   :  { %v2760_v43 = vadd.f32 %v2759_v61, %v2695_v44 }
 0x3e5   :  { %2910 = vst [vmem:[#allocation11 + $0x60] sm:$0xff] %v2887_v24 }
 0x3e8   :  { %v2824_v18 = vpop.f32.mrf.mxu2  ;;  %v2889_v13 = vpop.f32.mrf.mxu3 }
 0x3e9   :  { %v2825_v46 = vadd.f32 %v2824_v18, %v2760_v43  ;;  %v2697_v39 = vpop.f32.mrf.mxu0  ;;  %v2762_v62 = vpop.f32.mrf.mxu1 }
 0x3ea   :  { %v2698_v8 = vadd.f32 %v2697_v39, %v5653_v40 }
 0x3eb   :  { %v2890_v54 = vadd.f32 %v2889_v13, %v2825_v46 }
 0x3ec   :  { %v2763_v55 = vadd.f32 %v2762_v62, %v2698_v8 }
 0x3ed   :  { %2911 = vst [vmem:[#allocation11 + $0x68] sm:$0xff] %v2890_v54 }
 0x3f0   :  { %v2827_v34 = vpop.f32.mrf.mxu2  ;;  %v2892_v7 = vpop.f32.mrf.mxu3 }
 0x3f1   :  { %v2828_v35 = vadd.f32 %v2827_v34, %v2763_v55  ;;  %v2700_v10 = vpop.f32.mrf.mxu0  ;;  %v2765_v31 = vpop.f32.mrf.mxu1 }
 0x3f2   :  { %v2701_v57 = vadd.f32 %v2700_v10, %v5664_v33 }
 0x3f3   :  { %v2893_v42 = vadd.f32 %v2892_v7, %v2828_v35 }
 0x3f4   :  { %v2766_v20 = vadd.f32 %v2765_v31, %v2701_v57 }
 0x3f5   :  { %2912 = vst [vmem:[#allocation11 + $0x70] sm:$0xff] %v2893_v42 }
 0x3f8   :  { %v2830_v27 = vpop.f32.mrf.mxu2  ;;  %v2895_v1 = vpop.f32.mrf.mxu3 }
 0x3f9   :  { %v2831_v40 = vadd.f32 %v2830_v27, %v2766_v20 }
 0x3fb   :  { %v2896_v15 = vadd.f32 %v2895_v1, %v2831_v40 }
 0x3fd   :  { %2913 = vst [vmem:[#allocation11 + $0x78] sm:$0xff] %v2896_v15 }
 0x3fe   :  { %2926 = dma.vmem_to_hbm [thread:$0]  %s2919_s23, 2048, %s2921_s26, [#allocation4], %s3184_s15, %s3184_s15, %s3185_s16  }
 0x3ff   :  { %3177 = dma.done.wait [#allocation4], 2048  }
 0x400   :  { %3178 = vsyncadd [#allocation4], 4294965248 }
 0x401   :  { %2931 = vsyncpa [#allocation3], 1 }
 0x402   :  { %2932 = vsyncpa [#allocation6], 1 }
 0x403   :  { %2933 = vsyncpa [#allocation9], 1 }
 0x404   :  { %2934 = vsyncpa [#allocation4], 1 }

</bundles_post_ra>
